<compile_context>
chip_gen: v7x
topology: tpu7x:2x2x1
jax: 0.10.0
libtpu: 0.0.40
codegen_flags: <defaults>
</compile_context>

<pallas_src>
import functools

import jax
import jax.numpy as jnp
import numpy as np
from jax.experimental import pallas as pl
from jax.experimental.pallas import tpu as pltpu


def _layernorm(v, g, b, eps=1e-5):
    mu = jnp.mean(v, axis=-1, keepdims=True)
    var = jnp.mean((v - mu) ** 2, axis=-1, keepdims=True)
    return (v - mu) * jax.lax.rsqrt(var + eps) * g + b


def clip_layer_kernel(x_ref,
                      ln1_g_ref, ln1_b_ref, ln2_g_ref, ln2_b_ref,
                      w_qkv_ref, b_qkv_ref, w_out_ref, b_out_ref,
                      w_fc1_ref, b_fc1_ref, w_fc2_ref, b_fc2_ref,
                      o_ref, *, n_head, d_head, seq_len):
    x = x_ref[0]                       # (S_pad, D), float32
    Sp, D = x.shape
    scale = 1.0 / (d_head ** 0.5)

    residue = x                        # original input; reused by BOTH residuals

    # ---- layernorm_1 + causal multi-head self-attention ----
    h = _layernorm(x, ln1_g_ref[0], ln1_b_ref[0])

    # QKV projection: bf16 operands, f32 accumulation on the MXU.
    qkv = jnp.dot(h.astype(jnp.bfloat16), w_qkv_ref[...],
                  preferred_element_type=jnp.float32) + b_qkv_ref[0]
    q = qkv[:, :D] * scale             # fold softmax scale into q (S x D, not S x S per head)
    k = qkv[:, D:2 * D]
    v = qkv[:, 2 * D:]

    # Additive causal + key-padding mask (finite -> no NaN on padded rows).
    row = jax.lax.broadcasted_iota(jnp.int32, (Sp, Sp), 0)
    col = jax.lax.broadcasted_iota(jnp.int32, (Sp, Sp), 1)
    mask_bias = jnp.where((col > row) | (col >= seq_len),
                          jnp.float32(-1e30), jnp.float32(0.0))

    attn = jnp.zeros((Sp, D), jnp.float32)
    for hd in range(n_head):           # n_head is static -> unrolled at trace time
        sl = slice(hd * d_head, (hd + 1) * d_head)
        qh = q[:, sl].astype(jnp.bfloat16)
        kh = k[:, sl].astype(jnp.bfloat16)
        vh = v[:, sl].astype(jnp.bfloat16)

        # QK^T without materializing a transpose: contract the last dims.
        s = jax.lax.dot_general(qh, kh, (((1,), (1,)), ((), ())),
                                preferred_element_type=jnp.float32)
        s = s + mask_bias

        # Softmax in f32; reciprocal goes to the EUP slot.
        m = jnp.max(s, axis=-1, keepdims=True)
        e = jnp.exp(s - m)
        p = e * pl.reciprocal(jnp.sum(e, axis=-1, keepdims=True), approx=True)

        pv = jnp.dot(p.astype(jnp.bfloat16), vh,
                     preferred_element_type=jnp.float32)
        # Per-head row slice of the output projection (sublane-aligned rows of
        # w_out) accumulated into a lane-dense (S, D) f32 buffer: no concat.
        attn = attn + jnp.dot(pv.astype(jnp.bfloat16), w_out_ref[sl, :],
                              preferred_element_type=jnp.float32)
    attn = attn + b_out_ref[0]

    x1 = attn + residue

    # ---- layernorm_2 + MLP with QuickGELU ----
    h2 = _layernorm(x1, ln2_g_ref[0], ln2_b_ref[0])
    f = jnp.dot(h2.astype(jnp.bfloat16), w_fc1_ref[...],
                preferred_element_type=jnp.float32) + b_fc1_ref[0]
    f = f * jax.nn.sigmoid(1.702 * f)          # QuickGELU in f32
    f = jnp.dot(f.astype(jnp.bfloat16), w_fc2_ref[...],
                preferred_element_type=jnp.float32) + b_fc2_ref[0]

    # Second residual uses the ORIGINAL input (matches the given forward).
    o_ref[0] = (f + residue).astype(o_ref.dtype)


PARAM_ORDER = ("ln1_g", "ln1_b", "ln2_g", "ln2_b",
               "w_qkv", "b_qkv", "w_out", "b_out",
               "w_fc1", "b_fc1", "w_fc2", "b_fc2")

_BF16_WEIGHTS = ("w_qkv", "w_out", "w_fc1", "w_fc2")


def _full_spec(a):
    # Constant index map -> the parameter block stays resident in VMEM across
    # all grid (batch) steps; no re-DMA after the first fetch.
    nd = a.ndim
    return pl.BlockSpec(a.shape, lambda b, _nd=nd: (0,) * _nd)


def _vmem_limit_bytes(S, D):
    # bf16 matmul weights (worst case: double-buffered by the pipeline).
    w = (3 * D * D + D * D + 4 * D * D + 4 * D * D) * 2 * 2
    # f32 biases / LN params (double-buffered).
    b = (3 * D + D + 4 * D + D + 4 * D) * 4 * 2
    # input/output (1, S, D) f32 blocks, double-buffered.
    io = 2 * 2 * S * D * 4
    # in-kernel intermediates: qkv, mlp activation, score/mask tiles, misc.
    tmp = (3 * S * D + 4 * S * D + 3 * S * S + 4 * S * D) * 4
    est = int((w + b + io + tmp) * 1.25) + (4 << 20)
    # Clamp into a range that is legal on every chip (v7x has 64 MiB physical
    # VMEM per TensorCore, v5e/v6e have 128 MiB).
    return max(32 << 20, min(est, 64 << 20))


def clip_layer(x, params, *, n_head):
    B, S, D = x.shape
    d_head = D // n_head

    # Pad S to a lane-dense multiple of 128 (e.g. CLIP's 77 -> 128); padded
    # keys are masked inside the kernel and padded rows sliced off at the end.
    S_pad = ((S + 127) // 128) * 128
    x_p = x if S_pad == S else jnp.pad(x, ((0, 0), (0, S_pad - S), (0, 0)))

    # Matmul weights in bf16 (native MXU path, half the HBM/VMEM footprint);
    # biases / LN params stay f32.
    cast = dict(params)
    for name in _BF16_WEIGHTS:
        cast[name] = params[name].astype(jnp.bfloat16)
    plist = [cast[k] for k in PARAM_ORDER]

    out = pl.pallas_call(
        functools.partial(clip_layer_kernel, n_head=n_head, d_head=d_head,
                          seq_len=S),
        out_shape=jax.ShapeDtypeStruct((B, S_pad, D), x.dtype),
        grid_spec=pltpu.PrefetchScalarGridSpec(
            num_scalar_prefetch=0,
            grid=(B,),
            in_specs=[pl.BlockSpec((1, S_pad, D), lambda b: (b, 0, 0))]
                     + [_full_spec(p) for p in plist],
            out_specs=pl.BlockSpec((1, S_pad, D), lambda b: (b, 0, 0)),
        ),
        compiler_params=pltpu.CompilerParams(
            dimension_semantics=("parallel",),
            vmem_limit_bytes=_vmem_limit_bytes(S_pad, D)),
    )(x_p, *plist)
    return out[:, :S, :]


def clip_layer_ref(x, params, *, n_head):
    """Pure-JAX f32 reference mirroring the PyTorch forward semantics."""
    B, S, D = x.shape
    dh = D // n_head
    residue = x

    h = _layernorm(x, params["ln1_g"][0], params["ln1_b"][0])
    qkv = h @ params["w_qkv"] + params["b_qkv"][0]
    q, k, v = qkv[..., :D], qkv[..., D:2 * D], qkv[..., 2 * D:]
    q = q.reshape(B, S, n_head, dh).transpose(0, 2, 1, 3)
    k = k.reshape(B, S, n_head, dh).transpose(0, 2, 1, 3)
    v = v.reshape(B, S, n_head, dh).transpose(0, 2, 1, 3)
    w = jnp.einsum("bhqd,bhkd->bhqk", q, k)
    mask = jnp.triu(jnp.ones((S, S), bool), 1)
    w = jnp.where(mask, -jnp.inf, w) / jnp.sqrt(dh)
    w = jax.nn.softmax(w, axis=-1)
    o = jnp.einsum("bhqk,bhkd->bhqd", w, v)
    o = o.transpose(0, 2, 1, 3).reshape(B, S, D)
    o = o @ params["w_out"] + params["b_out"][0]

    x1 = o + residue
    h2 = _layernorm(x1, params["ln2_g"][0], params["ln2_b"][0])
    f = h2 @ params["w_fc1"] + params["b_fc1"][0]
    f = f * jax.nn.sigmoid(1.702 * f)
    f = f @ params["w_fc2"] + params["b_fc2"][0]
    return f + residue


def make_params(key, n_embd):
    ks = jax.random.split(key, 8)
    D = n_embd
    return {
        "ln1_g": jnp.ones((1, D), jnp.float32),
        "ln1_b": jnp.zeros((1, D), jnp.float32),
        "ln2_g": jnp.ones((1, D), jnp.float32),
        "ln2_b": jnp.zeros((1, D), jnp.float32),
        "w_qkv": 0.05 * jax.random.normal(ks[0], (D, 3 * D), jnp.float32),
        "b_qkv": 0.05 * jax.random.normal(ks[1], (1, 3 * D), jnp.float32),
        "w_out": 0.05 * jax.random.normal(ks[2], (D, D), jnp.float32),
        "b_out": 0.05 * jax.random.normal(ks[3], (1, D), jnp.float32),
        "w_fc1": 0.05 * jax.random.normal(ks[4], (D, 4 * D), jnp.float32),
        "b_fc1": 0.05 * jax.random.normal(ks[5], (1, 4 * D), jnp.float32),
        "w_fc2": 0.05 * jax.random.normal(ks[6], (4 * D, D), jnp.float32),
        "b_fc2": 0.05 * jax.random.normal(ks[7], (1, D), jnp.float32),
    }


if __name__ == "__main__":
    B, S, n_embd, n_head = 2, 8, 32, 4
    key = jax.random.PRNGKey(0)
    kx, kp = jax.random.split(key)
    x = jax.random.normal(kx, (B, S, n_embd), jnp.float32)
    params = make_params(kp, n_embd)

    out = jax.block_until_ready(clip_layer(x, params, n_head=n_head))
    ref = jax.block_until_ready(clip_layer_ref(x, params, n_head=n_head))

    # bf16 matmul operands + approx reciprocal -> slightly looser tolerance
    # than a pure-f32 implementation.
    np.testing.assert_allclose(np.asarray(out), np.asarray(ref),
                               rtol=2e-2, atol=2e-2)
    print("KERNEL_OK")
</pallas_src>

<mosaic_0001>
module attributes {stable_mosaic.version = 11 : i64} {
  func.func @clip_layer_kernel(%arg0: i32, %arg1: memref<1x128x32xf32, #tpu.memory_space<vmem>>, %arg2: memref<1x32xf32, #tpu.memory_space<vmem>>, %arg3: memref<1x32xf32, #tpu.memory_space<vmem>>, %arg4: memref<1x32xf32, #tpu.memory_space<vmem>>, %arg5: memref<1x32xf32, #tpu.memory_space<vmem>>, %arg6: memref<32x96xbf16, #tpu.memory_space<vmem>>, %arg7: memref<1x96xf32, #tpu.memory_space<vmem>>, %arg8: memref<32x32xbf16, #tpu.memory_space<vmem>>, %arg9: memref<1x32xf32, #tpu.memory_space<vmem>>, %arg10: memref<32x128xbf16, #tpu.memory_space<vmem>>, %arg11: memref<1x128xf32, #tpu.memory_space<vmem>>, %arg12: memref<128x32xbf16, #tpu.memory_space<vmem>>, %arg13: memref<1x32xf32, #tpu.memory_space<vmem>>, %arg14: memref<1x128x32xf32, #tpu.memory_space<vmem>>) attributes {dimension_semantics = [#tpu.dimension_semantics<parallel>], iteration_bounds = array<i64: 2>, scalar_prefetch = 0 : i64, scratch_operands = 0 : i64, tpu.core_type = #tpu.core_type<tc>, window_params = [{transform_indices = @transform_0, window_bounds = array<i64: 1, 128, 32>}, {pipeline_mode = #tpu.pipeline_mode<synchronous>, transform_indices = @transform_1, window_bounds = array<i64: 1, 32>}, {pipeline_mode = #tpu.pipeline_mode<synchronous>, transform_indices = @transform_2, window_bounds = array<i64: 1, 32>}, {pipeline_mode = #tpu.pipeline_mode<synchronous>, transform_indices = @transform_3, window_bounds = array<i64: 1, 32>}, {pipeline_mode = #tpu.pipeline_mode<synchronous>, transform_indices = @transform_4, window_bounds = array<i64: 1, 32>}, {pipeline_mode = #tpu.pipeline_mode<synchronous>, transform_indices = @transform_5, window_bounds = array<i64: 32, 96>}, {pipeline_mode = #tpu.pipeline_mode<synchronous>, transform_indices = @transform_6, window_bounds = array<i64: 1, 96>}, {pipeline_mode = #tpu.pipeline_mode<synchronous>, transform_indices = @transform_7, window_bounds = array<i64: 32, 32>}, {pipeline_mode = #tpu.pipeline_mode<synchronous>, transform_indices = @transform_8, window_bounds = array<i64: 1, 32>}, {pipeline_mode = #tpu.pipeline_mode<synchronous>, transform_indices = @transform_9, window_bounds = array<i64: 32, 128>}, {pipeline_mode = #tpu.pipeline_mode<synchronous>, transform_indices = @transform_10, window_bounds = array<i64: 1, 128>}, {pipeline_mode = #tpu.pipeline_mode<synchronous>, transform_indices = @transform_11, window_bounds = array<i64: 128, 32>}, {pipeline_mode = #tpu.pipeline_mode<synchronous>, transform_indices = @transform_12, window_bounds = array<i64: 1, 32>}, {transform_indices = @transform_13, window_bounds = array<i64: 1, 128, 32>}]} {
    %c0 = arith.constant 0 : index
    %c0_0 = arith.constant 0 : index
    %c0_1 = arith.constant 0 : index
    %0 = vector.load %arg1[%c0, %c0_0, %c0_1] : memref<1x128x32xf32, #tpu.memory_space<vmem>>, vector<1x128x32xf32>
    %1 = vector.shape_cast %0 : vector<1x128x32xf32> to vector<128x32xf32>
    %c0_2 = arith.constant 0 : index
    %c0_3 = arith.constant 0 : index
    %2 = vector.load %arg2[%c0_2, %c0_3] : memref<1x32xf32, #tpu.memory_space<vmem>>, vector<1x32xf32>
    %3 = vector.shape_cast %2 : vector<1x32xf32> to vector<32xf32>
    %c0_4 = arith.constant 0 : index
    %c0_5 = arith.constant 0 : index
    %4 = vector.load %arg3[%c0_4, %c0_5] : memref<1x32xf32, #tpu.memory_space<vmem>>, vector<1x32xf32>
    %5 = vector.shape_cast %4 : vector<1x32xf32> to vector<32xf32>
    %cst = arith.constant dense<0.000000e+00> : vector<128xf32>
    %6 = vector.multi_reduction <add>, %1, %cst [1] : vector<128x32xf32> to vector<128xf32>
    %7 = vector.shape_cast %6 : vector<128xf32> to vector<128x1xf32>
    %cst_6 = arith.constant 3.200000e+01 : f32
    %8 = vector.broadcast %cst_6 : f32 to vector<128x1xf32>
    %9 = arith.divf %7, %8 : vector<128x1xf32>
    %10 = vector.broadcast %9 : vector<128x1xf32> to vector<128x32xf32>
    %11 = arith.subf %1, %10 : vector<128x32xf32>
    %12 = arith.mulf %11, %11 : vector<128x32xf32>
    %cst_7 = arith.constant dense<0.000000e+00> : vector<128xf32>
    %13 = vector.multi_reduction <add>, %12, %cst_7 [1] : vector<128x32xf32> to vector<128xf32>
    %14 = vector.shape_cast %13 : vector<128xf32> to vector<128x1xf32>
    %cst_8 = arith.constant 3.200000e+01 : f32
    %15 = vector.broadcast %cst_8 : f32 to vector<128x1xf32>
    %16 = arith.divf %14, %15 : vector<128x1xf32>
    %17 = vector.broadcast %9 : vector<128x1xf32> to vector<128x32xf32>
    %18 = arith.subf %1, %17 : vector<128x32xf32>
    %cst_9 = arith.constant 9.99999974E-6 : f32
    %19 = vector.broadcast %cst_9 : f32 to vector<128x1xf32>
    %20 = arith.addf %16, %19 : vector<128x1xf32>
    %21 = math.rsqrt %20 : vector<128x1xf32>
    %22 = vector.broadcast %21 : vector<128x1xf32> to vector<128x32xf32>
    %23 = arith.mulf %18, %22 : vector<128x32xf32>
    %24 = vector.shape_cast %3 : vector<32xf32> to vector<1x32xf32>
    %25 = vector.broadcast %24 : vector<1x32xf32> to vector<128x32xf32>
    %26 = arith.mulf %23, %25 : vector<128x32xf32>
    %27 = vector.shape_cast %5 : vector<32xf32> to vector<1x32xf32>
    %28 = vector.broadcast %27 : vector<1x32xf32> to vector<128x32xf32>
    %29 = arith.addf %26, %28 : vector<128x32xf32>
    %30 = arith.truncf %29 : vector<128x32xf32> to vector<128x32xbf16>
    %c0_10 = arith.constant 0 : index
    %c0_11 = arith.constant 0 : index
    %31 = vector.load %arg6[%c0_10, %c0_11] : memref<32x96xbf16, #tpu.memory_space<vmem>>, vector<32x96xbf16>
    %cst_12 = arith.constant dense<0.000000e+00> : vector<128x96xf32>
    %32 = tpu.matmul %30, %31, %cst_12 {dimension_numbers = #tpu.dot_dimension_numbers<[1], [0], [0], [1], [0, 0, 1, 1], [], []>} : vector<128x32xbf16>, vector<32x96xbf16>, vector<128x96xf32> -> vector<128x96xf32>
    %c0_13 = arith.constant 0 : index
    %c0_14 = arith.constant 0 : index
    %33 = vector.load %arg7[%c0_13, %c0_14] : memref<1x96xf32, #tpu.memory_space<vmem>>, vector<1x96xf32>
    %34 = vector.shape_cast %33 : vector<1x96xf32> to vector<96xf32>
    %35 = vector.shape_cast %34 : vector<96xf32> to vector<1x96xf32>
    %36 = vector.broadcast %35 : vector<1x96xf32> to vector<128x96xf32>
    %37 = arith.addf %32, %36 : vector<128x96xf32>
    %38 = vector.extract_strided_slice %37 {offsets = [0, 0], sizes = [128, 32], strides = [1, 1]} : vector<128x96xf32> to vector<128x32xf32>
    %cst_15 = arith.constant 0.353553385 : f32
    %39 = vector.broadcast %cst_15 : f32 to vector<128x32xf32>
    %40 = arith.mulf %38, %39 : vector<128x32xf32>
    %41 = vector.extract_strided_slice %37 {offsets = [0, 32], sizes = [128, 32], strides = [1, 1]} : vector<128x96xf32> to vector<128x32xf32>
    %42 = vector.extract_strided_slice %37 {offsets = [0, 64], sizes = [128, 32], strides = [1, 1]} : vector<128x96xf32> to vector<128x32xf32>
    %43 = tpu.iota {dimensions = array<i32: 0>} : vector<128x128xi32>
    %44 = tpu.iota {dimensions = array<i32: 1>} : vector<128x128xi32>
    %45 = arith.cmpi sgt, %44, %43 : vector<128x128xi32>
    %c8_i32 = arith.constant 8 : i32
    %46 = vector.broadcast %c8_i32 : i32 to vector<128x128xi32>
    %47 = arith.cmpi sge, %44, %46 : vector<128x128xi32>
    %48 = arith.ori %45, %47 : vector<128x128xi1>
    %cst_16 = arith.constant -1.000000e+30 : f32
    %cst_17 = arith.constant 0.000000e+00 : f32
    %49 = vector.broadcast %cst_16 : f32 to vector<128x128xf32>
    %50 = vector.broadcast %cst_17 : f32 to vector<128x128xf32>
    %51 = arith.select %48, %49, %50 : vector<128x128xi1>, vector<128x128xf32>
    %cst_18 = arith.constant 0.000000e+00 : f32
    %52 = vector.broadcast %cst_18 : f32 to vector<128x32xf32>
    %53 = vector.extract_strided_slice %40 {offsets = [0, 0], sizes = [128, 8], strides = [1, 1]} : vector<128x32xf32> to vector<128x8xf32>
    %54 = arith.truncf %53 : vector<128x8xf32> to vector<128x8xbf16>
    %55 = vector.extract_strided_slice %41 {offsets = [0, 0], sizes = [128, 8], strides = [1, 1]} : vector<128x32xf32> to vector<128x8xf32>
    %56 = arith.truncf %55 : vector<128x8xf32> to vector<128x8xbf16>
    %57 = vector.extract_strided_slice %42 {offsets = [0, 0], sizes = [128, 8], strides = [1, 1]} : vector<128x32xf32> to vector<128x8xf32>
    %58 = arith.truncf %57 : vector<128x8xf32> to vector<128x8xbf16>
    %cst_19 = arith.constant dense<0.000000e+00> : vector<128x128xf32>
    %59 = tpu.matmul %54, %56, %cst_19 {dimension_numbers = #tpu.dot_dimension_numbers<[1], [1], [0], [0], [0, 0, 1, 0], [], []>} : vector<128x8xbf16>, vector<128x8xbf16>, vector<128x128xf32> -> vector<128x128xf32>
    %60 = arith.addf %59, %51 : vector<128x128xf32>
    %cst_20 = arith.constant dense<0xFF800000> : vector<128xf32>
    %61 = vector.multi_reduction <maximumf>, %60, %cst_20 [1] : vector<128x128xf32> to vector<128xf32>
    %62 = vector.shape_cast %61 : vector<128xf32> to vector<128x1xf32>
    %63 = vector.broadcast %62 : vector<128x1xf32> to vector<128x128xf32>
    %64 = arith.subf %60, %63 : vector<128x128xf32>
    %65 = math.exp %64 : vector<128x128xf32>
    %cst_21 = arith.constant dense<0.000000e+00> : vector<128xf32>
    %66 = vector.multi_reduction <add>, %65, %cst_21 [1] : vector<128x128xf32> to vector<128xf32>
    %67 = vector.shape_cast %66 : vector<128xf32> to vector<128x1xf32>
    %68 = tpu.reciprocal %67 {approx = true} : vector<128x1xf32> -> vector<128x1xf32>
    %69 = vector.broadcast %68 : vector<128x1xf32> to vector<128x128xf32>
    %70 = arith.mulf %65, %69 : vector<128x128xf32>
    %71 = arith.truncf %70 : vector<128x128xf32> to vector<128x128xbf16>
    %cst_22 = arith.constant dense<0.000000e+00> : vector<128x8xf32>
    %72 = tpu.matmul %71, %58, %cst_22 {dimension_numbers = #tpu.dot_dimension_numbers<[1], [0], [0], [1], [0, 0, 1, 1], [], []>} : vector<128x128xbf16>, vector<128x8xbf16>, vector<128x8xf32> -> vector<128x8xf32>
    %73 = arith.truncf %72 : vector<128x8xf32> to vector<128x8xbf16>
    %c0_23 = arith.constant 0 : index
    %c0_24 = arith.constant 0 : index
    %74 = vector.load %arg8[%c0_23, %c0_24] : memref<32x32xbf16, #tpu.memory_space<vmem>>, vector<8x32xbf16>
    %cst_25 = arith.constant dense<0.000000e+00> : vector<128x32xf32>
    %75 = tpu.matmul %73, %74, %cst_25 {dimension_numbers = #tpu.dot_dimension_numbers<[1], [0], [0], [1], [0, 0, 1, 1], [], []>} : vector<128x8xbf16>, vector<8x32xbf16>, vector<128x32xf32> -> vector<128x32xf32>
    %76 = arith.addf %52, %75 : vector<128x32xf32>
    %77 = vector.extract_strided_slice %40 {offsets = [0, 8], sizes = [128, 8], strides = [1, 1]} : vector<128x32xf32> to vector<128x8xf32>
    %78 = arith.truncf %77 : vector<128x8xf32> to vector<128x8xbf16>
    %79 = vector.extract_strided_slice %41 {offsets = [0, 8], sizes = [128, 8], strides = [1, 1]} : vector<128x32xf32> to vector<128x8xf32>
    %80 = arith.truncf %79 : vector<128x8xf32> to vector<128x8xbf16>
    %81 = vector.extract_strided_slice %42 {offsets = [0, 8], sizes = [128, 8], strides = [1, 1]} : vector<128x32xf32> to vector<128x8xf32>
    %82 = arith.truncf %81 : vector<128x8xf32> to vector<128x8xbf16>
    %cst_26 = arith.constant dense<0.000000e+00> : vector<128x128xf32>
    %83 = tpu.matmul %78, %80, %cst_26 {dimension_numbers = #tpu.dot_dimension_numbers<[1], [1], [0], [0], [0, 0, 1, 0], [], []>} : vector<128x8xbf16>, vector<128x8xbf16>, vector<128x128xf32> -> vector<128x128xf32>
    %84 = arith.addf %83, %51 : vector<128x128xf32>
    %cst_27 = arith.constant dense<0xFF800000> : vector<128xf32>
    %85 = vector.multi_reduction <maximumf>, %84, %cst_27 [1] : vector<128x128xf32> to vector<128xf32>
    %86 = vector.shape_cast %85 : vector<128xf32> to vector<128x1xf32>
    %87 = vector.broadcast %86 : vector<128x1xf32> to vector<128x128xf32>
    %88 = arith.subf %84, %87 : vector<128x128xf32>
    %89 = math.exp %88 : vector<128x128xf32>
    %cst_28 = arith.constant dense<0.000000e+00> : vector<128xf32>
    %90 = vector.multi_reduction <add>, %89, %cst_28 [1] : vector<128x128xf32> to vector<128xf32>
    %91 = vector.shape_cast %90 : vector<128xf32> to vector<128x1xf32>
    %92 = tpu.reciprocal %91 {approx = true} : vector<128x1xf32> -> vector<128x1xf32>
    %93 = vector.broadcast %92 : vector<128x1xf32> to vector<128x128xf32>
    %94 = arith.mulf %89, %93 : vector<128x128xf32>
    %95 = arith.truncf %94 : vector<128x128xf32> to vector<128x128xbf16>
    %cst_29 = arith.constant dense<0.000000e+00> : vector<128x8xf32>
    %96 = tpu.matmul %95, %82, %cst_29 {dimension_numbers = #tpu.dot_dimension_numbers<[1], [0], [0], [1], [0, 0, 1, 1], [], []>} : vector<128x128xbf16>, vector<128x8xbf16>, vector<128x8xf32> -> vector<128x8xf32>
    %97 = arith.truncf %96 : vector<128x8xf32> to vector<128x8xbf16>
    %c8 = arith.constant 8 : index
    %c0_30 = arith.constant 0 : index
    %98 = vector.load %arg8[%c8, %c0_30] : memref<32x32xbf16, #tpu.memory_space<vmem>>, vector<8x32xbf16>
    %cst_31 = arith.constant dense<0.000000e+00> : vector<128x32xf32>
    %99 = tpu.matmul %97, %98, %cst_31 {dimension_numbers = #tpu.dot_dimension_numbers<[1], [0], [0], [1], [0, 0, 1, 1], [], []>} : vector<128x8xbf16>, vector<8x32xbf16>, vector<128x32xf32> -> vector<128x32xf32>
    %100 = arith.addf %76, %99 : vector<128x32xf32>
    %101 = vector.extract_strided_slice %40 {offsets = [0, 16], sizes = [128, 8], strides = [1, 1]} : vector<128x32xf32> to vector<128x8xf32>
    %102 = arith.truncf %101 : vector<128x8xf32> to vector<128x8xbf16>
    %103 = vector.extract_strided_slice %41 {offsets = [0, 16], sizes = [128, 8], strides = [1, 1]} : vector<128x32xf32> to vector<128x8xf32>
    %104 = arith.truncf %103 : vector<128x8xf32> to vector<128x8xbf16>
    %105 = vector.extract_strided_slice %42 {offsets = [0, 16], sizes = [128, 8], strides = [1, 1]} : vector<128x32xf32> to vector<128x8xf32>
    %106 = arith.truncf %105 : vector<128x8xf32> to vector<128x8xbf16>
    %cst_32 = arith.constant dense<0.000000e+00> : vector<128x128xf32>
    %107 = tpu.matmul %102, %104, %cst_32 {dimension_numbers = #tpu.dot_dimension_numbers<[1], [1], [0], [0], [0, 0, 1, 0], [], []>} : vector<128x8xbf16>, vector<128x8xbf16>, vector<128x128xf32> -> vector<128x128xf32>
    %108 = arith.addf %107, %51 : vector<128x128xf32>
    %cst_33 = arith.constant dense<0xFF800000> : vector<128xf32>
    %109 = vector.multi_reduction <maximumf>, %108, %cst_33 [1] : vector<128x128xf32> to vector<128xf32>
    %110 = vector.shape_cast %109 : vector<128xf32> to vector<128x1xf32>
    %111 = vector.broadcast %110 : vector<128x1xf32> to vector<128x128xf32>
    %112 = arith.subf %108, %111 : vector<128x128xf32>
    %113 = math.exp %112 : vector<128x128xf32>
    %cst_34 = arith.constant dense<0.000000e+00> : vector<128xf32>
    %114 = vector.multi_reduction <add>, %113, %cst_34 [1] : vector<128x128xf32> to vector<128xf32>
    %115 = vector.shape_cast %114 : vector<128xf32> to vector<128x1xf32>
    %116 = tpu.reciprocal %115 {approx = true} : vector<128x1xf32> -> vector<128x1xf32>
    %117 = vector.broadcast %116 : vector<128x1xf32> to vector<128x128xf32>
    %118 = arith.mulf %113, %117 : vector<128x128xf32>
    %119 = arith.truncf %118 : vector<128x128xf32> to vector<128x128xbf16>
    %cst_35 = arith.constant dense<0.000000e+00> : vector<128x8xf32>
    %120 = tpu.matmul %119, %106, %cst_35 {dimension_numbers = #tpu.dot_dimension_numbers<[1], [0], [0], [1], [0, 0, 1, 1], [], []>} : vector<128x128xbf16>, vector<128x8xbf16>, vector<128x8xf32> -> vector<128x8xf32>
    %121 = arith.truncf %120 : vector<128x8xf32> to vector<128x8xbf16>
    %c16 = arith.constant 16 : index
    %c0_36 = arith.constant 0 : index
    %122 = vector.load %arg8[%c16, %c0_36] : memref<32x32xbf16, #tpu.memory_space<vmem>>, vector<8x32xbf16>
    %cst_37 = arith.constant dense<0.000000e+00> : vector<128x32xf32>
    %123 = tpu.matmul %121, %122, %cst_37 {dimension_numbers = #tpu.dot_dimension_numbers<[1], [0], [0], [1], [0, 0, 1, 1], [], []>} : vector<128x8xbf16>, vector<8x32xbf16>, vector<128x32xf32> -> vector<128x32xf32>
    %124 = arith.addf %100, %123 : vector<128x32xf32>
    %125 = vector.extract_strided_slice %40 {offsets = [0, 24], sizes = [128, 8], strides = [1, 1]} : vector<128x32xf32> to vector<128x8xf32>
    %126 = arith.truncf %125 : vector<128x8xf32> to vector<128x8xbf16>
    %127 = vector.extract_strided_slice %41 {offsets = [0, 24], sizes = [128, 8], strides = [1, 1]} : vector<128x32xf32> to vector<128x8xf32>
    %128 = arith.truncf %127 : vector<128x8xf32> to vector<128x8xbf16>
    %129 = vector.extract_strided_slice %42 {offsets = [0, 24], sizes = [128, 8], strides = [1, 1]} : vector<128x32xf32> to vector<128x8xf32>
    %130 = arith.truncf %129 : vector<128x8xf32> to vector<128x8xbf16>
    %cst_38 = arith.constant dense<0.000000e+00> : vector<128x128xf32>
    %131 = tpu.matmul %126, %128, %cst_38 {dimension_numbers = #tpu.dot_dimension_numbers<[1], [1], [0], [0], [0, 0, 1, 0], [], []>} : vector<128x8xbf16>, vector<128x8xbf16>, vector<128x128xf32> -> vector<128x128xf32>
    %132 = arith.addf %131, %51 : vector<128x128xf32>
    %cst_39 = arith.constant dense<0xFF800000> : vector<128xf32>
    %133 = vector.multi_reduction <maximumf>, %132, %cst_39 [1] : vector<128x128xf32> to vector<128xf32>
    %134 = vector.shape_cast %133 : vector<128xf32> to vector<128x1xf32>
    %135 = vector.broadcast %134 : vector<128x1xf32> to vector<128x128xf32>
    %136 = arith.subf %132, %135 : vector<128x128xf32>
    %137 = math.exp %136 : vector<128x128xf32>
    %cst_40 = arith.constant dense<0.000000e+00> : vector<128xf32>
    %138 = vector.multi_reduction <add>, %137, %cst_40 [1] : vector<128x128xf32> to vector<128xf32>
    %139 = vector.shape_cast %138 : vector<128xf32> to vector<128x1xf32>
    %140 = tpu.reciprocal %139 {approx = true} : vector<128x1xf32> -> vector<128x1xf32>
    %141 = vector.broadcast %140 : vector<128x1xf32> to vector<128x128xf32>
    %142 = arith.mulf %137, %141 : vector<128x128xf32>
    %143 = arith.truncf %142 : vector<128x128xf32> to vector<128x128xbf16>
    %cst_41 = arith.constant dense<0.000000e+00> : vector<128x8xf32>
    %144 = tpu.matmul %143, %130, %cst_41 {dimension_numbers = #tpu.dot_dimension_numbers<[1], [0], [0], [1], [0, 0, 1, 1], [], []>} : vector<128x128xbf16>, vector<128x8xbf16>, vector<128x8xf32> -> vector<128x8xf32>
    %145 = arith.truncf %144 : vector<128x8xf32> to vector<128x8xbf16>
    %c24 = arith.constant 24 : index
    %c0_42 = arith.constant 0 : index
    %146 = vector.load %arg8[%c24, %c0_42] : memref<32x32xbf16, #tpu.memory_space<vmem>>, vector<8x32xbf16>
    %cst_43 = arith.constant dense<0.000000e+00> : vector<128x32xf32>
    %147 = tpu.matmul %145, %146, %cst_43 {dimension_numbers = #tpu.dot_dimension_numbers<[1], [0], [0], [1], [0, 0, 1, 1], [], []>} : vector<128x8xbf16>, vector<8x32xbf16>, vector<128x32xf32> -> vector<128x32xf32>
    %148 = arith.addf %124, %147 : vector<128x32xf32>
    %c0_44 = arith.constant 0 : index
    %c0_45 = arith.constant 0 : index
    %149 = vector.load %arg9[%c0_44, %c0_45] : memref<1x32xf32, #tpu.memory_space<vmem>>, vector<1x32xf32>
    %150 = vector.shape_cast %149 : vector<1x32xf32> to vector<32xf32>
    %151 = vector.shape_cast %150 : vector<32xf32> to vector<1x32xf32>
    %152 = vector.broadcast %151 : vector<1x32xf32> to vector<128x32xf32>
    %153 = arith.addf %148, %152 : vector<128x32xf32>
    %154 = arith.addf %153, %1 : vector<128x32xf32>
    %c0_46 = arith.constant 0 : index
    %c0_47 = arith.constant 0 : index
    %155 = vector.load %arg4[%c0_46, %c0_47] : memref<1x32xf32, #tpu.memory_space<vmem>>, vector<1x32xf32>
    %156 = vector.shape_cast %155 : vector<1x32xf32> to vector<32xf32>
    %c0_48 = arith.constant 0 : index
    %c0_49 = arith.constant 0 : index
    %157 = vector.load %arg5[%c0_48, %c0_49] : memref<1x32xf32, #tpu.memory_space<vmem>>, vector<1x32xf32>
    %158 = vector.shape_cast %157 : vector<1x32xf32> to vector<32xf32>
    %cst_50 = arith.constant dense<0.000000e+00> : vector<128xf32>
    %159 = vector.multi_reduction <add>, %154, %cst_50 [1] : vector<128x32xf32> to vector<128xf32>
    %160 = vector.shape_cast %159 : vector<128xf32> to vector<128x1xf32>
    %cst_51 = arith.constant 3.200000e+01 : f32
    %161 = vector.broadcast %cst_51 : f32 to vector<128x1xf32>
    %162 = arith.divf %160, %161 : vector<128x1xf32>
    %163 = vector.broadcast %162 : vector<128x1xf32> to vector<128x32xf32>
    %164 = arith.subf %154, %163 : vector<128x32xf32>
    %165 = arith.mulf %164, %164 : vector<128x32xf32>
    %cst_52 = arith.constant dense<0.000000e+00> : vector<128xf32>
    %166 = vector.multi_reduction <add>, %165, %cst_52 [1] : vector<128x32xf32> to vector<128xf32>
    %167 = vector.shape_cast %166 : vector<128xf32> to vector<128x1xf32>
    %cst_53 = arith.constant 3.200000e+01 : f32
    %168 = vector.broadcast %cst_53 : f32 to vector<128x1xf32>
    %169 = arith.divf %167, %168 : vector<128x1xf32>
    %170 = vector.broadcast %162 : vector<128x1xf32> to vector<128x32xf32>
    %171 = arith.subf %154, %170 : vector<128x32xf32>
    %cst_54 = arith.constant 9.99999974E-6 : f32
    %172 = vector.broadcast %cst_54 : f32 to vector<128x1xf32>
    %173 = arith.addf %169, %172 : vector<128x1xf32>
    %174 = math.rsqrt %173 : vector<128x1xf32>
    %175 = vector.broadcast %174 : vector<128x1xf32> to vector<128x32xf32>
    %176 = arith.mulf %171, %175 : vector<128x32xf32>
    %177 = vector.shape_cast %156 : vector<32xf32> to vector<1x32xf32>
    %178 = vector.broadcast %177 : vector<1x32xf32> to vector<128x32xf32>
    %179 = arith.mulf %176, %178 : vector<128x32xf32>
    %180 = vector.shape_cast %158 : vector<32xf32> to vector<1x32xf32>
    %181 = vector.broadcast %180 : vector<1x32xf32> to vector<128x32xf32>
    %182 = arith.addf %179, %181 : vector<128x32xf32>
    %183 = arith.truncf %182 : vector<128x32xf32> to vector<128x32xbf16>
    %c0_55 = arith.constant 0 : index
    %c0_56 = arith.constant 0 : index
    %184 = vector.load %arg10[%c0_55, %c0_56] : memref<32x128xbf16, #tpu.memory_space<vmem>>, vector<32x128xbf16>
    %cst_57 = arith.constant dense<0.000000e+00> : vector<128x128xf32>
    %185 = tpu.matmul %183, %184, %cst_57 {dimension_numbers = #tpu.dot_dimension_numbers<[1], [0], [0], [1], [0, 0, 1, 1], [], []>} : vector<128x32xbf16>, vector<32x128xbf16>, vector<128x128xf32> -> vector<128x128xf32>
    %c0_58 = arith.constant 0 : index
    %c0_59 = arith.constant 0 : index
    %186 = vector.load %arg11[%c0_58, %c0_59] : memref<1x128xf32, #tpu.memory_space<vmem>>, vector<1x128xf32>
    %187 = vector.shape_cast %186 : vector<1x128xf32> to vector<128xf32>
    %188 = vector.shape_cast %187 : vector<128xf32> to vector<1x128xf32>
    %189 = vector.broadcast %188 : vector<1x128xf32> to vector<128x128xf32>
    %190 = arith.addf %185, %189 : vector<128x128xf32>
    %cst_60 = arith.constant 1.702000e+00 : f32
    %191 = vector.broadcast %cst_60 : f32 to vector<128x128xf32>
    %192 = arith.mulf %191, %190 : vector<128x128xf32>
    %193 = arith.negf %192 : vector<128x128xf32>
    %194 = math.exp %193 : vector<128x128xf32>
    %cst_61 = arith.constant 1.000000e+00 : f32
    %195 = vector.broadcast %cst_61 : f32 to vector<128x128xf32>
    %196 = arith.addf %195, %194 : vector<128x128xf32>
    %197 = arith.divf %195, %196 : vector<128x128xf32>
    %198 = arith.mulf %190, %197 : vector<128x128xf32>
    %199 = arith.truncf %198 : vector<128x128xf32> to vector<128x128xbf16>
    %c0_62 = arith.constant 0 : index
    %c0_63 = arith.constant 0 : index
    %200 = vector.load %arg12[%c0_62, %c0_63] : memref<128x32xbf16, #tpu.memory_space<vmem>>, vector<128x32xbf16>
    %cst_64 = arith.constant dense<0.000000e+00> : vector<128x32xf32>
    %201 = tpu.matmul %199, %200, %cst_64 {dimension_numbers = #tpu.dot_dimension_numbers<[1], [0], [0], [1], [0, 0, 1, 1], [], []>} : vector<128x128xbf16>, vector<128x32xbf16>, vector<128x32xf32> -> vector<128x32xf32>
    %c0_65 = arith.constant 0 : index
    %c0_66 = arith.constant 0 : index
    %202 = vector.load %arg13[%c0_65, %c0_66] : memref<1x32xf32, #tpu.memory_space<vmem>>, vector<1x32xf32>
    %203 = vector.shape_cast %202 : vector<1x32xf32> to vector<32xf32>
    %204 = vector.shape_cast %203 : vector<32xf32> to vector<1x32xf32>
    %205 = vector.broadcast %204 : vector<1x32xf32> to vector<128x32xf32>
    %206 = arith.addf %201, %205 : vector<128x32xf32>
    %207 = arith.addf %206, %1 : vector<128x32xf32>
    %c0_67 = arith.constant 0 : index
    %c0_68 = arith.constant 0 : index
    %c0_69 = arith.constant 0 : index
    %208 = vector.load %arg14[%c0_67, %c0_68, %c0_69] : memref<1x128x32xf32, #tpu.memory_space<vmem>>, vector<1x128x32xf32>
    %209 = vector.shape_cast %208 : vector<1x128x32xf32> to vector<128x32xf32>
    %210 = vector.shape_cast %207 : vector<128x32xf32> to vector<1x128x32xf32>
    tpu.vector_store %arg14[%c0_67, %c0_68, %c0_69], %210 {strides = array<i32>} : memref<1x128x32xf32, #tpu.memory_space<vmem>>, vector<1x128x32xf32>,
    return
  }
  func.func @transform_0(%arg0: i32) -> (i32, i32, i32) {
    %c0_i32 = arith.constant 0 : i32
    %c0_i32_0 = arith.constant 0 : i32
    %c0_i32_1 = arith.constant 0 : i32
    return %arg0, %c0_i32, %c0_i32_0 : i32, i32, i32
  }
  func.func @transform_1(%arg0: i32) -> (i32, i32) {
    %c0_i32 = arith.constant 0 : i32
    %c0_i32_0 = arith.constant 0 : i32
    %c0_i32_1 = arith.constant 0 : i32
    return %c0_i32, %c0_i32_0 : i32, i32
  }
  func.func @transform_2(%arg0: i32) -> (i32, i32) {
    %c0_i32 = arith.constant 0 : i32
    %c0_i32_0 = arith.constant 0 : i32
    %c0_i32_1 = arith.constant 0 : i32
    return %c0_i32, %c0_i32_0 : i32, i32
  }
  func.func @transform_3(%arg0: i32) -> (i32, i32) {
    %c0_i32 = arith.constant 0 : i32
    %c0_i32_0 = arith.constant 0 : i32
    %c0_i32_1 = arith.constant 0 : i32
    return %c0_i32, %c0_i32_0 : i32, i32
  }
  func.func @transform_4(%arg0: i32) -> (i32, i32) {
    %c0_i32 = arith.constant 0 : i32
    %c0_i32_0 = arith.constant 0 : i32
    %c0_i32_1 = arith.constant 0 : i32
    return %c0_i32, %c0_i32_0 : i32, i32
  }
  func.func @transform_5(%arg0: i32) -> (i32, i32) {
    %c0_i32 = arith.constant 0 : i32
    %c0_i32_0 = arith.constant 0 : i32
    %c0_i32_1 = arith.constant 0 : i32
    return %c0_i32, %c0_i32_0 : i32, i32
  }
  func.func @transform_6(%arg0: i32) -> (i32, i32) {
    %c0_i32 = arith.constant 0 : i32
    %c0_i32_0 = arith.constant 0 : i32
    %c0_i32_1 = arith.constant 0 : i32
    return %c0_i32, %c0_i32_0 : i32, i32
  }
  func.func @transform_7(%arg0: i32) -> (i32, i32) {
    %c0_i32 = arith.constant 0 : i32
    %c0_i32_0 = arith.constant 0 : i32
    %c0_i32_1 = arith.constant 0 : i32
    return %c0_i32, %c0_i32_0 : i32, i32
  }
  func.func @transform_8(%arg0: i32) -> (i32, i32) {
    %c0_i32 = arith.constant 0 : i32
    %c0_i32_0 = arith.constant 0 : i32
    %c0_i32_1 = arith.constant 0 : i32
    return %c0_i32, %c0_i32_0 : i32, i32
  }
  func.func @transform_9(%arg0: i32) -> (i32, i32) {
    %c0_i32 = arith.constant 0 : i32
    %c0_i32_0 = arith.constant 0 : i32
    %c0_i32_1 = arith.constant 0 : i32
    return %c0_i32, %c0_i32_0 : i32, i32
  }
  func.func @transform_10(%arg0: i32) -> (i32, i32) {
    %c0_i32 = arith.constant 0 : i32
    %c0_i32_0 = arith.constant 0 : i32
    %c0_i32_1 = arith.constant 0 : i32
    return %c0_i32, %c0_i32_0 : i32, i32
  }
  func.func @transform_11(%arg0: i32) -> (i32, i32) {
    %c0_i32 = arith.constant 0 : i32
    %c0_i32_0 = arith.constant 0 : i32
    %c0_i32_1 = arith.constant 0 : i32
    return %c0_i32, %c0_i32_0 : i32, i32
  }
  func.func @transform_12(%arg0: i32) -> (i32, i32) {
    %c0_i32 = arith.constant 0 : i32
    %c0_i32_0 = arith.constant 0 : i32
    %c0_i32_1 = arith.constant 0 : i32
    return %c0_i32, %c0_i32_0 : i32, i32
  }
  func.func @transform_13(%arg0: i32) -> (i32, i32, i32) {
    %c0_i32 = arith.constant 0 : i32
    %c0_i32_0 = arith.constant 0 : i32
    %c0_i32_1 = arith.constant 0 : i32
    return %arg0, %c0_i32, %c0_i32_0 : i32, i32, i32
  }
}

</mosaic_0001>

<bundles_post_ra>
// kernel: tpu_custom_call.1
= control target key start
LH: loop header
LB: loop body
LE: loop exit
PB: predicated region body
PF: predicated region fallthrough
CT: control target
= control target key end

     0   :  { %s5519_s25 = smov 0   ;;  %s7401_s0 = inlined_call_operand.vmem [shape: f32[2,128,32], index: 0, kind: input, shape index: {}]   ;;  %s7402_s1 = inlined_call_operand.vmem [shape: f32[1,32], index: 1, kind: input, shape index: {}]   ;;  %s7403_s2 = inlined_call_operand.vmem [shape: f32[1,32], index: 2, kind: input, shape index: {}]   ;;  %s7404_s3 = inlined_call_operand.vmem [shape: f32[1,32], index: 3, kind: input, shape index: {}]   ;;  %s7405_s4 = inlined_call_operand.vmem [shape: f32[1,32], index: 4, kind: input, shape index: {}]   ;;  %s7406_s5 = inlined_call_operand.vmem [shape: bf16[32,96], index: 5, kind: input, shape index: {}]   ;;  %s7407_s6 = inlined_call_operand.vmem [shape: f32[1,96], index: 6, kind: input, shape index: {}]   ;;  %s7408_s7 = inlined_call_operand.vmem [shape: bf16[32,32], index: 7, kind: input, shape index: {}]   ;;  %s7409_s8 = inlined_call_operand.vmem [shape: f32[1,32], index: 8, kind: input, shape index: {}]   ;;  %s7410_s9 = inlined_call_operand.vmem [shape: bf16[32,128], index: 9, kind: input, shape index: {}]   ;;  %s7411_s10 = inlined_call_operand.vmem [shape: f32[1,128], index: 10, kind: input, shape index: {}]   ;;  %s7412_s11 = inlined_call_operand.vmem [shape: bf16[128,32], index: 11, kind: input, shape index: {}]   ;;  %s7413_s12 = inlined_call_operand.vmem [shape: f32[1,32], index: 12, kind: input, shape index: {}]   ;;  %s7414_s13 = inlined_call_operand.vmem [shape: f32[2,128,32], index: 13, kind: output, shape index: {}]  }
   0x1 LB: > { %s4168_s26 = sadd.s32 4294967295, %s5435_s25   ;;  %p4172_p0 = scmp.ge.s32.totalorder %s5435_s25, 1  ;;  %s5435_s25 = sphi %s5519_s25, %s23_s25  }
   0x2   : > { %p387_p1 = scmp.lt.s32.totalorder %s5435_s25, 3 }
   0x4   : > { %p388_p2 = pnand %p4172_p0, %p387_p1 }
   0x6   : > { %391 = sbr.rel (%p388_p2) target bundleno = 3872 (0xf20), region = 72 }
   0xd   : > { %p431_p3 = scmp.lt.s32.totalorder %s4168_s26, 1  ;;  %vm460_vm0 = vcmask 261120   ;;  %s5437_s24 = smov 96   ;;  %vm990_vm1 = vcmask 64512  }
   0xe   : > { %s5438_s28 = smov 64   ;;  %s5439_s29 = smov 88  }
   0xf   : > { %s7526_s26 = smov (!%p431_p3, %s4168_s26), 1  ;;  %s5441_s14 = smov 120  }
  0x10   : > { %s4295_s27 = sshll.u32 %s7526_s26, 7  ;;  %s5442_s15 = smov 80  }
  0x11   : > { %s5535_s30 = scalar_lea.vmem %s7401_s0, %s4295_s27  ;;  %s5443_s16 = smov 112  }
  0x12   : > { %v442_v0 = vld [vmem:[%s5535_s30] sm:$0xff]  ;;  %v444_v1 = vld [vmem:[%s5535_s30 + $0x10] sm:$0xff]  ;;  %v443_v2 = vld [vmem:[%s5535_s30 + $0x8] sm:$0xff]  ;;  %s5444_s17 = smov 56   ;;  %s5445_s18 = smov 72  }
  0x13   : > { %v461_v3 = vsel %vm460_vm0, %v442_v0, 0.0  ;;  %v467_v4 = vsel %vm460_vm0, %v444_v1, 0.0  ;;  %v445_v5 = vld [vmem:[%s5535_s30 + $0x18] sm:$0xff]  ;;  %v5544_v6 = vld [vmem:[%s5535_s30 + $0x20] sm:$0xff]  ;;  %v464_v7 = vsel %vm460_vm0, %v443_v2, 0.0  ;;  %v447_v9 = vld [vmem:[%s5535_s30 + $0x28] sm:$0xff]  ;;  %s7333_s23 = scalar_lea.vmem %s7414_s13, %s4295_s27 }
  0x14   : > { %462 = vadd.xlane.f32.xlu0 %v461_v3  ;;  %468 = vadd.xlane.f32.xlu1 %v467_v4  ;;  %v470_v8 = vsel %vm460_vm0, %v445_v5, 0.0  ;;  %v473_v10 = vsel %vm460_vm0, %v5544_v6, 0.0  ;;  %v476_v11 = vsel %vm460_vm0, %v447_v9, 0.0  ;;  %v5553_v12 = vld [vmem:[%s5535_s30 + $0x30] sm:$0xff]  ;;  %v5556_v13 = vld [vmem:[%s5535_s30 + $0x38] sm:$0xff]  ;;  %v5563_v16 = vld [vmem:[%s5535_s30 + $0x40] sm:$0xff] }
  0x15   : > { %v479_v14 = vsel %vm460_vm0, %v5553_v12, 0.0  ;;  %v482_v15 = vsel %vm460_vm0, %v5556_v13, 0.0  ;;  %v5566_v17 = vld [vmem:[%s5535_s30 + $0x48] sm:$0xff]  ;;  %v485_v18 = vsel %vm460_vm0, %v5563_v16, 0.0  ;;  %v5573_v20 = vld [vmem:[%s5535_s30 + $0x50] sm:$0xff]  ;;  %v5576_v21 = vld [vmem:[%s5535_s30 + $0x58] sm:$0xff] }
  0x16   : > { %v488_v19 = vsel %vm460_vm0, %v5566_v17, 0.0  ;;  %v491_v22 = vsel %vm460_vm0, %v5573_v20, 0.0  ;;  %v494_v23 = vsel %vm460_vm0, %v5576_v21, 0.0  ;;  %v5583_v24 = vld [vmem:[%s5535_s30 + $0x60] sm:$0xff]  ;;  %v5586_v25 = vld [vmem:[%s5535_s30 + $0x68] sm:$0xff]  ;;  %v5593_v28 = vld [vmem:[%s5535_s30 + $0x70] sm:$0xff] }
  0x17   : > { %v497_v26 = vsel %vm460_vm0, %v5583_v24, 0.0  ;;  %v500_v27 = vsel %vm460_vm0, %v5586_v25, 0.0  ;;  %v5596_v29 = vld [vmem:[%s5535_s30 + $0x78] sm:$0xff]  ;;  %v503_v30 = vsel %vm460_vm0, %v5593_v28, 0.0  ;;  %s5446_s19 = smov 104   ;;  %s5447_s20 = smov 48  }
  0x18   : > { %465 = vadd.xlane.f32.xlu0 %v464_v7  ;;  %471 = vadd.xlane.f32.xlu1 %v470_v8  ;;  %v506_v31 = vsel %vm460_vm0, %v5596_v29, 0.0 }
  0x1c   : > { %474 = vadd.xlane.f32.xlu0 %v473_v10  ;;  %477 = vadd.xlane.f32.xlu1 %v476_v11 }
  0x20   : > { %480 = vadd.xlane.f32.xlu0 %v479_v14  ;;  %483 = vadd.xlane.f32.xlu1 %v482_v15 }
  0x24   : > { %486 = vadd.xlane.f32.xlu0 %v485_v18  ;;  %489 = vadd.xlane.f32.xlu1 %v488_v19 }
  0x28   : > { %492 = vadd.xlane.f32.xlu0 %v491_v22  ;;  %495 = vadd.xlane.f32.xlu1 %v494_v23 }
  0x2c   : > { %498 = vadd.xlane.f32.xlu0 %v497_v26  ;;  %501 = vadd.xlane.f32.xlu1 %v500_v27 }
  0x30   : > { %504 = vadd.xlane.f32.xlu0 %v503_v30  ;;  %507 = vadd.xlane.f32.xlu1 %v506_v31 }
  0xa1   : > { %v463_v32 = vpop.xlane.xlu0 %462  ;;  %v469_v33 = vpop.xlane.xlu1 %468 }
  0xa2   : > { %v510_v34 = vmul.f32 0.03125, %v463_v32  ;;  %v512_v35 = vmul.f32 0.03125, %v469_v33 }
  0xa4   : > { %v5602_v36 = vsub.f32 %v442_v0, %v510_v34  ;;  %v5604_v37 = vsub.f32 %v444_v1, %v512_v35 }
  0xa5   : > { %v466_v38 = vpop.xlane.xlu0 %465  ;;  %v472_v39 = vpop.xlane.xlu1 %471 }
  0xa6   : > { %v511_v40 = vmul.f32 0.03125, %v466_v38  ;;  %v513_v41 = vmul.f32 0.03125, %v472_v39  ;;  %v542_v42 = vmul.f32 %v5602_v36, %v5602_v36  ;;  %v544_v43 = vmul.f32 %v5604_v37, %v5604_v37 }
  0xa8   : > { %v5610_v44 = vsub.f32 %v443_v2, %v511_v40  ;;  %v5612_v45 = vsub.f32 %v445_v5, %v513_v41  ;;  %v558_v46 = vsel %vm460_vm0, %v542_v42, 0.0  ;;  %v564_v49 = vsel %vm460_vm0, %v544_v43, 0.0 }
  0xa9   : > { %559 = vadd.xlane.f32.xlu0 %v558_v46  ;;  %v475_v47 = vpop.xlane.xlu0 %474  ;;  %v478_v48 = vpop.xlane.xlu1 %477 }
  0xaa   : > { %v514_v50 = vmul.f32 0.03125, %v475_v47  ;;  %v515_v51 = vmul.f32 0.03125, %v478_v48  ;;  %v543_v52 = vmul.f32 %v5610_v44, %v5610_v44  ;;  %v545_v53 = vmul.f32 %v5612_v45, %v5612_v45 }
  0xac   : > { %v5621_v54 = vsub.f32 %v5544_v6, %v514_v50  ;;  %v5623_v55 = vsub.f32 %v447_v9, %v515_v51  ;;  %v561_v56 = vsel %vm460_vm0, %v543_v52, 0.0  ;;  %v567_v59 = vsel %vm460_vm0, %v545_v53, 0.0  ;;  %v5002_v53 = vld [vmem:[%s7406_s5 + $0x8] sm:$0xff]  }
  0xad   : > { %565 = vadd.xlane.f32.xlu0 %v564_v49  ;;  %562 = vadd.xlane.f32.xlu1 %v561_v56  ;;  %v481_v57 = vpop.xlane.xlu0 %480  ;;  %v484_v58 = vpop.xlane.xlu1 %483 }
  0xae   : > { %v516_v60 = vmul.f32 0.03125, %v481_v57  ;;  %v517_v61 = vmul.f32 0.03125, %v484_v58  ;;  %v546_v62 = vmul.f32 %v5621_v54, %v5621_v54  ;;  %v547_v63 = vmul.f32 %v5623_v55, %v5623_v55 }
  0xb0   : > { %v5632_v0 = vsub.f32 %v5553_v12, %v516_v60  ;;  %v5635_v1 = vsub.f32 %v5556_v13, %v517_v61  ;;  %v570_v2 = vsel %vm460_vm0, %v546_v62, 0.0  ;;  %v573_v5 = vsel %vm460_vm0, %v547_v63, 0.0 }
  0xb1   : > { %568 = vadd.xlane.f32.xlu1 %v567_v59  ;;  %571 = vadd.xlane.f32.xlu0 %v570_v2  ;;  %v487_v3 = vpop.xlane.xlu0 %486  ;;  %v490_v4 = vpop.xlane.xlu1 %489 }
  0xb2   : > { %v518_v6 = vmul.f32 0.03125, %v487_v3  ;;  %v519_v7 = vmul.f32 0.03125, %v490_v4  ;;  %v548_v8 = vmul.f32 %v5632_v0, %v5632_v0  ;;  %v549_v9 = vmul.f32 %v5635_v1, %v5635_v1 }
  0xb4   : > { %v5644_v10 = vsub.f32 %v5563_v16, %v518_v6  ;;  %v5647_v11 = vsub.f32 %v5566_v17, %v519_v7  ;;  %v576_v12 = vsel %vm460_vm0, %v548_v8, 0.0  ;;  %v579_v15 = vsel %vm460_vm0, %v549_v9, 0.0 }
  0xb5   : > { %574 = vadd.xlane.f32.xlu1 %v573_v5  ;;  %577 = vadd.xlane.f32.xlu0 %v576_v12  ;;  %v493_v13 = vpop.xlane.xlu0 %492  ;;  %v496_v14 = vpop.xlane.xlu1 %495 }
  0xb6   : > { %v520_v18 = vmul.f32 0.03125, %v493_v13  ;;  %v521_v19 = vmul.f32 0.03125, %v496_v14  ;;  %v550_v22 = vmul.f32 %v5644_v10, %v5644_v10  ;;  %v551_v16 = vmul.f32 %v5647_v11, %v5647_v11 }
  0xb8   : > { %v5656_v23 = vsub.f32 %v5573_v20, %v520_v18  ;;  %v5659_v17 = vsub.f32 %v5576_v21, %v521_v19  ;;  %v582_v26 = vsel %vm460_vm0, %v550_v22, 0.0  ;;  %v585_v31 = vsel %vm460_vm0, %v551_v16, 0.0 }
  0xb9   : > { %580 = vadd.xlane.f32.xlu1 %v579_v15  ;;  %583 = vadd.xlane.f32.xlu0 %v582_v26  ;;  %v499_v27 = vpop.xlane.xlu0 %498  ;;  %v502_v30 = vpop.xlane.xlu1 %501 }
  0xba   : > { %v522_v32 = vmul.f32 0.03125, %v499_v27  ;;  %v523_v33 = vmul.f32 0.03125, %v502_v30  ;;  %v552_v34 = vmul.f32 %v5656_v23, %v5656_v23  ;;  %v553_v20 = vmul.f32 %v5659_v17, %v5659_v17 }
  0xbc   : > { %v5668_v35 = vsub.f32 %v5583_v24, %v522_v32  ;;  %v5671_v21 = vsub.f32 %v5586_v25, %v523_v33  ;;  %v588_v38 = vsel %vm460_vm0, %v552_v34, 0.0  ;;  %v591_v41 = vsel %vm460_vm0, %v553_v20, 0.0 }
  0xbd   : > { %586 = vadd.xlane.f32.xlu1 %v585_v31  ;;  %589 = vadd.xlane.f32.xlu0 %v588_v38  ;;  %v505_v39 = vpop.xlane.xlu0 %504  ;;  %v508_v40 = vpop.xlane.xlu1 %507  ;;  %v5703_v31 = vld [vmem:[%s7402_s1] ss:$0 sm:$0xff] }
  0xbe   : > { %v524_v42 = vmul.f32 0.03125, %v505_v39  ;;  %v525_v43 = vmul.f32 0.03125, %v508_v40  ;;  %v554_v46 = vmul.f32 %v5668_v35, %v5668_v35  ;;  %v555_v24 = vmul.f32 %v5671_v21, %v5671_v21 }
  0xc0   : > { %v5680_v47 = vsub.f32 %v5593_v28, %v524_v42  ;;  %v5683_v25 = vsub.f32 %v5596_v29, %v525_v43  ;;  %v594_v48 = vsel %vm460_vm0, %v554_v46, 0.0  ;;  %v597_v49 = vsel %vm460_vm0, %v555_v24, 0.0  ;;  %v5001_v29 = vld [vmem:[%s7406_s5] sm:$0xff]  }
  0xc1   : > { %592 = vadd.xlane.f32.xlu1 %v591_v41  ;;  %595 = vadd.xlane.f32.xlu0 %v594_v48  ;;  %v5710_v43 = vld [vmem:[%s7403_s2] ss:$0 sm:$0xff] }
  0xc2   : > { %v556_v50 = vmul.f32 %v5680_v47, %v5680_v47  ;;  %v557_v51 = vmul.f32 %v5683_v25, %v5683_v25  ;;  %4497 = vmatprep.subr.bf16.mxu0 %v5001_v29 }
  0xc3   : > { %4498 = vmatpush3.bf16.msra.mxu0 %v5001_v29 }
  0xc4   : > { %v600_v52 = vsel %vm460_vm0, %v556_v50, 0.0  ;;  %v603_v28 = vsel %vm460_vm0, %v557_v51, 0.0  ;;  %4499 = vmatprep.subr.bf16.mxu0 %v5002_v53 }
  0xc5   : > { %598 = vadd.xlane.f32.xlu1 %v597_v49  ;;  %601 = vadd.xlane.f32.xlu0 %v600_v52 }
  0xc7   : > { %4500 = vmatpush3.bf16.msra.mxu0 %v5002_v53 }
  0xc9   : > { %604 = vadd.xlane.f32.xlu1 %v603_v28 }
 0x136   : > { %v560_v56 = vpop.xlane.xlu0 %559 }
 0x137   : > { %v606_v57 = vmul.f32 0.03125, %v560_v56 }
 0x139   : > { %v622_v58 = vadd.f32 1e-05, %v606_v57 }
 0x13a   : > { %v563_v59 = vpop.xlane.xlu1 %562  ;;  %v566_v60 = vpop.xlane.xlu0 %565 }
 0x13b   : > { %5013 = vrsqrt.f32 %v622_v58  ;;  %v607_v61 = vmul.f32 0.03125, %v563_v59  ;;  %v608_v62 = vmul.f32 0.03125, %v566_v60 }
 0x13d   : > { %v623_v63 = vadd.f32 1e-05, %v607_v61  ;;  %v624_v2 = vadd.f32 1e-05, %v608_v62 }
 0x13e   : > { %v569_v3 = vpop.xlane.xlu1 %568  ;;  %v572_v4 = vpop.xlane.xlu0 %571 }
 0x13f   : > { %5015 = vrsqrt.f32 %v623_v63  ;;  %v609_v5 = vmul.f32 0.03125, %v569_v3  ;;  %v610_v6 = vmul.f32 0.03125, %v572_v4 }
 0x140   : > { %5017 = vrsqrt.f32 %v624_v2 }
 0x141   : > { %v625_v7 = vadd.f32 1e-05, %v609_v5  ;;  %v626_v8 = vadd.f32 1e-05, %v610_v6 }
 0x142   : > { %v575_v9 = vpop.xlane.xlu1 %574  ;;  %v578_v12 = vpop.xlane.xlu0 %577 }
 0x143   : > { %5019 = vrsqrt.f32 %v625_v7  ;;  %v611_v13 = vmul.f32 0.03125, %v575_v9  ;;  %v612_v14 = vmul.f32 0.03125, %v578_v12 }
 0x144   : > { %5021 = vrsqrt.f32 %v626_v8 }
 0x145   : > { %v5014_v15 = vpop.eup %5013  ;;  %v627_v18 = vadd.f32 1e-05, %v611_v13  ;;  %v628_v19 = vadd.f32 1e-05, %v612_v14 }
 0x146   : > { %v581_v22 = vpop.xlane.xlu1 %580  ;;  %v584_v16 = vpop.xlane.xlu0 %583  ;;  %v654_v26 = vmul.f32 %v5014_v15, %v5602_v36 }
 0x147   : > { %5023 = vrsqrt.f32 %v627_v18  ;;  %v613_v27 = vmul.f32 0.03125, %v581_v22  ;;  %v614_v30 = vmul.f32 0.03125, %v584_v16 }
 0x148   : > { %5025 = vrsqrt.f32 %v628_v19  ;;  %v676_v41 = vmul.f32 %v5703_v31, %v654_v26 }
 0x149   : > { %v5016_v32 = vpop.eup %5015  ;;  %v629_v33 = vadd.f32 1e-05, %v613_v27  ;;  %v630_v34 = vadd.f32 1e-05, %v614_v30 }
 0x14a   : > { %v5018_v20 = vpop.eup %5017  ;;  %v587_v38 = vpop.xlane.xlu1 %586  ;;  %v655_v40 = vmul.f32 %v5016_v32, %v5610_v44  ;;  %v698_v28 = vadd.f32 %v5710_v43, %v676_v41 }
 0x14b   : > { %v590_v39 = vpop.xlane.xlu0 %589  ;;  %5027 = vrsqrt.f32 %v629_v33  ;;  %v615_v36 = vmul.f32 0.03125, %v587_v38  ;;  %v656_v46 = vmul.f32 %v5018_v20, %v5604_v37 }
 0x14c   : > { %v616_v42 = vmul.f32 0.03125, %v590_v39  ;;  %5029 = vrsqrt.f32 %v630_v34  ;;  %v677_v24 = vmul.f32 %v5703_v31, %v655_v40 }
 0x14d   : > { %v5020_v48 = vpop.eup %5019  ;;  %v631_v49 = vadd.f32 1e-05, %v615_v36  ;;  %v678_v56 = vmul.f32 %v5703_v31, %v656_v46 }
 0x14e   : > { %v632_v50 = vadd.f32 1e-05, %v616_v42  ;;  %v5022_v51 = vpop.eup %5021  ;;  %v593_v44 = vpop.xlane.xlu1 %592  ;;  %v699_v29 = vadd.f32 %v5710_v43, %v677_v24  ;;  %v657_v53 = vmul.f32 %v5020_v48, %v5612_v45 }
 0x14f   : > { %v596_v52 = vpop.xlane.xlu0 %595  ;;  %5031 = vrsqrt.f32 %v631_v49  ;;  %v617_v57 = vmul.f32 0.03125, %v593_v44  ;;  %v658_v60 = vmul.f32 %v5022_v51, %v5621_v54  ;;  %v700_v45 = vadd.f32 %v5710_v43, %v678_v56 }
 0x150   : > { %v618_v37 = vmul.f32 0.03125, %v596_v52  ;;  %5033 = vrsqrt.f32 %v632_v50  ;;  %v714_v58 = vpack.c.bf16 %v699_v29, %v698_v28  ;;  %v679_v59 = vmul.f32 %v5703_v31, %v657_v53 }
 0x151   : > { %v5024_v61 = vpop.eup %5023  ;;  %v633_v62 = vadd.f32 1e-05, %v617_v57  ;;  %v680_v7 = vmul.f32 %v5703_v31, %v658_v60 }
 0x152   : > { %v634_v63 = vadd.f32 1e-05, %v618_v37  ;;  %v5026_v2 = vpop.eup %5025  ;;  %v599_v3 = vpop.xlane.xlu1 %598  ;;  %4501 = vmatprep.mubr.msk.bf16.mxu0 %vm460_vm0, %v714_v58  ;;  %v701_v5 = vadd.f32 %v5710_v43, %v679_v59  ;;  %v659_v6 = vmul.f32 %v5024_v61, %v5623_v55 }
 0x153   : > { %v602_v4 = vpop.xlane.xlu0 %601  ;;  %5035 = vrsqrt.f32 %v633_v62  ;;  %v619_v8 = vmul.f32 0.03125, %v599_v3  ;;  %v660_v54 = vmul.f32 %v5026_v2, %v5632_v0  ;;  %v702_v55 = vadd.f32 %v5710_v43, %v680_v7 }
 0x154   : > { %v620_v9 = vmul.f32 0.03125, %v602_v4  ;;  %5037 = vrsqrt.f32 %v634_v63  ;;  %v715_v12 = vpack.c.bf16 %v701_v5, %v700_v45  ;;  %v681_v13 = vmul.f32 %v5703_v31, %v659_v6  ;;  %v5768_v4 = vld [vmem:[%s7407_s6] ss:$0 sm:$0xff] }
 0x155   : > { %v5028_v14 = vpop.eup %5027  ;;  %v635_v15 = vadd.f32 1e-05, %v619_v8  ;;  %v682_v27 = vmul.f32 %v5703_v31, %v660_v54 }
 0x156   : > { %v636_v18 = vadd.f32 1e-05, %v620_v9  ;;  %v5030_v19 = vpop.eup %5029  ;;  %v605_v22 = vpop.xlane.xlu1 %604  ;;  %4502 = vmatmul.mubr.msk.bf16.vlgmr.msra.gmra.mrb[0].mxu0 %vm460_vm0, %v715_v12  ;;  %v703_v16 = vadd.f32 %v5710_v43, %v681_v13  ;;  %v661_v26 = vmul.f32 %v5028_v14, %v5635_v1 }
 0x157   : > { %5039 = vrsqrt.f32 %v635_v15  ;;  %v621_v0 = vmul.f32 0.03125, %v605_v22  ;;  %v662_v30 = vmul.f32 %v5030_v19, %v5644_v10  ;;  %v704_v39 = vadd.f32 %v5710_v43, %v682_v27 }
 0x158   : > { %5041 = vrsqrt.f32 %v636_v18  ;;  %v716_v32 = vpack.c.bf16 %v703_v16, %v702_v55  ;;  %v683_v33 = vmul.f32 %v5703_v31, %v661_v26 }
 0x159   : > { %v5032_v34 = vpop.eup %5031  ;;  %v637_v20 = vadd.f32 1e-05, %v621_v0  ;;  %v684_v41 = vmul.f32 %v5703_v31, %v662_v30 }
 0x15a   : > { %v5034_v38 = vpop.eup %5033  ;;  %4505 = vmatprep.mubr.msk.bf16.mxu0 %vm460_vm0, %v716_v32  ;;  %v705_v40 = vadd.f32 %v5710_v43, %v683_v33  ;;  %v663_v1 = vmul.f32 %v5032_v34, %v5647_v11 }
 0x15b   : > { %5043 = vrsqrt.f32 %v637_v20  ;;  %v664_v10 = vmul.f32 %v5034_v38, %v5656_v23  ;;  %v706_v48 = vadd.f32 %v5710_v43, %v684_v41 }
 0x15c   : > { %v717_v36 = vpack.c.bf16 %v705_v40, %v704_v39  ;;  %v685_v42 = vmul.f32 %v5703_v31, %v663_v1 }
 0x15d   : > { %v5036_v46 = vpop.eup %5035  ;;  %v686_v11 = vmul.f32 %v5703_v31, %v664_v10 }
 0x15e   : > { %v5038_v24 = vpop.eup %5037  ;;  %4506 = vmatmul.mubr.msk.bf16.gmra.mrb[4].mxu0 %vm460_vm0, %v717_v36  ;;  %v707_v49 = vadd.f32 %v5710_v43, %v685_v42  ;;  %v665_v50 = vmul.f32 %v5036_v46, %v5659_v17 }
 0x15f   : > { %v666_v51 = vmul.f32 %v5038_v24, %v5668_v35  ;;  %v708_v29 = vadd.f32 %v5710_v43, %v686_v11 }
 0x160   : > { %v718_v44 = vpack.c.bf16 %v707_v49, %v706_v48  ;;  %v687_v23 = vmul.f32 %v5703_v31, %v665_v50 }
 0x161   : > { %v5040_v52 = vpop.eup %5039  ;;  %v688_v57 = vmul.f32 %v5703_v31, %v666_v51 }
 0x162   : > { %v5042_v28 = vpop.eup %5041  ;;  %4509 = vmatprep.mubr.msk.bf16.mxu0 %vm460_vm0, %v718_v44  ;;  %v709_v53 = vadd.f32 %v5710_v43, %v687_v23  ;;  %v667_v56 = vmul.f32 %v5040_v52, %v5671_v21 }
 0x163   : > { %v668_v17 = vmul.f32 %v5042_v28, %v5680_v47  ;;  %v710_v59 = vadd.f32 %v5710_v43, %v688_v57 }
 0x164   : > { %v719_v37 = vpack.c.bf16 %v709_v53, %v708_v29  ;;  %v689_v35 = vmul.f32 %v5703_v31, %v667_v56 }
 0x165   : > { %v5044_v58 = vpop.eup %5043  ;;  %v690_v62 = vmul.f32 %v5703_v31, %v668_v17 }
 0x166   : > { %4510 = vmatmul.mubr.msk.bf16.gmra.mrb[8].mxu0 %vm460_vm0, %v719_v37  ;;  %v711_v60 = vadd.f32 %v5710_v43, %v689_v35  ;;  %v669_v61 = vmul.f32 %v5044_v58, %v5683_v25 }
 0x167   : > { %v712_v47 = vadd.f32 %v5710_v43, %v690_v62 }
 0x168   : > { %v720_v63 = vpack.c.bf16 %v711_v60, %v710_v59  ;;  %v691_v21 = vmul.f32 %v5703_v31, %v669_v61 }
 0x16a   : > { %4513 = vmatprep.mubr.msk.bf16.mxu0 %vm460_vm0, %v720_v63  ;;  %v713_v2 = vadd.f32 %v5710_v43, %v691_v21 }
 0x16c   : > { %v721_v3 = vpack.c.bf16 %v713_v2, %v712_v47 }
 0x16e   : > { %4514 = vmatmul.mubr.msk.bf16.gmra.mrb[12].mxu0 %vm460_vm0, %v721_v3 }
 0x229   : > { %v4503_v25 = vpop.f32.mrb[0].mxu0 }
 0x22a   : > { %v812_v45 = vadd.f32 %v4503_v25, %v5768_v4  ;;  %v803_v5 = vpop.f32.mrb[1].mxu0 }
 0x22b   : > { %v804_v31 = vadd.f32 %v5768_v4, %v803_v5  ;;  %v4504_v6 = vpop.f32.mrb[2].mxu0 }
 0x22c   : > { %v815_v7 = vadd.f32 %v4504_v6, %v5768_v4  ;;  %v806_v8 = vpop.f32.mrb[3].mxu0  ;;  %v868_v9 = vmul.f32 0.35355338, %v812_v45 }
 0x22d   : > { %v807_v43 = vadd.f32 %v5768_v4, %v806_v8  ;;  %v866_v13 = vmul.f32 0.35355338, %v804_v31 }
 0x22e   : > { %v869_v54 = vmul.f32 0.35355338, %v815_v7  ;;  %v5774_v12 = vpack.c.bf16 %v815_v7, %v812_v45 }
 0x22f   : > { %v867_v14 = vmul.f32 0.35355338, %v807_v43  ;;  %v5776_v15 = vpack.c.bf16 %v807_v43, %v804_v31 }
 0x230   : > { %v5778_v18 = vpack.c.bf16 %v869_v54, %v868_v9  ;;  %976 = vrot.lane.b32.xlu1 %v5774_v12, %s5437_s24 }
 0x231   : > { %v5782_v19 = vpack.c.bf16 %v867_v14, %v866_v13  ;;  %974 = vrot.lane.b32.xlu0 %v5776_v15, %s5437_s24  ;;  %v4507_v22 = vpop.f32.mrb[4].mxu0 }
 0x232   : > { %v828_v55 = vadd.f32 %v4507_v22, %v5768_v4  ;;  %v819_v16 = vpop.f32.mrb[5].mxu0 }
 0x233   : > { %v820_v26 = vadd.f32 %v5768_v4, %v819_v16  ;;  %v4508_v27 = vpop.f32.mrb[6].mxu0  ;;  %4533 = vmatprep.mubr.msk.bf16.mxu1 %vm990_vm1, %v5782_v19 }
 0x234   : > { %v831_v0 = vadd.f32 %v4508_v27, %v5768_v4  ;;  %v822_v30 = vpop.f32.mrb[7].mxu0  ;;  %v872_v33 = vmul.f32 0.35355338, %v828_v55 }
 0x235   : > { %v823_v32 = vadd.f32 %v5768_v4, %v822_v30  ;;  %v870_v38 = vmul.f32 0.35355338, %v820_v26 }
 0x236   : > { %v873_v34 = vmul.f32 0.35355338, %v831_v0  ;;  %v5792_v20 = vpack.c.bf16 %v831_v0, %v828_v55 }
 0x237   : > { %v871_v39 = vmul.f32 0.35355338, %v823_v32  ;;  %v5794_v40 = vpack.c.bf16 %v823_v32, %v820_v26 }
 0x238   : > { %v5796_v1 = vpack.c.bf16 %v873_v34, %v872_v33 }
 0x239   : > { %v5798_v41 = vpack.c.bf16 %v871_v39, %v870_v38  ;;  %978 = vrot.lane.b32.xlu1 %v5794_v40, %s5437_s24  ;;  %v4511_v10 = vpop.f32.mrb[8].mxu0 }
 0x23a   : > { %v844_v36 = vadd.f32 %v4511_v10, %v5768_v4  ;;  %v835_v42 = vpop.f32.mrb[9].mxu0 }
 0x23b   : > { %v836_v46 = vadd.f32 %v5768_v4, %v835_v42  ;;  %v4512_v24 = vpop.f32.mrb[10].mxu0 }
 0x23c   : > { %v847_v48 = vadd.f32 %v4512_v24, %v5768_v4  ;;  %v838_v49 = vpop.f32.mrb[11].mxu0  ;;  %v876_v11 = vmul.f32 0.35355338, %v844_v36 }
 0x23d   : > { %v839_v50 = vadd.f32 %v5768_v4, %v838_v49  ;;  %980 = vrot.lane.b32.xlu1 %v5792_v20, %s5437_s24  ;;  %v874_v23 = vmul.f32 0.35355338, %v836_v46 }
 0x23e   : > { %v877_v51 = vmul.f32 0.35355338, %v847_v48  ;;  %v5808_v44 = vpack.c.bf16 %v847_v48, %v844_v36  ;;  %v882_v36 = vlaneseq }
 0x23f   : > { %v875_v52 = vmul.f32 0.35355338, %v839_v50  ;;  %v5810_v28 = vpack.c.bf16 %v839_v50, %v836_v46  ;;  %v5440_v50 = vmov 0.0  }
 0x240   : > { %v5812_v29 = vpack.c.bf16 %v877_v51, %v876_v11  ;;  %v5882_v42 = vshrl.u32 %v882_v36, 7  ;;  %v5885_v24 = vand.u32 127, %v882_v36 }
 0x241   : > { %v5814_v53 = vpack.c.bf16 %v875_v52, %v874_v23  ;;  %984 = vrot.lane.b32.xlu1 %v5808_v44, %s5437_s24  ;;  %982 = vrot.lane.b32.xlu0 %v5810_v28, %s5437_s24  ;;  %v4515_v56 = vpop.f32.mrb[12].mxu0 }
 0x242   : > { %v860_v57 = vadd.f32 %v4515_v56, %v5768_v4  ;;  %v851_v17 = vpop.f32.mrb[13].mxu0  ;;  %v885_v46 = vadd.s32 16, %v5882_v42  ;;  %v884_v48 = vadd.s32 8, %v5882_v42  ;;  %vm917_vm3 = vcmp.ge.s32.totalorder %v5885_v24, 8 }
 0x243   : > { %v852_v37 = vadd.f32 %v5768_v4, %v851_v17  ;;  %v4516_v35 = vpop.f32.mrb[14].mxu0  ;;  %vm901_vm6 = vcmp.gt.s32.totalorder %v5885_v24, %v5882_v42  ;;  %v886_v49 = vadd.s32 24, %v5882_v42  ;;  %v890_v51 = vadd.s32 56, %v5882_v42 }
 0x244   : > { %v863_v58 = vadd.f32 %v4516_v35, %v5768_v4  ;;  %v854_v59 = vpop.f32.mrb[15].mxu0  ;;  %v880_v61 = vmul.f32 0.35355338, %v860_v57  ;;  %vm903_vm2 = vcmp.gt.s32.totalorder %v5885_v24, %v885_v46  ;;  %vm902_vm5 = vcmp.gt.s32.totalorder %v5885_v24, %v884_v48  ;;  %vm918_vm8 = vmor %vm901_vm6, %vm917_vm3 }
 0x245   : > { %v855_v60 = vadd.f32 %v5768_v4, %v854_v59  ;;  %v878_v21 = vmul.f32 0.35355338, %v852_v37  ;;  %vm920_vm4 = vmor %vm903_vm2, %vm917_vm3  ;;  %vm904_vm9 = vcmp.gt.s32.totalorder %v5885_v24, %v886_v49  ;;  %v889_v52 = vadd.s32 48, %v5882_v42 }
 0x246   : > { %v881_v62 = vmul.f32 0.35355338, %v863_v58  ;;  %v5824_v63 = vpack.c.bf16 %v863_v58, %v860_v57  ;;  %v5897_v11 = vsel %vm920_vm4, -1e+30, %v5440_v50  ;;  %vm919_vm7 = vmor %vm902_vm5, %vm917_vm3  ;;  %vm908_vm10 = vcmp.gt.s32.totalorder %v5885_v24, %v890_v51 }
 0x247   : > { %v879_v47 = vmul.f32 0.35355338, %v855_v60  ;;  %v5826_v2 = vpack.c.bf16 %v855_v60, %v852_v37  ;;  %v5910_v17 = vsel %vm919_vm7, -1e+30, %v5440_v50  ;;  %v5913_v37 = vsel %vm918_vm8, -1e+30, %v5440_v50  ;;  %vm921_vm11 = vmor %vm904_vm9, %vm917_vm3 }
 0x248   : > { %v5828_v3 = vpack.c.bf16 %v881_v62, %v880_v61  ;;  %988 = vrot.lane.b32.xlu1 %v5824_v63, %s5437_s24  ;;  %v888_v58 = vadd.s32 40, %v5882_v42  ;;  %vm907_vm12 = vcmp.gt.s32.totalorder %v5885_v24, %v889_v52  ;;  %v887_v61 = vadd.s32 32, %v5882_v42  ;;  %vm925_vm13 = vmor %vm908_vm10, %vm917_vm3 }
 0x249   : > { %v5832_v25 = vpack.c.bf16 %v879_v47, %v878_v21  ;;  %986 = vrot.lane.b32.xlu0 %v5826_v2, %s5437_s24  ;;  %v5931_v21 = vsel %vm921_vm11, -1e+30, %v5440_v50  ;;  %v894_v47 = vadd.s32 88, %v5882_v42  ;;  %vm924_vm15 = vmor %vm907_vm12, %vm917_vm3  ;;  %v895_v46 = vadd.s32 96, %v5882_v42 }
 0x24a   : > { %7449 = vst [vmem:[#allocation2_spill] sm:$0xff] %v5931_v21  ;;  %vm906_vm14 = vcmp.gt.s32.totalorder %v5885_v24, %v888_v58  ;;  %vm905_vm2 = vcmp.gt.s32.totalorder %v5885_v24, %v887_v61 }
 0x24b   : > { %vm923_vm4 = vmor %vm906_vm14, %vm917_vm3  ;;  %vm912_vm5 = vcmp.gt.s32.totalorder %v5885_v24, %v894_v47 }
 0x24c   : > { %1290 = vrot.lane.b32.xlu1 %v5774_v12, %s5438_s28  ;;  %vm922_vm6 = vmor %vm905_vm2, %vm917_vm3  ;;  %vm913_vm2 = vcmp.gt.s32.totalorder %v5885_v24, %v895_v46 }
 0x24d   : > { %1288 = vrot.lane.b32.xlu0 %v5776_v15, %s5438_s28  ;;  %vm929_vm8 = vmor %vm912_vm5, %vm917_vm3 }
 0x250   : > { %1294 = vrot.lane.b32.xlu1 %v5792_v20, %s5438_s28 }
 0x251   : > { %1292 = vrot.lane.b32.xlu0 %v5794_v40, %s5438_s28 }
 0x254   : > { %1298 = vrot.lane.b32.xlu1 %v5808_v44, %s5438_s28 }
 0x255   : > { %1296 = vrot.lane.b32.xlu0 %v5810_v28, %s5438_s28 }
 0x258   : > { %1302 = vrot.lane.b32.xlu1 %v5824_v63, %s5438_s28 }
 0x259   : > { %1442 = vrot.lane.b32.xlu0 %v5776_v15, %s5439_s29 }
 0x25c   : > { %1444 = vrot.lane.b32.xlu1 %v5774_v12, %s5439_s29 }
 0x25d   : > { %1300 = vrot.lane.b32.xlu0 %v5826_v2, %s5438_s28  ;;  %s5448_s28 = smov 40  }
 0x2a2   : > { %v977_v5 = vpop.permute.xlu1 %976 }
 0x2a3   : > { %v975_v4 = vpop.permute.xlu0 %974  ;;  %v1019_v6 = vsel %vm990_vm1, %v977_v5, 0 }
 0x2a4   : > { %4945 = vmatprep.subr.msk.bf16.mxu1 %vm990_vm1, %v975_v4  ;;  %v1016_v45 = vsel %vm990_vm1, %v975_v4, 0 }
 0x2a5   : > { %4518 = vmatpush3.bf16.xpose.msra.mxu1 %v1016_v45  ;;  %v5941_v45 = vsel %vm925_vm13, -1e+30, %v5440_v50 }
 0x2a6   : > { %4946 = vmatprep.subr.msk.bf16.mxu1 %vm990_vm1, %v977_v5  ;;  %v893_v5 = vadd.s32 80, %v5882_v42 }
 0x2a8   : > { %vm911_vm7 = vcmp.gt.s32.totalorder %v5885_v24, %v893_v5  ;;  %v898_v5 = vadd.s32 120, %v5882_v42 }
 0x2a9   : > { %vm928_vm10 = vmor %vm911_vm7, %vm917_vm3 }
 0x2aa   : > { %vm916_vm5 = vcmp.gt.s32.totalorder %v5885_v24, %v898_v5 }
 0x2ab   : > { %v979_v31 = vpop.permute.xlu1 %978 }
 0x2ac   : > { %v1022_v8 = vsel %vm990_vm1, %v979_v31, 0 }
 0x2ad   : > { %4520 = vmatpush3.bf16.xpose.msra.mxu1 %v1019_v6 }
 0x2ae   : > { %4947 = vmatprep.subr.msk.bf16.mxu1 %vm990_vm1, %v979_v31 }
 0x2af   : > { %v981_v7 = vpop.permute.xlu1 %980 }
 0x2b0   : > { %v1025_v14 = vsel %vm990_vm1, %v981_v7, 0 }
 0x2b3   : > { %v985_v43 = vpop.permute.xlu1 %984  ;;  %v983_v9 = vpop.permute.xlu0 %982 }
 0x2b4   : > { %v1028_v26 = vsel %vm990_vm1, %v983_v9, 0  ;;  %v1031_v30 = vsel %vm990_vm1, %v985_v43, 0 }
 0x2b5   : > { %4522 = vmatpush3.bf16.xpose.msra.mxu1 %v1022_v8 }
 0x2b6   : > { %4948 = vmatprep.subr.msk.bf16.mxu1 %vm990_vm1, %v981_v7  ;;  %v5950_v7 = vsel %vm924_vm15, -1e+30, %v5440_v50 }
 0x2b7   : > { %7450 = vst [vmem:[#allocation3_spill] sm:$0xff] %v5950_v7 }
 0x2ba   : > { %v989_v54 = vpop.permute.xlu1 %988 }
 0x2bb   : > { %v987_v13 = vpop.permute.xlu0 %986  ;;  %v1037_v10 = vsel %vm990_vm1, %v989_v54, 0 }
 0x2bc   : > { %v1034_v34 = vsel %vm990_vm1, %v987_v13, 0 }
 0x2bd   : > { %4524 = vmatpush3.bf16.xpose.msra.mxu1 %v1025_v14  ;;  %v891_v14 = vadd.s32 64, %v5882_v42 }
 0x2be   : > { %4949 = vmatprep.subr.msk.bf16.mxu1 %vm990_vm1, %v983_v9  ;;  %v1291_v55 = vpop.permute.xlu1 %1290 }
 0x2bf   : > { %v1289_v22 = vpop.permute.xlu0 %1288  ;;  %vm909_vm11 = vcmp.gt.s32.totalorder %v5885_v24, %v891_v14 }
 0x2c0   : > { %4549 = vmatprep.subr.bf16.mxu0 %v1289_v22  ;;  %vm926_vm13 = vmor %vm909_vm11, %vm917_vm3 }
 0x2c1   : > { %4550 = vmatpush3.bf16.msra.mxu0 %v1289_v22  ;;  %v6011_v49 = vsel %vm926_vm13, -1e+30, %v5440_v50 }
 0x2c2   : > { %4551 = vmatprep.subr.bf16.mxu0 %v1291_v55  ;;  %v1295_v27 = vpop.permute.xlu1 %1294  ;;  %7453 = vst [vmem:[#allocation6_spill] sm:$0xff] %v6011_v49 }
 0x2c3   : > { %v1293_v16 = vpop.permute.xlu0 %1292 }
 0x2c5   : > { %4526 = vmatpush3.bf16.xpose.msra.mxu1 %v1028_v26  ;;  %4552 = vmatpush3.bf16.msra.mxu0 %v1291_v55  ;;  %v5972_v55 = vsel %vm922_vm6, -1e+30, %v5440_v50  ;;  %vm933_vm6 = vmor %vm916_vm5, %vm917_vm3 }
 0x2c6   : > { %4950 = vmatprep.subr.msk.bf16.mxu1 %vm990_vm1, %v985_v43  ;;  %4553 = vmatprep.subr.bf16.mxu0 %v1293_v16  ;;  %v1299_v33 = vpop.permute.xlu1 %1298  ;;  %v892_v43 = vadd.s32 72, %v5882_v42  ;;  %7451 = vst [vmem:[#allocation4_spill] sm:$0xff] %v5972_v55 }
 0x2c7   : > { %v1297_v0 = vpop.permute.xlu0 %1296 }
 0x2c8   : > { %vm910_vm9 = vcmp.gt.s32.totalorder %v5885_v24, %v892_v43 }
 0x2c9   : > { %4554 = vmatpush3.bf16.msra.mxu0 %v1293_v16  ;;  %vm927_vm12 = vmor %vm910_vm9, %vm917_vm3 }
 0x2ca   : > { %4555 = vmatprep.subr.bf16.mxu0 %v1295_v27  ;;  %v1303_v39 = vpop.permute.xlu1 %1302  ;;  %v6002_v36 = vsel %vm927_vm12, -1e+30, %v5440_v50 }
 0x2cb   : > { %v5861_v32 = vpop.permute.xlu0 %1442 }
 0x2cd   : > { %4528 = vmatpush3.bf16.xpose.msra.mxu1 %v1031_v30  ;;  %4556 = vmatpush3.bf16.msra.mxu0 %v1295_v27  ;;  %v5983_v27 = vsel %vm929_vm8, -1e+30, %v5440_v50 }
 0x2ce   : > { %4951 = vmatprep.subr.msk.bf16.mxu1 %vm990_vm1, %v987_v13  ;;  %4557 = vmatprep.subr.bf16.mxu0 %v1297_v0  ;;  %v5961_v13 = vsel %vm923_vm4, -1e+30, %v5440_v50  ;;  %vm930_vm4 = vmor %vm913_vm2, %vm917_vm3  ;;  %v6067_v14 = vpop.permute.xlu1 %1444 }
 0x2cf   : > { %v1301_v38 = vpop.permute.xlu0 %1300  ;;  %v6034_v47 = vsel %vm930_vm4, -1e+30, %v5440_v50 }
 0x2d0   : > { %7455 = vst [vmem:[#allocation8_spill] sm:$0xff] %v6034_v47 }
 0x2d1   : > { %4558 = vmatpush3.bf16.msra.mxu0 %v1297_v0  ;;  %v897_v0 = vadd.s32 112, %v5882_v42 }
 0x2d2   : > { %4559 = vmatprep.subr.bf16.mxu0 %v1299_v33 }
 0x2d3   : > { %vm915_vm14 = vcmp.gt.s32.totalorder %v5885_v24, %v897_v0 }
 0x2d4   : > { %vm932_vm15 = vmor %vm915_vm14, %vm917_vm3 }
 0x2d5   : > { %4530 = vmatpush3.bf16.xpose.msra.mxu1 %v1034_v34  ;;  %4560 = vmatpush3.bf16.msra.mxu0 %v1299_v33  ;;  %v5993_v34 = vsel %vm928_vm10, -1e+30, %v5440_v50 }
 0x2d6   : > { %4952 = vmatprep.subr.msk.bf16.mxu1 %vm990_vm1, %v989_v54  ;;  %4561 = vmatprep.subr.bf16.mxu0 %v1301_v38  ;;  %7452 = vst [vmem:[#allocation5_spill] sm:$0xff] %v5993_v34 }
 0x2d9   : > { %4562 = vmatpush3.bf16.msra.mxu0 %v1301_v38 }
 0x2da   : > { %4563 = vmatprep.subr.bf16.mxu0 %v1303_v39 }
 0x2dd   : > { %4532 = vmatpush3.bf16.xpose.msra.mxu1 %v1037_v10  ;;  %4564 = vmatpush3.bf16.msra.mxu0 %v1303_v39 }
 0x2de   : > { %4953 = vmatprep.subr.msk.bf16.mxu0 %vm990_vm1, %v5861_v32 }
 0x2e4   : > { %4534 = vmatmul.mubr.msk.bf16.vlgmr.msra.gmra.mrb[0].mxu1 %vm990_vm1, %v5778_v18 }
 0x2e5   : > { %4537 = vmatprep.mubr.msk.bf16.mxu1 %vm990_vm1, %v5798_v41 }
 0x2ec   : > { %4538 = vmatmul.mubr.msk.bf16.gmra.mrb[4].mxu1 %vm990_vm1, %v5796_v1 }
 0x2ed   : > { %4541 = vmatprep.mubr.msk.bf16.mxu1 %vm990_vm1, %v5814_v53 }
 0x2f4   : > { %4542 = vmatmul.mubr.msk.bf16.gmra.mrb[8].mxu1 %vm990_vm1, %v5812_v29 }
 0x2f5   : > { %4545 = vmatprep.mubr.msk.bf16.mxu1 %vm990_vm1, %v5832_v25 }
 0x2fc   : > { %4546 = vmatmul.mubr.msk.bf16.gmra.mrb[12].mxu1 %vm990_vm1, %v5828_v3 }
 0x3b7   : > { %v4535_v23 = vpop.f32.mrb[0].mxu1 }
 0x3b8   : > { %v5907_v56 = vadd.f32 %v4535_v23, %v5897_v11  ;;  %v1073_v57 = vpop.f32.mrb[1].mxu1 }
 0x3b9   : > { %v4536_v35 = vpop.f32.mrb[2].mxu1  ;;  %v5926_v62 = vadd.f32 %v1073_v57, %v5913_v37 }
 0x3ba   : > { %1140 = vmax.xlane.f32.xlu0 %v5907_v56  ;;  %v1076_v59 = vpop.f32.mrb[3].mxu1  ;;  %v5945_v31 = vadd.f32 %v4536_v35, %v5931_v21  ;;  %v6025_v35 = vsel %vm932_vm15, -1e+30, %v5440_v50 }
 0x3bb   : > { %v5921_v60 = vadd.f32 %v1076_v59, %v5910_v17  ;;  %7454 = vst [vmem:[#allocation7_spill] sm:$0xff] %v6025_v35 }
 0x3bd   : > { %1138 = vmax.xlane.f32.xlu1 %v5921_v60 }
 0x3be   : > { %1136 = vmax.xlane.f32.xlu0 %v5926_v62 }
 0x3bf   : > { %v4539_v4 = vpop.f32.mrb[4].mxu1 }
 0x3c0   : > { %v1089_v6 = vpop.f32.mrb[5].mxu1  ;;  %v5966_v22 = vadd.f32 %v4539_v4, %v5950_v7 }
 0x3c1   : > { %v4540_v8 = vpop.f32.mrb[6].mxu1  ;;  %v5987_v30 = vadd.f32 %v1089_v6, %v5972_v55  ;;  %v896_v6 = vadd.s32 104, %v5882_v42 }
 0x3c2   : > { %v5957_v9 = vadd.f32 %v4540_v8, %v5941_v45  ;;  %v1092_v54 = vpop.f32.mrb[7].mxu1  ;;  %1142 = vmax.xlane.f32.xlu0 %v5945_v31  ;;  %v6052_v8 = vsel %vm933_vm6, -1e+30, %v5440_v50 }
 0x3c3   : > { %v5976_v16 = vadd.f32 %v1092_v54, %v5961_v13  ;;  %vm914_vm7 = vcmp.gt.s32.totalorder %v5885_v24, %v896_v6  ;;  %7456 = vst [vmem:[#allocation9_spill] sm:$0xff] %v6052_v8 }
 0x3c4   : > { %1150 = vmax.xlane.f32.xlu1 %v5957_v9  ;;  %vm931_vm8 = vmor %vm914_vm7, %vm917_vm3  ;;  %vm1909_vm3 = vcmask 1043456  }
 0x3c5   : > { %v6060_v54 = vsel %vm931_vm8, -1e+30, %v5440_v50 }
 0x3c6   : > { %1148 = vmax.xlane.f32.xlu0 %v5966_v22  ;;  %7457 = vst [vmem:[#allocation10_spill] sm:$0xff] %v6060_v54 }
 0x3c7   : > { %v4543_v26 = vpop.f32.mrb[8].mxu1 }
 0x3c8   : > { %v1105_v33 = vpop.f32.mrb[9].mxu1  ;;  %1146 = vmax.xlane.f32.xlu1 %v5976_v16  ;;  %v6007_v48 = vadd.f32 %v4543_v26, %v5993_v34 }
 0x3c9   : > { %v4544_v38 = vpop.f32.mrb[10].mxu1  ;;  %v6021_v52 = vadd.f32 %v1105_v33, %v6011_v49 }
 0x3ca   : > { %v5998_v39 = vadd.f32 %v4544_v38, %v5983_v27  ;;  %v1108_v10 = vpop.f32.mrb[11].mxu1  ;;  %1144 = vmax.xlane.f32.xlu0 %v5987_v30 }
 0x3cb   : > { %v6014_v51 = vadd.f32 %v1108_v10, %v6002_v36 }
 0x3cc   : > { %1158 = vmax.xlane.f32.xlu1 %v5998_v39 }
 0x3ce   : > { %1156 = vmax.xlane.f32.xlu0 %v6007_v48 }
 0x3cf   : > { %v4547_v23 = vpop.f32.mrb[12].mxu1 }
 0x3d0   : > { %v1121_v57 = vpop.f32.mrb[13].mxu1  ;;  %1154 = vmax.xlane.f32.xlu1 %v6014_v51  ;;  %v6031_v61 = vadd.f32 %v4547_v23, %v6025_v35 }
 0x3d1   : > { %v4548_v58 = vpop.f32.mrb[14].mxu1  ;;  %v6038_v4 = vadd.f32 %v1121_v57, %v6034_v47 }
 0x3d2   : > { %v1124_v59 = vpop.f32.mrb[15].mxu1  ;;  %1152 = vmax.xlane.f32.xlu0 %v6021_v52  ;;  %v6057_v43 = vadd.f32 %v4548_v58, %v6052_v8 }
 0x3d3   : > { %v6064_v42 = vadd.f32 %v1124_v59, %v6060_v54 }
 0x3d6   : > { %1164 = vmax.xlane.f32.xlu0 %v6031_v61 }
 0x3da   : > { %1160 = vmax.xlane.f32.xlu0 %v6038_v4 }
 0x3e1   : > { %1448 = vrot.lane.b32.xlu1 %v5792_v20, %s5439_s29 }
 0x3f0   : > { %1446 = vrot.lane.b32.xlu0 %v5794_v40, %s5439_s29 }
 0x405   : > { %1166 = vmax.xlane.f32.xlu1 %v6057_v43 }
 0x409   : > { %1162 = vmax.xlane.f32.xlu1 %v6064_v42 }
 0x447   : > { %v1141_v26 = vpop.xlane.xlu0 %1140 }
 0x448   : > { %v1170_v0 = vsub.f32 %v5907_v56, %v1141_v26 }
 0x44a   : > { %v1188_v24 = vmul.f32 1.442695, %v1170_v0  ;;  %v1139_v33 = vpop.xlane.xlu1 %1138 }
 0x44b   : > { %v1169_v38 = vsub.f32 %v5921_v60, %v1139_v33  ;;  %v1137_v10 = vpop.xlane.xlu0 %1136 }
 0x44c   : > { %5045 = vpow2.f32 %v1188_v24  ;;  %v1168_v50 = vsub.f32 %v5926_v62, %v1137_v10 }
 0x44d   : > { %v1186_v46 = vmul.f32 1.442695, %v1169_v38 }
 0x44e   : > { %v1184_v23 = vmul.f32 1.442695, %v1168_v50 }
 0x44f   : > { %5047 = vpow2.f32 %v1186_v46  ;;  %v1143_v57 = vpop.xlane.xlu0 %1142 }
 0x450   : > { %5049 = vpow2.f32 %v1184_v23  ;;  %v1171_v58 = vsub.f32 %v5945_v31, %v1143_v57 }
 0x451   : > { %v1151_v26 = vpop.xlane.xlu1 %1150 }
 0x452   : > { %v1190_v59 = vmul.f32 1.442695, %v1171_v58  ;;  %v1175_v58 = vsub.f32 %v5957_v9, %v1151_v26 }
 0x453   : > { %v1149_v6 = vpop.xlane.xlu0 %1148 }
 0x454   : > { %5051 = vpow2.f32 %v1190_v59  ;;  %v1174_v24 = vsub.f32 %v5966_v22, %v1149_v6  ;;  %v1198_v35 = vmul.f32 1.442695, %v1175_v58 }
 0x455   : > { %v1147_v33 = vpop.xlane.xlu1 %1146 }
 0x456   : > { %v6073_v5 = vpop.eup %5045  ;;  %v1196_v10 = vmul.f32 1.442695, %v1174_v24  ;;  %v1173_v46 = vsub.f32 %v5976_v16, %v1147_v33 }
 0x457   : > { %1220 = vadd.xlane.f32.xlu1 %v6073_v5  ;;  %v1145_v31 = vpop.xlane.xlu0 %1144 }
 0x458   : > { %v1172_v50 = vsub.f32 %v5987_v30, %v1145_v31  ;;  %5053 = vpow2.f32 %v1196_v10  ;;  %v1194_v54 = vmul.f32 1.442695, %v1173_v46 }
 0x459   : > { %v6076_v56 = vpop.eup %5047  ;;  %v1159_v23 = vpop.xlane.xlu1 %1158 }
 0x45a   : > { %v6078_v60 = vpop.eup %5049  ;;  %1218 = vadd.xlane.f32.xlu0 %v6076_v56  ;;  %v1192_v59 = vmul.f32 1.442695, %v1172_v50  ;;  %v1179_v9 = vsub.f32 %v5998_v39, %v1159_v23 }
 0x45b   : > { %1216 = vadd.xlane.f32.xlu1 %v6078_v60  ;;  %v1157_v0 = vpop.xlane.xlu0 %1156 }
 0x45c   : > { %v1178_v8 = vsub.f32 %v6007_v48, %v1157_v0  ;;  %5055 = vpow2.f32 %v1192_v59 }
 0x45d   : > { %v1155_v47 = vpop.xlane.xlu1 %1154  ;;  %5057 = vpow2.f32 %v1194_v54 }
 0x45e   : > { %v6082_v62 = vpop.eup %5051  ;;  %v1204_v6 = vmul.f32 1.442695, %v1178_v8  ;;  %5059 = vpow2.f32 %v1198_v35  ;;  %v1206_v8 = vmul.f32 1.442695, %v1179_v9 }
 0x45f   : > { %1222 = vadd.xlane.f32.xlu1 %v6082_v62  ;;  %v1153_v38 = vpop.xlane.xlu0 %1152 }
 0x460   : > { %v1176_v30 = vsub.f32 %v6021_v52, %v1153_v38  ;;  %5061 = vpow2.f32 %v1204_v6  ;;  %v1177_v52 = vsub.f32 %v6014_v51, %v1155_v47 }
 0x461   : > { %v6100_v48 = vpop.permute.xlu1 %1448 }
 0x462   : > { %v1200_v26 = vmul.f32 1.442695, %v1176_v30  ;;  %v6098_v33 = vpop.eup %5053  ;;  %v1202_v0 = vmul.f32 1.442695, %v1177_v52 }
 0x463   : > { %v1165_v57 = vpop.xlane.xlu0 %1164 }
 0x464   : > { %v1182_v22 = vsub.f32 %v6031_v61, %v1165_v57 }
 0x466   : > { %v1212_v16 = vmul.f32 1.442695, %v1182_v22  ;;  %v6104_v35 = vpop.eup %5055 }
 0x467   : > { %v1161_v31 = vpop.xlane.xlu0 %1160 }
 0x468   : > { %v1180_v24 = vsub.f32 %v6038_v4, %v1161_v31  ;;  %5063 = vpow2.f32 %v1212_v16  ;;  %v6106_v4 = vpop.eup %5057 }
 0x469   : > { %5065 = vpow2.f32 %v1200_v26  ;;  %v6111_v10 = vpop.eup %5059 }
 0x46a   : > { %v1208_v61 = vmul.f32 1.442695, %v1180_v24  ;;  %v6113_v51 = vpop.eup %5061 }
 0x46b   : > { %v1447_v6 = vpop.permute.xlu0 %1446 }
 0x46c   : > { %5067 = vpow2.f32 %v1208_v61 }
 0x46d   : > { %5069 = vpow2.f32 %v1206_v8 }
 0x470   : > { %1450 = vrot.lane.b32.xlu0 %v5810_v28, %s5439_s29  ;;  %1452 = vrot.lane.b32.xlu1 %v5808_v44, %s5439_s29 }
 0x472   : > { %v6118_v46 = vpop.eup %5063 }
 0x473   : > { %v6120_v23 = vpop.eup %5065 }
 0x476   : > { %v6124_v57 = vpop.eup %5067 }
 0x477   : > { %v6126_v58 = vpop.eup %5069 }
 0x48f   : > { %1228 = vadd.xlane.f32.xlu0 %v6098_v33 }
 0x492   : > { %v1167_v54 = vpop.xlane.xlu1 %1166 }
 0x493   : > { %v1183_v39 = vsub.f32 %v6057_v43, %v1167_v54  ;;  %1224 = vadd.xlane.f32.xlu0 %v6104_v35 }
 0x494   : > { %1226 = vadd.xlane.f32.xlu1 %v6106_v4 }
 0x495   : > { %v1214_v38 = vmul.f32 1.442695, %v1183_v39 }
 0x496   : > { %v1163_v50 = vpop.xlane.xlu1 %1162 }
 0x497   : > { %5071 = vpow2.f32 %v1214_v38  ;;  %v1181_v47 = vsub.f32 %v6064_v42, %v1163_v50  ;;  %1230 = vadd.xlane.f32.xlu0 %v6111_v10 }
 0x498   : > { %1236 = vadd.xlane.f32.xlu1 %v6113_v51  ;;  %5073 = vpow2.f32 %v1202_v0 }
 0x499   : > { %v1210_v43 = vmul.f32 1.442695, %v1181_v47  ;;  %v1483_v47 = vsel %vm990_vm1, %v5861_v32, 0 }
 0x49b   : > { %1244 = vadd.xlane.f32.xlu0 %v6118_v46  ;;  %5075 = vpow2.f32 %v1210_v43 }
 0x49c   : > { %1232 = vadd.xlane.f32.xlu1 %v6120_v23 }
 0x49f   : > { %1240 = vadd.xlane.f32.xlu0 %v6124_v57 }
 0x4a0   : > { %1238 = vadd.xlane.f32.xlu1 %v6126_v58 }
 0x4a1   : > { %v6130_v42 = vpop.eup %5071 }
 0x4a2   : > { %v6132_v59 = vpop.eup %5073 }
 0x4a3   : > { %1246 = vadd.xlane.f32.xlu0 %v6130_v42 }
 0x4a4   : > { %1234 = vadd.xlane.f32.xlu1 %v6132_v59 }
 0x4a5   : > { %v6136_v22 = vpop.eup %5075 }
 0x4a8   : > { %1242 = vadd.xlane.f32.xlu1 %v6136_v22 }
 0x4b9   : > { %1456 = vrot.lane.b32.xlu1 %v5824_v63, %s5439_s29  ;;  %1454 = vrot.lane.b32.xlu0 %v5826_v2, %s5439_s29 }
 0x4bd   : > { %1428 = vrot.lane.b32.xlu1 %v5778_v18, %s5441_s14  ;;  %1426 = vrot.lane.b32.xlu0 %v5782_v19, %s5441_s14 }
 0x4c1   : > { %1432 = vrot.lane.b32.xlu1 %v5796_v1, %s5441_s14  ;;  %1430 = vrot.lane.b32.xlu0 %v5798_v41, %s5441_s14 }
 0x4c5   : > { %1436 = vrot.lane.b32.xlu1 %v5812_v29, %s5441_s14  ;;  %1434 = vrot.lane.b32.xlu0 %v5814_v53, %s5441_s14 }
 0x4c9   : > { %1440 = vrot.lane.b32.xlu1 %v5828_v3, %s5441_s14  ;;  %1438 = vrot.lane.b32.xlu0 %v5832_v25, %s5441_s14 }
 0x4cd   : > { %2152 = vrot.lane.b32.xlu1 %v5774_v12, %s5442_s15  ;;  %2150 = vrot.lane.b32.xlu0 %v5776_v15, %s5442_s15 }
 0x4d1   : > { %2156 = vrot.lane.b32.xlu1 %v5792_v20, %s5442_s15  ;;  %2154 = vrot.lane.b32.xlu0 %v5794_v40, %s5442_s15 }
 0x4d5   : > { %2160 = vrot.lane.b32.xlu1 %v5808_v44, %s5442_s15  ;;  %2158 = vrot.lane.b32.xlu0 %v5810_v28, %s5442_s15 }
 0x4d9   : > { %2164 = vrot.lane.b32.xlu1 %v5824_v63, %s5442_s15  ;;  %2162 = vrot.lane.b32.xlu0 %v5826_v2, %s5442_s15 }
 0x4dd   : > { %2136 = vrot.lane.b32.xlu1 %v5778_v18, %s5443_s16  ;;  %2134 = vrot.lane.b32.xlu0 %v5782_v19, %s5443_s16 }
 0x4e1   : > { %2140 = vrot.lane.b32.xlu1 %v5796_v1, %s5443_s16  ;;  %2138 = vrot.lane.b32.xlu0 %v5798_v41, %s5443_s16 }
 0x4e4   : > { %v1221_v30 = vpop.xlane.xlu1 %1220 }
 0x4e5   : > { %2144 = vrot.lane.b32.xlu1 %v5812_v29, %s5443_s16  ;;  %2142 = vrot.lane.b32.xlu0 %v5814_v53, %s5443_s16 }
 0x4e7   : > { %v1219_v31 = vpop.xlane.xlu0 %1218 }
 0x4e8   : > { %5077 = vrcp.f32 %v1219_v31  ;;  %v1217_v16 = vpop.xlane.xlu1 %1216 }
 0x4e9   : > { %5079 = vrcp.f32 %v1217_v16  ;;  %2148 = vrot.lane.b32.xlu1 %v5828_v3, %s5443_s16  ;;  %2146 = vrot.lane.b32.xlu0 %v5832_v25, %s5443_s16 }
 0x4ea   : > { %5081 = vrcp.f32 %v1221_v30 }
 0x4eb   : > { %v1451_v32 = vpop.permute.xlu0 %1450 }
 0x4ec   : > { %v1223_v24 = vpop.xlane.xlu1 %1222 }
 0x4ed   : > { %5083 = vrcp.f32 %v1223_v24  ;;  %1755 = vrot.lane.b32.xlu1 %v5776_v15, %s5444_s17  ;;  %1759 = vrot.lane.b32.xlu0 %v5794_v40, %s5444_s17 }
 0x4f1   : > { %1757 = vrot.lane.b32.xlu1 %v5774_v12, %s5444_s17 }
 0x4f2   : > { %v5078_v9 = vpop.eup %5077 }
 0x4f3   : > { %v5080_v26 = vpop.eup %5079  ;;  %v1265_v61 = vmul.f32 %v5078_v9, %v6076_v56  ;;  %v1486_v56 = vsel %vm990_vm1, %v6067_v14, 0 }
 0x4f4   : > { %v1264_v8 = vmul.f32 %v5080_v26, %v6078_v60  ;;  %v5082_v52 = vpop.eup %5081  ;;  %v1492_v60 = vsel %vm990_vm1, %v6100_v48, 0 }
 0x4f5   : > { %1761 = vrot.lane.b32.xlu1 %v5792_v20, %s5444_s17  ;;  %v1266_v0 = vmul.f32 %v5082_v52, %v6073_v5  ;;  %v1489_v5 = vsel %vm990_vm1, %v1447_v6, 0 }
 0x4f6   : > { %v1280_v54 = vpack.c.bf16 %v1265_v61, %v1264_v8 }
 0x4f7   : > { %v5084_v39 = vpop.eup %5083 }
 0x4f8   : > { %v1267_v38 = vmul.f32 %v5084_v39, %v6082_v62  ;;  %4565 = vmatprep.mubr.bf16.mxu0 %v1280_v54  ;;  %v1495_v62 = vsel %vm990_vm1, %v1451_v32, 0 }
 0x4fa   : > { %v1281_v50 = vpack.c.bf16 %v1267_v38, %v1266_v0 }
 0x4fc   : > { %4566 = vmatmul.mubr.bf16.vlgmr.msra.gmra.mrb[16].mxu0 %v1281_v50 }
 0x4fd   : > { %4582 = vmatpush3.bf16.xpose.msra.mxu0 %v1483_v47 }
 0x4fe   : > { %4954 = vmatprep.subr.msk.bf16.mxu0 %vm990_vm1, %v6067_v14  ;;  %v1453_v14 = vpop.permute.xlu1 %1452 }
 0x4ff   : > { %v1498_v31 = vsel %vm990_vm1, %v1453_v14, 0 }
 0x505   : > { %4584 = vmatpush3.bf16.xpose.msra.mxu0 %v1486_v56 }
 0x506   : > { %4955 = vmatprep.subr.msk.bf16.mxu0 %vm990_vm1, %v1447_v6 }
 0x50d   : > { %4586 = vmatpush3.bf16.xpose.msra.mxu0 %v1489_v5 }
 0x50e   : > { %4956 = vmatprep.subr.msk.bf16.mxu0 %vm990_vm1, %v6100_v48 }
 0x515   : > { %4588 = vmatpush3.bf16.xpose.msra.mxu0 %v1492_v60 }
 0x516   : > { %4957 = vmatprep.subr.msk.bf16.mxu0 %vm990_vm1, %v1451_v32 }
 0x51c   : > { %v1229_v43 = vpop.xlane.xlu0 %1228 }
 0x51d   : > { %4590 = vmatpush3.bf16.xpose.msra.mxu0 %v1495_v62 }
 0x51e   : > { %4958 = vmatprep.subr.msk.bf16.mxu0 %vm990_vm1, %v1453_v14 }
 0x520   : > { %v1225_v30 = vpop.xlane.xlu0 %1224 }
 0x521   : > { %5085 = vrcp.f32 %v1225_v30  ;;  %v1227_v6 = vpop.xlane.xlu1 %1226 }
 0x522   : > { %5087 = vrcp.f32 %v1227_v6 }
 0x523   : > { %5089 = vrcp.f32 %v1229_v43 }
 0x524   : > { %v1231_v16 = vpop.xlane.xlu0 %1230 }
 0x525   : > { %4592 = vmatpush3.bf16.xpose.msra.mxu0 %v1498_v31  ;;  %5091 = vrcp.f32 %v1231_v16  ;;  %v1237_v48 = vpop.xlane.xlu1 %1236 }
 0x528   : > { %v1245_v24 = vpop.xlane.xlu0 %1244 }
 0x529   : > { %v1233_v9 = vpop.xlane.xlu1 %1232 }
 0x52b   : > { %v5086_v26 = vpop.eup %5085 }
 0x52c   : > { %v5088_v61 = vpop.eup %5087  ;;  %v1241_v8 = vpop.xlane.xlu0 %1240  ;;  %v1268_v52 = vmul.f32 %v5086_v26, %v6104_v35 }
 0x52d   : > { %v5090_v54 = vpop.eup %5089  ;;  %v1239_v39 = vpop.xlane.xlu1 %1238  ;;  %v1269_v0 = vmul.f32 %v5088_v61, %v6106_v4 }
 0x52e   : > { %5093 = vrcp.f32 %v1239_v39  ;;  %v1270_v56 = vmul.f32 %v5090_v54, %v6098_v33 }
 0x52f   : > { %v5092_v38 = vpop.eup %5091  ;;  %v1282_v50 = vpack.c.bf16 %v1269_v0, %v1268_v52  ;;  %5095 = vrcp.f32 %v1233_v9 }
 0x530   : > { %v1247_v47 = vpop.xlane.xlu0 %1246  ;;  %v1271_v5 = vmul.f32 %v5092_v38, %v6111_v10  ;;  %5097 = vrcp.f32 %v1237_v48 }
 0x531   : > { %v1235_v60 = vpop.xlane.xlu1 %1234  ;;  %4569 = vmatprep.mubr.bf16.mxu0 %v1282_v50 }
 0x532   : > { %5099 = vrcp.f32 %v1235_v60  ;;  %v1283_v32 = vpack.c.bf16 %v1271_v5, %v1270_v56 }
 0x533   : > { %5101 = vrcp.f32 %v1241_v8 }
 0x534   : > { %4570 = vmatmul.mubr.bf16.gmra.mrb[20].mxu0 %v1283_v32  ;;  %v1455_v35 = vpop.permute.xlu0 %1454 }
 0x535   : > { %v1243_v62 = vpop.xlane.xlu1 %1242  ;;  %4959 = vmatprep.subr.msk.bf16.mxu0 %vm990_vm1, %v1455_v35  ;;  %v1501_v4 = vsel %vm990_vm1, %v1455_v35, 0 }
 0x536   : > { %5103 = vrcp.f32 %v1243_v62  ;;  %4594 = vmatpush3.bf16.xpose.msra.mxu0 %v1501_v4 }
 0x537   : > { %5105 = vrcp.f32 %v1247_v47 }
 0x538   : > { %v1427_v43 = vpop.permute.xlu0 %1426  ;;  %v5094_v33 = vpop.eup %5093  ;;  %5107 = vrcp.f32 %v1245_v24 }
 0x539   : > { %v1457_v10 = vpop.permute.xlu1 %1456  ;;  %v5096_v14 = vpop.eup %5095  ;;  %v1275_v16 = vmul.f32 %v5094_v33, %v6126_v58 }
 0x53a   : > { %4960 = vmatprep.subr.msk.bf16.mxu0 %vm990_vm1, %v1457_v10  ;;  %v5098_v30 = vpop.eup %5097  ;;  %v1504_v9 = vsel %vm990_vm1, %v1457_v10, 0  ;;  %v1272_v26 = vmul.f32 %v5096_v14, %v6120_v23 }
 0x53b   : > { %v1274_v24 = vmul.f32 %v5098_v30, %v6113_v51 }
 0x53c   : > { %v5100_v6 = vpop.eup %5099  ;;  %v1431_v31 = vpop.permute.xlu0 %1430 }
 0x53d   : > { %v1429_v48 = vpop.permute.xlu1 %1428  ;;  %v1273_v61 = vmul.f32 %v5100_v6, %v6132_v59  ;;  %v5102_v8 = vpop.eup %5101  ;;  %v1285_v0 = vpack.c.bf16 %v1275_v16, %v1274_v24 }
 0x53e   : > { %4596 = vmatpush3.bf16.xpose.msra.mxu0 %v1504_v9  ;;  %v1276_v58 = vmul.f32 %v5102_v8, %v6124_v57 }
 0x53f   : > { %v1284_v52 = vpack.c.bf16 %v1273_v61, %v1272_v26 }
 0x540   : > { %v5104_v54 = vpop.eup %5103  ;;  %v1435_v39 = vpop.permute.xlu0 %1434 }
 0x541   : > { %v5106_v38 = vpop.eup %5105  ;;  %v1433_v50 = vpop.permute.xlu1 %1432  ;;  %4573 = vmatprep.mubr.bf16.mxu0 %v1284_v52  ;;  %v1277_v47 = vmul.f32 %v5104_v54, %v6136_v22 }
 0x542   : > { %4574 = vmatmul.mubr.bf16.gmra.mrb[24].mxu0 %v1285_v0  ;;  %v5108_v56 = vpop.eup %5107  ;;  %v1279_v59 = vmul.f32 %v5106_v38, %v6130_v42 }
 0x543   : > { %v1286_v23 = vpack.c.bf16 %v1277_v47, %v1276_v58  ;;  %v1278_v51 = vmul.f32 %v5108_v56, %v6118_v46 }
 0x544   : > { %v1439_v5 = vpop.permute.xlu0 %1438 }
 0x545   : > { %v1437_v60 = vpop.permute.xlu1 %1436  ;;  %4577 = vmatprep.mubr.bf16.mxu0 %v1286_v23  ;;  %v1287_v35 = vpack.c.bf16 %v1279_v59, %v1278_v51 }
 0x548   : > { %v2151_v32 = vpop.permute.xlu0 %2150 }
 0x549   : > { %v1441_v62 = vpop.permute.xlu1 %1440  ;;  %4963 = vmatprep.subr.msk.bf16.mxu0 %vm990_vm1, %v2151_v32  ;;  %v2191_v42 = vsel %vm990_vm1, %v2151_v32, 0 }
 0x54a   : > { %4578 = vmatmul.mubr.bf16.gmra.mrb[28].mxu0 %v1287_v35 }
 0x54b   : > { %4597 = vmatprep.mubr.msk.bf16.mxu0 %vm990_vm1, %v1427_v43 }
 0x54c   : > { %v2155_v57 = vpop.permute.xlu0 %2154 }
 0x54d   : > { %v2153_v22 = vpop.permute.xlu1 %2152 }
 0x54e   : > { %v2194_v43 = vsel %vm990_vm1, %v2153_v22, 0 }
 0x550   : > { %v2159_v4 = vpop.permute.xlu0 %2158 }
 0x551   : > { %v2157_v33 = vpop.permute.xlu1 %2156 }
 0x552   : > { %4598 = vmatmul.mubr.msk.bf16.vlgmr.msra.gmra.mrb[32].mxu0 %vm990_vm1, %v1429_v48  ;;  %v2200_v8 = vsel %vm990_vm1, %v2157_v33, 0 }
 0x553   : > { %4682 = vmatpush3.bf16.xpose.msra.mxu0 %v2191_v42  ;;  %4601 = vmatprep.mubr.msk.bf16.mxu0 %vm990_vm1, %v1431_v31  ;;  %v2197_v31 = vsel %vm990_vm1, %v2155_v57, 0 }
 0x554   : > { %4964 = vmatprep.subr.msk.bf16.mxu0 %vm990_vm1, %v2153_v22  ;;  %v2163_v46 = vpop.permute.xlu0 %2162 }
 0x555   : > { %v2161_v10 = vpop.permute.xlu1 %2160  ;;  %v2209_v58 = vsel %vm990_vm1, %v2163_v46, 0 }
 0x558   : > { %v2135_v30 = vpop.permute.xlu0 %2134 }
 0x559   : > { %v2165_v14 = vpop.permute.xlu1 %2164 }
 0x55a   : > { %4602 = vmatmul.mubr.msk.bf16.gmra.mrb[36].mxu0 %vm990_vm1, %v1433_v50  ;;  %v2206_v50 = vsel %vm990_vm1, %v2161_v10, 0  ;;  %v2212_v47 = vsel %vm990_vm1, %v2165_v14, 0 }
 0x55b   : > { %4684 = vmatpush3.bf16.xpose.msra.mxu0 %v2194_v43  ;;  %4605 = vmatprep.mubr.msk.bf16.mxu0 %vm990_vm1, %v1435_v39  ;;  %v2203_v39 = vsel %vm990_vm1, %v2159_v4, 0 }
 0x55c   : > { %4965 = vmatprep.subr.msk.bf16.mxu0 %vm990_vm1, %v2155_v57  ;;  %v2139_v16 = vpop.permute.xlu0 %2138 }
 0x55d   : > { %v2137_v6 = vpop.permute.xlu1 %2136 }
 0x560   : > { %v2143_v26 = vpop.permute.xlu0 %2142 }
 0x561   : > { %v2141_v48 = vpop.permute.xlu1 %2140 }
 0x562   : > { %4606 = vmatmul.mubr.msk.bf16.gmra.mrb[40].mxu0 %vm990_vm1, %v1437_v60 }
 0x563   : > { %4686 = vmatpush3.bf16.xpose.msra.mxu0 %v2197_v31  ;;  %4609 = vmatprep.mubr.msk.bf16.mxu0 %vm990_vm1, %v1439_v5 }
 0x564   : > { %4966 = vmatprep.subr.msk.bf16.mxu0 %vm990_vm1, %v2157_v33  ;;  %v2147_v24 = vpop.permute.xlu0 %2146 }
 0x565   : > { %v2145_v9 = vpop.permute.xlu1 %2144 }
 0x568   : > { %v1760_v0 = vpop.permute.xlu0 %1759 }
 0x569   : > { %v2149_v61 = vpop.permute.xlu1 %2148 }
 0x56a   : > { %4610 = vmatmul.mubr.msk.bf16.gmra.mrb[44].mxu0 %vm990_vm1, %v1441_v62 }
 0x56b   : > { %4688 = vmatpush3.bf16.xpose.msra.mxu0 %v2200_v8  ;;  %4697 = vmatprep.mubr.msk.bf16.mxu0 %vm990_vm1, %v2135_v30 }
 0x56c   : > { %4967 = vmatprep.subr.msk.bf16.mxu0 %vm990_vm1, %v2159_v4  ;;  %v7474_v4 = vld [vmem:[#allocation8_spill] sm:$0xff] }
 0x56d   : > { %v1756_v52 = vpop.permute.xlu1 %1755 }
 0x56e   : > { %4613 = vmatprep.subr.bf16.mxu1 %v1756_v52 }
 0x56f   : > { %4614 = vmatpush3.bf16.msra.mxu1 %v1756_v52 }
 0x571   : > { %v1758_v54 = vpop.permute.xlu1 %1757 }
 0x572   : > { %4615 = vmatprep.subr.bf16.mxu1 %v1758_v54 }
 0x573   : > { %4690 = vmatpush3.bf16.xpose.msra.mxu0 %v2203_v39  ;;  %4616 = vmatpush3.bf16.msra.mxu1 %v1758_v54 }
 0x574   : > { %4968 = vmatprep.subr.msk.bf16.mxu0 %vm990_vm1, %v2161_v10  ;;  %4617 = vmatprep.subr.bf16.mxu1 %v1760_v0 }
 0x575   : > { %v1762_v38 = vpop.permute.xlu1 %1761 }
 0x577   : > { %4618 = vmatpush3.bf16.msra.mxu1 %v1760_v0 }
 0x578   : > { %4619 = vmatprep.subr.bf16.mxu1 %v1762_v38 }
 0x57b   : > { %4692 = vmatpush3.bf16.xpose.msra.mxu0 %v2206_v50  ;;  %4620 = vmatpush3.bf16.msra.mxu1 %v1762_v38 }
 0x57c   : > { %4969 = vmatprep.subr.msk.bf16.mxu0 %vm990_vm1, %v2163_v46 }
 0x583   : > { %4694 = vmatpush3.bf16.xpose.msra.mxu0 %v2209_v58 }
 0x584   : > { %4970 = vmatprep.subr.msk.bf16.mxu0 %vm990_vm1, %v2165_v14 }
 0x58b   : > { %4696 = vmatpush3.bf16.xpose.msra.mxu0 %v2212_v47 }
 0x592   : > { %4698 = vmatmul.mubr.msk.bf16.vlgmr.msra.gmra.mrb[48].mxu0 %vm990_vm1, %v2137_v6 }
 0x593   : > { %4701 = vmatprep.mubr.msk.bf16.mxu0 %vm990_vm1, %v2139_v16 }
 0x59a   : > { %4702 = vmatmul.mubr.msk.bf16.gmra.mrb[52].mxu0 %vm990_vm1, %v2141_v48 }
 0x59b   : > { %4705 = vmatprep.mubr.msk.bf16.mxu0 %vm990_vm1, %v2143_v26 }
 0x5a2   : > { %4706 = vmatmul.mubr.msk.bf16.gmra.mrb[56].mxu0 %vm990_vm1, %v2145_v9 }
 0x5a3   : > { %4709 = vmatprep.mubr.msk.bf16.mxu0 %vm990_vm1, %v2147_v24 }
 0x5aa   : > { %4710 = vmatmul.mubr.msk.bf16.gmra.mrb[60].mxu0 %vm990_vm1, %v2149_v61 }
 0x5cf   : > { %v6243_v56 = vpop.f32.mrb[16].mxu0 }
 0x5d0   : > { %7458 = vst [vmem:[#allocation11_spill] sm:$0xff] %v6243_v56  ;;  %v6245_v23 = vpop.f32.mrb[17].mxu0 }
 0x5d1   : > { %7459 = vst [vmem:[#allocation12_spill] sm:$0xff] %v6245_v23  ;;  %v6247_v5 = vpop.f32.mrb[18].mxu0 }
 0x5d2   : > { %7460 = vst [vmem:[#allocation13_spill] sm:$0xff] %v6247_v5  ;;  %v6251_v60 = vpop.f32.mrb[19].mxu0 }
 0x5d3   : > { %7461 = vst [vmem:[#allocation14_spill] sm:$0xff] %v6251_v60 }
 0x607   : > { %v6255_v32 = vpop.f32.mrb[20].mxu0 }
 0x608   : > { %7462 = vst [vmem:[#allocation15_spill] sm:$0xff] %v6255_v32  ;;  %v6257_v35 = vpop.f32.mrb[21].mxu0 }
 0x609   : > { %7463 = vst [vmem:[#allocation16_spill] sm:$0xff] %v6257_v35  ;;  %v6259_v62 = vpop.f32.mrb[22].mxu0 }
 0x60a   : > { %7464 = vst [vmem:[#allocation17_spill] sm:$0xff] %v6259_v62  ;;  %v6263_v22 = vpop.f32.mrb[23].mxu0 }
 0x60b   : > { %7465 = vst [vmem:[#allocation18_spill] sm:$0xff] %v6263_v22 }
 0x615   : > { %v6267_v33 = vpop.f32.mrb[24].mxu0 }
 0x616   : > { %7466 = vst [vmem:[#allocation19_spill] sm:$0xff] %v6267_v33  ;;  %v6269_v42 = vpop.f32.mrb[25].mxu0 }
 0x617   : > { %7467 = vst [vmem:[#allocation20_spill] sm:$0xff] %v6269_v42  ;;  %v6271_v46 = vpop.f32.mrb[26].mxu0 }
 0x618   : > { %7468 = vst [vmem:[#allocation21_spill] sm:$0xff] %v6271_v46  ;;  %v6275_v14 = vpop.f32.mrb[27].mxu0 }
 0x619   : > { %7469 = vst [vmem:[#allocation22_spill] sm:$0xff] %v6275_v14 }
 0x61d   : > { %v6279_v30 = vpop.f32.mrb[28].mxu0 }
 0x61e   : > { %7470 = vst [vmem:[#allocation23_spill] sm:$0xff] %v6279_v30  ;;  %v6281_v6 = vpop.f32.mrb[29].mxu0 }
 0x61f   : > { %7471 = vst [vmem:[#allocation24_spill] sm:$0xff] %v6281_v6  ;;  %v6283_v16 = vpop.f32.mrb[30].mxu0 }
 0x620   : > { %7472 = vst [vmem:[#allocation25_spill] sm:$0xff] %v6283_v16  ;;  %v6287_v31 = vpop.f32.mrb[31].mxu0  ;;  %v7476_v16 = vld [vmem:[#allocation9_spill] sm:$0xff] }
 0x621   : > { %7473 = vst [vmem:[#allocation26_spill] sm:$0xff] %v6287_v31 }
 0x625   : > { %v4599_v26 = vpop.f32.mrb[32].mxu0 }
 0x626   : > { %v6292_v61 = vadd.f32 %v4599_v26, %v5897_v11  ;;  %v1540_v8 = vpop.f32.mrb[33].mxu0 }
 0x627   : > { %v4600_v24 = vpop.f32.mrb[34].mxu0  ;;  %v6299_v39 = vadd.f32 %v1540_v8, %v5913_v37 }
 0x628   : > { %1607 = vmax.xlane.f32.xlu0 %v6292_v61  ;;  %v1543_v52 = vpop.f32.mrb[35].mxu0  ;;  %v6304_v38 = vadd.f32 %v4600_v24, %v5931_v21 }
 0x629   : > { %v6296_v54 = vadd.f32 %v1543_v52, %v5910_v17 }
 0x62b   : > { %1605 = vmax.xlane.f32.xlu1 %v6296_v54 }
 0x62c   : > { %1603 = vmax.xlane.f32.xlu0 %v6299_v39 }
 0x62d   : > { %v4603_v0 = vpop.f32.mrb[36].mxu0 }
 0x62e   : > { %v1556_v50 = vpop.f32.mrb[37].mxu0  ;;  %v6312_v8 = vadd.f32 %v4603_v0, %v5950_v7 }
 0x62f   : > { %v6307_v58 = vadd.f32 %v1556_v50, %v5972_v55  ;;  %v4604_v47 = vpop.f32.mrb[38].mxu0 }
 0x630   : > { %1609 = vmax.xlane.f32.xlu0 %v6304_v38  ;;  %v1559_v26 = vpop.f32.mrb[39].mxu0  ;;  %v6315_v52 = vadd.f32 %v4604_v47, %v5941_v45 }
 0x631   : > { %1611 = vmax.xlane.f32.xlu1 %v6307_v58  ;;  %v6320_v50 = vadd.f32 %v1559_v26, %v5961_v13 }
 0x634   : > { %1615 = vmax.xlane.f32.xlu0 %v6312_v8 }
 0x635   : > { %1617 = vmax.xlane.f32.xlu1 %v6315_v52  ;;  %v4607_v24 = vpop.f32.mrb[40].mxu0 }
 0x636   : > { %v1572_v48 = vpop.f32.mrb[41].mxu0  ;;  %v6328_v47 = vadd.f32 %v4607_v24, %v5993_v34 }
 0x637   : > { %v6323_v9 = vadd.f32 %v1572_v48, %v6011_v49  ;;  %v4608_v10 = vpop.f32.mrb[42].mxu0 }
 0x638   : > { %1613 = vmax.xlane.f32.xlu0 %v6320_v50  ;;  %v1575_v0 = vpop.f32.mrb[43].mxu0  ;;  %v6331_v43 = vadd.f32 %v4608_v10, %v5983_v27  ;;  %v7475_v10 = vld [vmem:[#allocation7_spill] sm:$0xff] }
 0x639   : > { %1619 = vmax.xlane.f32.xlu1 %v6323_v9  ;;  %v6336_v48 = vadd.f32 %v1575_v0, %v6002_v36  ;;  %v7477_v0 = vld [vmem:[#allocation10_spill] sm:$0xff] }
 0x63c   : > { %1623 = vmax.xlane.f32.xlu0 %v6328_v47 }
 0x63d   : > { %1625 = vmax.xlane.f32.xlu1 %v6331_v43  ;;  %v4611_v26 = vpop.f32.mrb[44].mxu0 }
 0x63e   : > { %v1588_v57 = vpop.f32.mrb[45].mxu0  ;;  %v6344_v30 = vadd.f32 %v4611_v26, %v7475_v10 }
 0x63f   : > { %v6339_v59 = vadd.f32 %v1588_v57, %v7474_v4  ;;  %v4612_v51 = vpop.f32.mrb[46].mxu0 }
 0x640   : > { %1621 = vmax.xlane.f32.xlu0 %v6336_v48  ;;  %v1591_v24 = vpop.f32.mrb[47].mxu0  ;;  %v6347_v6 = vadd.f32 %v4612_v51, %v7476_v16 }
 0x641   : > { %1627 = vmax.xlane.f32.xlu1 %v6339_v59  ;;  %v6352_v31 = vadd.f32 %v1591_v24, %v7477_v0 }
 0x644   : > { %1631 = vmax.xlane.f32.xlu0 %v6344_v30 }
 0x645   : > { %1633 = vmax.xlane.f32.xlu1 %v6347_v6 }
 0x648   : > { %1629 = vmax.xlane.f32.xlu0 %v6352_v31 }
 0x656   : > { %1765 = vrot.lane.b32.xlu1 %v5808_v44, %s5444_s17 }
 0x65e   : > { %1763 = vrot.lane.b32.xlu0 %v5810_v28, %s5444_s17 }
 0x665   : > { %v6359_v57 = vpop.f32.mrb[48].mxu0 }
 0x666   : > { %7478 = vst [vmem:[#allocation9_spill] sm:$0xff] %v6359_v57  ;;  %v6361_v26 = vpop.f32.mrb[49].mxu0 }
 0x667   : > { %v6363_v51 = vpop.f32.mrb[50].mxu0 }
 0x668   : > { %7479 = vst [vmem:[#allocation10_spill] sm:$0xff] %v6363_v51  ;;  %v6365_v33 = vpop.f32.mrb[51].mxu0 }
 0x66d   : > { %v6367_v46 = vpop.f32.mrb[52].mxu0 }
 0x66e   : > { %7480 = vst [vmem:[#allocation27_spill] sm:$0xff] %v6367_v46  ;;  %v6369_v24 = vpop.f32.mrb[53].mxu0 }
 0x66f   : > { %7481 = vst [vmem:[#allocation28_spill] sm:$0xff] %v6369_v24  ;;  %v6371_v42 = vpop.f32.mrb[54].mxu0 }
 0x670   : > { %v6373_v14 = vpop.f32.mrb[55].mxu0 }
 0x675   : > { %v6375_v32 = vpop.f32.mrb[56].mxu0 }
 0x676   : > { %7482 = vst [vmem:[#allocation29_spill] sm:$0xff] %v6375_v32  ;;  %v6377_v62 = vpop.f32.mrb[57].mxu0 }
 0x677   : > { %7483 = vst [vmem:[#allocation30_spill] sm:$0xff] %v6377_v62  ;;  %v6379_v35 = vpop.f32.mrb[58].mxu0 }
 0x678   : > { %v6381_v22 = vpop.f32.mrb[59].mxu0 }
 0x67d   : > { %v6383_v56 = vpop.f32.mrb[60].mxu0 }
 0x67e   : > { %7484 = vst [vmem:[#allocation31_spill] sm:$0xff] %v6383_v56  ;;  %v6385_v5 = vpop.f32.mrb[61].mxu0 }
 0x67f   : > { %7485 = vst [vmem:[#allocation32_spill] sm:$0xff] %v6385_v5  ;;  %v6387_v23 = vpop.f32.mrb[62].mxu0 }
 0x680   : > { %v6389_v60 = vpop.f32.mrb[63].mxu0 }
 0x6b5   : > { %v1608_v10 = vpop.xlane.xlu0 %1607 }
 0x6b6   : > { %v1637_v4 = vsub.f32 %v6292_v61, %v1608_v10 }
 0x6b8   : > { %v1655_v34 = vmul.f32 1.442695, %v1637_v4  ;;  %v1606_v32 = vpop.xlane.xlu1 %1605 }
 0x6b9   : > { %v1604_v49 = vpop.xlane.xlu0 %1603  ;;  %v1636_v7 = vsub.f32 %v6296_v54, %v1606_v32 }
 0x6ba   : > { %5109 = vpow2.f32 %v1655_v34  ;;  %v1635_v62 = vsub.f32 %v6299_v39, %v1604_v49 }
 0x6bb   : > { %v1653_v51 = vmul.f32 1.442695, %v1636_v7 }
 0x6bc   : > { %v1651_v46 = vmul.f32 1.442695, %v1635_v62 }
 0x6bd   : > { %v1610_v24 = vpop.xlane.xlu0 %1609 }
 0x6be   : > { %5111 = vpow2.f32 %v1651_v46  ;;  %v1638_v56 = vsub.f32 %v6304_v38, %v1610_v24  ;;  %v1612_v5 = vpop.xlane.xlu1 %1611 }
 0x6bf   : > { %v1639_v21 = vsub.f32 %v6307_v58, %v1612_v5 }
 0x6c0   : > { %v1657_v55 = vmul.f32 1.442695, %v1638_v56 }
 0x6c1   : > { %v1616_v57 = vpop.xlane.xlu0 %1615  ;;  %v1659_v32 = vmul.f32 1.442695, %v1639_v21 }
 0x6c2   : > { %5113 = vpow2.f32 %v1657_v55  ;;  %v1641_v4 = vsub.f32 %v6312_v8, %v1616_v57  ;;  %v1618_v34 = vpop.xlane.xlu1 %1617 }
 0x6c3   : > { %v1642_v61 = vsub.f32 %v6315_v52, %v1618_v34  ;;  %5115 = vpow2.f32 %v1653_v51 }
 0x6c4   : > { %v6398_v49 = vpop.eup %5109  ;;  %v1663_v62 = vmul.f32 1.442695, %v1641_v4 }
 0x6c5   : > { %1687 = vadd.xlane.f32.xlu0 %v6398_v49  ;;  %v1614_v46 = vpop.xlane.xlu0 %1613  ;;  %v1665_v56 = vmul.f32 1.442695, %v1642_v61 }
 0x6c6   : > { %5117 = vpow2.f32 %v1663_v62  ;;  %v1640_v7 = vsub.f32 %v6320_v50, %v1614_v46  ;;  %v1620_v5 = vpop.xlane.xlu1 %1619 }
 0x6c7   : > { %5119 = vpow2.f32 %v1659_v32  ;;  %v1643_v39 = vsub.f32 %v6323_v9, %v1620_v5 }
 0x6c8   : > { %v6402_v54 = vpop.eup %5111  ;;  %v1661_v55 = vmul.f32 1.442695, %v1640_v7  ;;  %5121 = vpow2.f32 %v1665_v56 }
 0x6c9   : > { %1683 = vadd.xlane.f32.xlu1 %v6402_v54  ;;  %v1624_v38 = vpop.xlane.xlu0 %1623  ;;  %v1667_v50 = vmul.f32 1.442695, %v1643_v39 }
 0x6ca   : > { %v1645_v21 = vsub.f32 %v6328_v47, %v1624_v38  ;;  %v1626_v58 = vpop.xlane.xlu1 %1625  ;;  %5123 = vpow2.f32 %v1661_v55 }
 0x6cb   : > { %v1646_v8 = vsub.f32 %v6331_v43, %v1626_v58 }
 0x6cc   : > { %v6408_v52 = vpop.eup %5113  ;;  %v1671_v10 = vmul.f32 1.442695, %v1645_v21 }
 0x6cd   : > { %1689 = vadd.xlane.f32.xlu0 %v6408_v52  ;;  %v1622_v57 = vpop.xlane.xlu0 %1621  ;;  %v1673_v51 = vmul.f32 1.442695, %v1646_v8  ;;  %v6412_v24 = vpop.eup %5115 }
 0x6ce   : > { %5125 = vpow2.f32 %v1671_v10  ;;  %v1644_v9 = vsub.f32 %v6336_v48, %v1622_v57  ;;  %v1628_v4 = vpop.xlane.xlu1 %1627 }
 0x6cf   : > { %5127 = vpow2.f32 %v1667_v50  ;;  %v1647_v61 = vsub.f32 %v6339_v59, %v1628_v4 }
 0x6d0   : > { %v6414_v34 = vpop.eup %5117  ;;  %v1669_v47 = vmul.f32 1.442695, %v1644_v9  ;;  %5129 = vpow2.f32 %v1673_v51 }
 0x6d1   : > { %1685 = vadd.xlane.f32.xlu0 %v6412_v24  ;;  %1695 = vadd.xlane.f32.xlu1 %v6414_v34  ;;  %v1632_v43 = vpop.xlane.xlu0 %1631  ;;  %v6420_v32 = vpop.eup %5119  ;;  %v1675_v5 = vmul.f32 1.442695, %v1647_v61  ;;  %v7486_v61 = vld [vmem:[#allocation9_spill] sm:$0xff] }
 0x6d2   : > { %v1649_v62 = vsub.f32 %v6344_v30, %v1632_v43  ;;  %v6422_v48 = vpop.eup %5121  ;;  %5131 = vpow2.f32 %v1669_v47  ;;  %v1634_v56 = vpop.xlane.xlu1 %1633 }
 0x6d3   : > { %v1650_v57 = vsub.f32 %v6347_v6, %v1634_v56 }
 0x6d4   : > { %v1679_v46 = vmul.f32 1.442695, %v1649_v62  ;;  %v6426_v55 = vpop.eup %5123  ;;  %v6519_v62 = vadd.f32 %v7486_v61, %v5897_v11  ;;  %v7491_v61 = vld [vmem:[#allocation3_spill] sm:$0xff] }
 0x6d5   : > { %1697 = vadd.xlane.f32.xlu0 %v6422_v48  ;;  %1691 = vadd.xlane.f32.xlu1 %v6420_v32  ;;  %v1630_v7 = vpop.xlane.xlu0 %1629  ;;  %v1681_v9 = vmul.f32 1.442695, %v1650_v57 }
 0x6d6   : > { %5133 = vpow2.f32 %v1679_v46  ;;  %v1766_v38 = vpop.permute.xlu1 %1765  ;;  %v1648_v50 = vsub.f32 %v6352_v31, %v1630_v7 }
 0x6d7   : > { %5135 = vpow2.f32 %v1675_v5 }
 0x6d8   : > { %v6428_v39 = vpop.eup %5125  ;;  %v1677_v51 = vmul.f32 1.442695, %v1648_v50  ;;  %v7488_v50 = vld [vmem:[#allocation10_spill] sm:$0xff] }
 0x6d9   : > { %1693 = vadd.xlane.f32.xlu0 %v6426_v55  ;;  %1703 = vadd.xlane.f32.xlu1 %v6428_v39  ;;  %v1764_v59 = vpop.permute.xlu0 %1763  ;;  %v6432_v30 = vpop.eup %5127 }
 0x6da   : > { %4621 = vmatprep.subr.bf16.mxu1 %v1764_v59  ;;  %v6434_v21 = vpop.eup %5129  ;;  %5137 = vpow2.f32 %v1677_v51 }
 0x6db   : > { %4622 = vmatpush3.bf16.msra.mxu1 %v1764_v59  ;;  %5139 = vpow2.f32 %v1681_v9 }
 0x6dc   : > { %4623 = vmatprep.subr.bf16.mxu1 %v1766_v38  ;;  %v6438_v58 = vpop.eup %5131 }
 0x6dd   : > { %1705 = vadd.xlane.f32.xlu0 %v6434_v21  ;;  %1699 = vadd.xlane.f32.xlu1 %v6432_v30 }
 0x6df   : > { %4624 = vmatpush3.bf16.msra.mxu1 %v1766_v38  ;;  %v7487_v38 = vld [vmem:[#allocation2_spill] sm:$0xff] }
 0x6e0   : > { %v6440_v8 = vpop.eup %5133  ;;  %v6528_v57 = vadd.f32 %v7488_v50, %v7487_v38 }
 0x6e1   : > { %1701 = vadd.xlane.f32.xlu0 %v6438_v58  ;;  %1711 = vadd.xlane.f32.xlu1 %v6440_v8  ;;  %v6444_v10 = vpop.eup %5135 }
 0x6e4   : > { %v6460_v4 = vpop.eup %5137 }
 0x6e5   : > { %1707 = vadd.xlane.f32.xlu1 %v6444_v10  ;;  %v6464_v31 = vpop.eup %5139 }
 0x6f6   : > { %1769 = vrot.lane.b32.xlu1 %v5824_v63, %s5444_s17 }
 0x6f7   : > { %1767 = vrot.lane.b32.xlu0 %v5826_v2, %s5444_s17 }
 0x6fa   : > { %2751 = vrot.lane.b32.xlu1 %v5774_v12, %s5445_s18 }
 0x6fe   : > { %2753 = vrot.lane.b32.xlu1 %v5794_v40, %s5445_s18 }
 0x702   : > { %2755 = vrot.lane.b32.xlu1 %v5792_v20, %s5445_s18 }
 0x706   : > { %2759 = vrot.lane.b32.xlu1 %v5808_v44, %s5445_s18 }
 0x70a   : > { %2763 = vrot.lane.b32.xlu1 %v5824_v63, %s5445_s18 }
 0x70e   : > { %2735 = vrot.lane.b32.xlu1 %v5778_v18, %s5446_s19  ;;  %v6473_v18 = vadd.f32 %v6365_v33, %v5910_v17 }
 0x712   : > { %2739 = vrot.lane.b32.xlu1 %v5796_v1, %s5446_s19  ;;  %v6479_v1 = vadd.f32 %v6373_v14, %v5961_v13 }
 0x716   : > { %2743 = vrot.lane.b32.xlu1 %v5812_v29, %s5446_s19  ;;  %1709 = vadd.xlane.f32.xlu0 %v6460_v4  ;;  %v6485_v29 = vadd.f32 %v6371_v42, %v5941_v45 }
 0x71a   : > { %2747 = vrot.lane.b32.xlu1 %v5828_v3, %s5446_s19  ;;  %1713 = vadd.xlane.f32.xlu0 %v6464_v31  ;;  %v6502_v3 = vadd.f32 %v6389_v60, %v7477_v0  ;;  %v6512_v60 = vadd.f32 %v6361_v26, %v5913_v37 }
 0x730   : > { %2749 = vrot.lane.b32.xlu0 %v5776_v15, %s5445_s18 }
 0x734   : > { %2757 = vrot.lane.b32.xlu0 %v5810_v28, %s5445_s18 }
 0x738   : > { %2761 = vrot.lane.b32.xlu0 %v5826_v2, %s5445_s18 }
 0x73c   : > { %2733 = vrot.lane.b32.xlu0 %v5782_v19, %s5446_s19  ;;  %v6491_v19 = vadd.f32 %v6381_v22, %v6002_v36 }
 0x73e   : > { %2313 = vmax.xlane.f32.xlu1 %v6473_v18 }
 0x740   : > { %2737 = vrot.lane.b32.xlu0 %v5798_v41, %s5446_s19  ;;  %v6497_v41 = vadd.f32 %v6379_v35, %v5983_v27 }
 0x742   : > { %2321 = vmax.xlane.f32.xlu1 %v6479_v1 }
 0x744   : > { %2741 = vrot.lane.b32.xlu0 %v5814_v53, %s5446_s19  ;;  %v6507_v53 = vadd.f32 %v6387_v23, %v7476_v16 }
 0x746   : > { %2325 = vmax.xlane.f32.xlu1 %v6485_v29 }
 0x748   : > { %2745 = vrot.lane.b32.xlu0 %v5832_v25, %s5446_s19 }
 0x74a   : > { %2329 = vmax.xlane.f32.xlu1 %v6491_v19 }
 0x74e   : > { %2333 = vmax.xlane.f32.xlu1 %v6497_v41 }
 0x752   : > { %2337 = vmax.xlane.f32.xlu1 %v6502_v3  ;;  %v1688_v22 = vpop.xlane.xlu0 %1687 }
 0x756   : > { %2341 = vmax.xlane.f32.xlu1 %v6507_v53  ;;  %v1684_v25 = vpop.xlane.xlu1 %1683 }
 0x757   : > { %5141 = vrcp.f32 %v1684_v25  ;;  %v7490_v25 = vld [vmem:[#allocation28_spill] sm:$0xff] }
 0x75a   : > { %v1690_v33 = vpop.xlane.xlu0 %1689 }
 0x75e   : > { %v1696_v35 = vpop.xlane.xlu1 %1695  ;;  %v1686_v42 = vpop.xlane.xlu0 %1685 }
 0x75f   : > { %5143 = vrcp.f32 %v1686_v42 }
 0x760   : > { %5145 = vrcp.f32 %v1690_v33 }
 0x761   : > { %v5142_v23 = vpop.eup %5141 }
 0x762   : > { %v1692_v14 = vpop.xlane.xlu1 %1691  ;;  %v1698_v6 = vpop.xlane.xlu0 %1697  ;;  %v1731_v7 = vmul.f32 %v5142_v23, %v6402_v54  ;;  %v7489_v54 = vld [vmem:[#allocation4_spill] sm:$0xff] }
 0x766   : > { %v1704_v47 = vpop.xlane.xlu1 %1703  ;;  %v1694_v43 = vpop.xlane.xlu0 %1693 }
 0x767   : > { %2465 = vrot.lane.b32.xlu1 %v5774_v12, %s5447_s20  ;;  %2311 = vmax.xlane.f32.xlu0 %v6512_v60  ;;  %5147 = vrcp.f32 %v1694_v43 }
 0x768   : > { %5149 = vrcp.f32 %v1688_v22 }
 0x769   : > { %v5144_v46 = vpop.eup %5143  ;;  %5151 = vrcp.f32 %v1692_v14 }
 0x76a   : > { %v1700_v56 = vpop.xlane.xlu1 %1699  ;;  %v1706_v26 = vpop.xlane.xlu0 %1705  ;;  %v1732_v5 = vmul.f32 %v5144_v46, %v6412_v24  ;;  %5153 = vrcp.f32 %v1698_v6  ;;  %v6537_v24 = vadd.f32 %v7490_v25, %v7489_v54  ;;  %v7492_v46 = vld [vmem:[#allocation27_spill] sm:$0xff]  ;;  %v7493_v25 = vld [vmem:[#allocation6_spill] sm:$0xff] }
 0x76b   : > { %2471 = vrot.lane.b32.xlu1 %v5810_v28, %s5447_s20  ;;  %2315 = vmax.xlane.f32.xlu0 %v6519_v62  ;;  %v5146_v22 = vpop.eup %5145 }
 0x76c   : > { %v1747_v59 = vpack.c.bf16 %v1732_v5, %v1731_v7  ;;  %v1734_v6 = vmul.f32 %v5146_v22, %v6408_v52  ;;  %v6543_v7 = vadd.f32 %v7492_v46, %v7491_v61  ;;  %v7494_v52 = vld [vmem:[#allocation30_spill] sm:$0xff] }
 0x76d   : > { %v6551_v22 = vadd.f32 %v7494_v52, %v7493_v25 }
 0x76e   : > { %v6530_v51 = vpop.xlane.xlu1 %1711  ;;  %v1702_v9 = vpop.xlane.xlu0 %1701  ;;  %4629 = vmatprep.mubr.bf16.mxu1 %v1747_v59 }
 0x76f   : > { %2473 = vrot.lane.b32.xlu1 %v5808_v44, %s5447_s20  ;;  %2317 = vmax.xlane.f32.xlu0 %v6528_v57  ;;  %5155 = vrcp.f32 %v1702_v9 }
 0x770   : > { %5157 = vrcp.f32 %v1696_v35 }
 0x771   : > { %v5148_v14 = vpop.eup %5147  ;;  %5159 = vrcp.f32 %v1700_v56 }
 0x772   : > { %v1708_v33 = vpop.xlane.xlu1 %1707  ;;  %v1768_v42 = vpop.permute.xlu0 %1767  ;;  %v1736_v59 = vmul.f32 %v5148_v14, %v6426_v55  ;;  %5161 = vrcp.f32 %v1706_v26  ;;  %v7495_v14 = vld [vmem:[#allocation5_spill] sm:$0xff] }
 0x773   : > { %4625 = vmatprep.subr.bf16.mxu1 %v1768_v42  ;;  %v5150_v43 = vpop.eup %5149  ;;  %2319 = vmax.xlane.f32.xlu0 %v6537_v24  ;;  %5163 = vrcp.f32 %v1704_v47 }
 0x774   : > { %4626 = vmatpush3.bf16.msra.mxu1 %v1768_v42  ;;  %v5152_v23 = vpop.eup %5151  ;;  %v1733_v35 = vmul.f32 %v5150_v43, %v6398_v49  ;;  %v7496_v43 = vld [vmem:[#allocation29_spill] sm:$0xff]  ;;  %5165 = vrcp.f32 %v1708_v33 }
 0x775   : > { %v1735_v56 = vmul.f32 %v5152_v23, %v6420_v32  ;;  %v5154_v9 = vpop.eup %5153  ;;  %v6557_v32 = vadd.f32 %v7496_v43, %v7495_v14 }
 0x776   : > { %v1770_v5 = vpop.permute.xlu1 %1769  ;;  %v1748_v50 = vpack.c.bf16 %v1734_v6, %v1733_v35  ;;  %v1738_v26 = vmul.f32 %v5154_v9, %v6422_v48  ;;  %v7497_v35 = vld [vmem:[#allocation8_spill] sm:$0xff]  ;;  %v7499_v9 = vld [vmem:[#allocation7_spill] sm:$0xff] }
 0x777   : > { %4627 = vmatprep.subr.bf16.mxu1 %v1770_v5  ;;  %2323 = vmax.xlane.f32.xlu0 %v6543_v7  ;;  %v1749_v42 = vpack.c.bf16 %v1736_v59, %v1735_v56  ;;  %v7498_v56 = vld [vmem:[#allocation32_spill] sm:$0xff] }
 0x778   : > { %4628 = vmatpush3.bf16.msra.mxu1 %v1770_v5 }
 0x779   : > { %v5156_v46 = vpop.eup %5155 }
 0x77a   : > { %v5158_v55 = vpop.eup %5157  ;;  %v1740_v23 = vmul.f32 %v5156_v46, %v6438_v58  ;;  %v2752_v43 = vpop.permute.xlu1 %2751 }
 0x77b   : > { %4630 = vmatmul.mubr.bf16.vlgmr.msra.gmra.mrb[16].mxu1 %v1748_v50  ;;  %2327 = vmax.xlane.f32.xlu0 %v6551_v22  ;;  %v5160_v49 = vpop.eup %5159  ;;  %v1737_v6 = vmul.f32 %v5158_v55, %v6414_v34  ;;  %v6565_v50 = vadd.f32 %v7498_v56, %v7497_v35  ;;  %v7500_v34 = vld [vmem:[#allocation31_spill] sm:$0xff] }
 0x77c   : > { %4633 = vmatprep.mubr.bf16.mxu1 %v1749_v42  ;;  %v1739_v47 = vmul.f32 %v5160_v49, %v6432_v30  ;;  %v5162_v59 = vpop.eup %5161  ;;  %v6571_v42 = vadd.f32 %v7500_v34, %v7499_v9 }
 0x77d   : > { %v1750_v5 = vpack.c.bf16 %v1738_v26, %v1737_v6  ;;  %v5164_v48 = vpop.eup %5163  ;;  %v1742_v58 = vmul.f32 %v5162_v59, %v6434_v21 }
 0x77e   : > { %v1751_v52 = vpack.c.bf16 %v1740_v23, %v1739_v47  ;;  %v1741_v30 = vmul.f32 %v5164_v48, %v6428_v39  ;;  %v5166_v49 = vpop.eup %5165  ;;  %v2754_v34 = vpop.permute.xlu1 %2753 }
 0x77f   : > { %2331 = vmax.xlane.f32.xlu0 %v6557_v32  ;;  %v1743_v6 = vmul.f32 %v5166_v49, %v6444_v10 }
 0x780   : > { %v1752_v46 = vpack.c.bf16 %v1742_v58, %v1741_v30  ;;  %v2793_v58 = vsel %vm990_vm1, %v2752_v43, 0 }
 0x783   : > { %4634 = vmatmul.mubr.bf16.gmra.mrb[20].mxu1 %v1750_v5  ;;  %2335 = vmax.xlane.f32.xlu0 %v6565_v50 }
 0x784   : > { %4637 = vmatprep.mubr.bf16.mxu1 %v1751_v52 }
 0x787   : > { %2339 = vmax.xlane.f32.xlu0 %v6571_v42 }
 0x78b   : > { %4638 = vmatmul.mubr.bf16.gmra.mrb[24].mxu1 %v1752_v46  ;;  %v2756_v46 = vpop.permute.xlu1 %2755 }
 0x79d   : > { %2463 = vrot.lane.b32.xlu0 %v5776_v15, %s5447_s20 }
 0x7a1   : > { %2467 = vrot.lane.b32.xlu0 %v5794_v40, %s5447_s20 }
 0x7a3   : > { %v1710_v55 = vpop.xlane.xlu0 %1709 }
 0x7a4   : > { %5167 = vrcp.f32 %v1710_v55  ;;  %v2760_v55 = vpop.permute.xlu1 %2759 }
 0x7a5   : > { %5169 = vrcp.f32 %v6530_v51  ;;  %2469 = vrot.lane.b32.xlu0 %v5792_v20, %s5447_s20  ;;  %v2805_v49 = vsel %vm990_vm1, %v2760_v55, 0 }
 0x7a7   : > { %v1714_v21 = vpop.xlane.xlu0 %1713 }
 0x7a8   : > { %5171 = vrcp.f32 %v1714_v21  ;;  %v1884_v21 = vld [vmem:[%s7408_s7 + $0x4] sm:$0xf] }
 0x7a9   : > { %4961 = vmatprep.subr.msk.bf16.mxu1 %vm1909_vm3, %v1884_v21 }
 0x7ab   : > { %v2750_v39 = vpop.permute.xlu0 %2749 }
 0x7ac   : > { %4972 = vmatprep.subr.msk.bf16.mxu0 %vm990_vm1, %v2750_v39  ;;  %v2790_v26 = vsel %vm990_vm1, %v2750_v39, 0  ;;  %v1911_v39 = vsel %vm1909_vm3, %v1884_v21, 0 }
 0x7ad   : > { %4764 = vmatpush3.bf16.xpose.msra.mxu0 %v2790_v26  ;;  %4646 = vmatpush3.bf16.msra.mxu1 %v1911_v39  ;;  %v6607_v26 = vld [vmem:[%s7408_s7] sm:$0xf] }
 0x7ae   : > { %v5168_v33 = vpop.eup %5167  ;;  %4973 = vmatprep.subr.msk.bf16.mxu0 %vm990_vm1, %v2752_v43  ;;  %4962 = vmatprep.subr.msk.bf16.mxu1 %vm1909_vm3, %v6607_v26  ;;  %v2764_v43 = vpop.permute.xlu1 %2763 }
 0x7af   : > { %v2758_v23 = vpop.permute.xlu0 %2757  ;;  %v1744_v51 = vmul.f32 %v5168_v33, %v6460_v4  ;;  %v5170_v47 = vpop.eup %5169  ;;  %v2796_v4 = vsel %vm990_vm1, %v2754_v34, 0 }
 0x7b0   : > { %v1745_v52 = vmul.f32 %v5170_v47, %v6440_v8  ;;  %v2799_v8 = vsel %vm990_vm1, %v2756_v46, 0 }
 0x7b1   : > { %v1753_v5 = vpack.c.bf16 %v1744_v51, %v1743_v6  ;;  %v2811_v51 = vsel %vm990_vm1, %v2764_v43, 0 }
 0x7b2   : > { %v5172_v59 = vpop.eup %5171 }
 0x7b3   : > { %4641 = vmatprep.mubr.bf16.mxu1 %v1753_v5  ;;  %v2762_v56 = vpop.permute.xlu0 %2761  ;;  %v1746_v48 = vmul.f32 %v5172_v59, %v6464_v31  ;;  %v2802_v31 = vsel %vm990_vm1, %v2758_v23, 0 }
 0x7b4   : > { %v2808_v33 = vsel %vm990_vm1, %v2762_v56, 0 }
 0x7b5   : > { %4766 = vmatpush3.bf16.xpose.msra.mxu0 %v2793_v58  ;;  %v1754_v30 = vpack.c.bf16 %v1746_v48, %v1745_v52 }
 0x7b6   : > { %4974 = vmatprep.subr.msk.bf16.mxu0 %vm990_vm1, %v2754_v34 }
 0x7b7   : > { %4642 = vmatmul.mubr.bf16.gmra.mrb[28].mxu1 %v1754_v30  ;;  %v2734_v10 = vpop.permute.xlu0 %2733 }
 0x7b8   : > { %4779 = vmatprep.mubr.msk.bf16.mxu0 %vm990_vm1, %v2734_v10 }
 0x7bb   : > { %v2738_v6 = vpop.permute.xlu0 %2737 }
 0x7bd   : > { %4768 = vmatpush3.bf16.xpose.msra.mxu0 %v2796_v4 }
 0x7be   : > { %4975 = vmatprep.subr.msk.bf16.mxu0 %vm990_vm1, %v2756_v46 }
 0x7bf   : > { %v2742_v5 = vpop.permute.xlu0 %2741 }
 0x7c3   : > { %v2746_v52 = vpop.permute.xlu0 %2745 }
 0x7c5   : > { %4770 = vmatpush3.bf16.xpose.msra.mxu0 %v2799_v8 }
 0x7c6   : > { %4976 = vmatprep.subr.msk.bf16.mxu0 %vm990_vm1, %v2758_v23  ;;  %v2736_v23 = vpop.permute.xlu1 %2735 }
 0x7ca   : > { %v2740_v47 = vpop.permute.xlu1 %2739 }
 0x7cd   : > { %4772 = vmatpush3.bf16.xpose.msra.mxu0 %v2802_v31 }
 0x7ce   : > { %4977 = vmatprep.subr.msk.bf16.mxu0 %vm990_vm1, %v2760_v55  ;;  %v2744_v59 = vpop.permute.xlu1 %2743 }
 0x7d2   : > { %v2748_v48 = vpop.permute.xlu1 %2747 }
 0x7d5   : > { %4774 = vmatpush3.bf16.xpose.msra.mxu0 %v2805_v49 }
 0x7d6   : > { %4978 = vmatprep.subr.msk.bf16.mxu0 %vm990_vm1, %v2762_v56  ;;  %v2314_v58 = vpop.xlane.xlu1 %2313 }
 0x7d7   : > { %v2344_v21 = vsub.f32 %v6473_v18, %v2314_v58 }
 0x7da   : > { %v2322_v46 = vpop.xlane.xlu1 %2321 }
 0x7dd   : > { %4776 = vmatpush3.bf16.xpose.msra.mxu0 %v2808_v33 }
 0x7de   : > { %4979 = vmatprep.subr.msk.bf16.mxu0 %vm990_vm1, %v2764_v43  ;;  %v2326_v43 = vpop.xlane.xlu1 %2325 }
 0x7e5   : > { %4778 = vmatpush3.bf16.xpose.msra.mxu0 %v2811_v51 }
 0x7ec   : > { %4780 = vmatmul.mubr.msk.bf16.vlgmr.msra.gmra.mrb[64].mxu0 %vm990_vm1, %v2736_v23 }
 0x7ed   : > { %4783 = vmatprep.mubr.msk.bf16.mxu0 %vm990_vm1, %v2738_v6 }
 0x7f4   : > { %4784 = vmatmul.mubr.msk.bf16.gmra.mrb[68].mxu0 %vm990_vm1, %v2740_v47  ;;  %v2312_v56 = vpop.xlane.xlu0 %2311 }
 0x7f5   : > { %4787 = vmatprep.mubr.msk.bf16.mxu0 %vm990_vm1, %v2742_v5  ;;  %v2343_v30 = vsub.f32 %v6512_v60, %v2312_v56  ;;  %v2361_v60 = vmul.f32 1.442695, %v2344_v21 }
 0x7f7   : > { %v2359_v8 = vmul.f32 1.442695, %v2343_v30 }
 0x7f8   : > { %v2316_v34 = vpop.xlane.xlu0 %2315 }
 0x7f9   : > { %v2345_v10 = vsub.f32 %v6519_v62, %v2316_v34  ;;  %v2348_v62 = vsub.f32 %v6479_v1, %v2322_v46 }
 0x7fb   : > { %v2363_v4 = vmul.f32 1.442695, %v2345_v10  ;;  %v2369_v18 = vmul.f32 1.442695, %v2348_v62 }
 0x7fc   : > { %4788 = vmatmul.mubr.msk.bf16.gmra.mrb[72].mxu0 %vm990_vm1, %v2744_v59  ;;  %v2318_v31 = vpop.xlane.xlu0 %2317  ;;  %v2350_v59 = vsub.f32 %v6485_v29, %v2326_v43 }
 0x7fd   : > { %5173 = vpow2.f32 %v2363_v4  ;;  %4791 = vmatprep.mubr.msk.bf16.mxu0 %vm990_vm1, %v2746_v52  ;;  %v2346_v55 = vsub.f32 %v6528_v57, %v2318_v31  ;;  %v2330_v57 = vpop.xlane.xlu1 %2329 }
 0x7fe   : > { %5175 = vpow2.f32 %v2359_v8  ;;  %v2373_v56 = vmul.f32 1.442695, %v2350_v59  ;;  %v2352_v8 = vsub.f32 %v6491_v19, %v2330_v57 }
 0x7ff   : > { %v2365_v39 = vmul.f32 1.442695, %v2346_v55 }
 0x800   : > { %v2320_v49 = vpop.xlane.xlu0 %2319  ;;  %v2377_v43 = vmul.f32 1.442695, %v2352_v8 }
 0x801   : > { %5177 = vpow2.f32 %v2365_v39  ;;  %v2347_v23 = vsub.f32 %v6537_v24, %v2320_v49  ;;  %v2334_v58 = vpop.xlane.xlu1 %2333 }
 0x802   : > { %5179 = vpow2.f32 %v2361_v60  ;;  %v2354_v29 = vsub.f32 %v6497_v41, %v2334_v58 }
 0x803   : > { %v2367_v52 = vmul.f32 1.442695, %v2347_v23 }
 0x804   : > { %4792 = vmatmul.mubr.msk.bf16.gmra.mrb[76].mxu0 %vm990_vm1, %v2748_v48  ;;  %v2324_v33 = vpop.xlane.xlu0 %2323  ;;  %v2381_v31 = vmul.f32 1.442695, %v2354_v29  ;;  %v2035_v29 = vsel %vm1909_vm3, %v6607_v26, 0 }
 0x805   : > { %v2349_v6 = vsub.f32 %v6543_v7, %v2324_v33  ;;  %v2338_v57 = vpop.xlane.xlu1 %2337 }
 0x807   : > { %v6629_v51 = vpop.eup %5173  ;;  %v2371_v47 = vmul.f32 1.442695, %v2349_v6 }
 0x808   : > { %2395 = vadd.xlane.f32.xlu1 %v6629_v51  ;;  %v2328_v5 = vpop.xlane.xlu0 %2327  ;;  %v6634_v48 = vpop.eup %5175 }
 0x809   : > { %5181 = vpow2.f32 %v2371_v47  ;;  %v2351_v1 = vsub.f32 %v6551_v22, %v2328_v5  ;;  %v2356_v47 = vsub.f32 %v6502_v3, %v2338_v57 }
 0x80a   : > { %5183 = vpow2.f32 %v2369_v18  ;;  %v2342_v18 = vpop.xlane.xlu1 %2341 }
 0x80b   : > { %v2375_v24 = vmul.f32 1.442695, %v2351_v1  ;;  %5185 = vpow2.f32 %v2367_v52  ;;  %v6638_v30 = vpop.eup %5177  ;;  %v2385_v59 = vmul.f32 1.442695, %v2356_v47  ;;  %v2358_v52 = vsub.f32 %v6507_v53, %v2342_v18 }
 0x80c   : > { %2391 = vadd.xlane.f32.xlu1 %v6634_v48  ;;  %v2332_v7 = vpop.xlane.xlu0 %2331  ;;  %v6642_v4 = vpop.eup %5179 }
 0x80d   : > { %v2353_v34 = vsub.f32 %v6557_v32, %v2332_v7  ;;  %5187 = vpow2.f32 %v2375_v24 }
 0x80e   : > { %5189 = vpow2.f32 %v2373_v56  ;;  %v2466_v18 = vpop.permute.xlu1 %2465 }
 0x80f   : > { %v2379_v10 = vmul.f32 1.442695, %v2353_v34  ;;  %v2389_v34 = vmul.f32 1.442695, %v2358_v52 }
 0x810   : > { %2397 = vadd.xlane.f32.xlu1 %v6638_v30  ;;  %v2336_v22 = vpop.xlane.xlu0 %2335 }
 0x811   : > { %5191 = vpow2.f32 %v2379_v10  ;;  %v2355_v55 = vsub.f32 %v6565_v50, %v2336_v22 }
 0x812   : > { %5193 = vpow2.f32 %v2381_v31 }
 0x813   : > { %v6644_v46 = vpop.eup %5181  ;;  %v2383_v19 = vmul.f32 1.442695, %v2355_v55 }
 0x814   : > { %2393 = vadd.xlane.f32.xlu1 %v6642_v4  ;;  %2403 = vadd.xlane.f32.xlu0 %v6644_v46  ;;  %v2340_v32 = vpop.xlane.xlu0 %2339  ;;  %v6651_v21 = vpop.eup %5183 }
 0x815   : > { %v2357_v41 = vsub.f32 %v6571_v42, %v2340_v32  ;;  %v6653_v39 = vpop.eup %5185 }
 0x817   : > { %v2387_v49 = vmul.f32 1.442695, %v2357_v41  ;;  %v6657_v60 = vpop.eup %5187 }
 0x818   : > { %2401 = vadd.xlane.f32.xlu1 %v6651_v21  ;;  %2399 = vadd.xlane.f32.xlu0 %v6653_v39  ;;  %v6659_v62 = vpop.eup %5189  ;;  %v2464_v3 = vpop.permute.xlu0 %2463 }
 0x819   : > { %5195 = vpow2.f32 %v2387_v49 }
 0x81a   : > { %5197 = vpow2.f32 %v2377_v43 }
 0x81b   : > { %5199 = vpow2.f32 %v2383_v19  ;;  %v6663_v50 = vpop.eup %5191 }
 0x81c   : > { %2407 = vadd.xlane.f32.xlu1 %v6657_v60  ;;  %2405 = vadd.xlane.f32.xlu0 %v6659_v62  ;;  %v6666_v42 = vpop.eup %5193  ;;  %5201 = vpow2.f32 %v2385_v59  ;;  %v2472_v59 = vpop.permute.xlu1 %2471 }
 0x81d   : > { %5203 = vpow2.f32 %v2389_v34  ;;  %v7501_v34 = vld [vmem:[#allocation14_spill] sm:$0xff] }
 0x820   : > { %2411 = vadd.xlane.f32.xlu0 %v6663_v50 }
 0x823   : > { %v6668_v33 = vpop.eup %5195 }
 0x824   : > { %2413 = vadd.xlane.f32.xlu0 %v6666_v42  ;;  %2419 = vadd.xlane.f32.xlu1 %v6668_v33  ;;  %v6672_v23 = vpop.eup %5197 }
 0x825   : > { %v6674_v6 = vpop.eup %5199 }
 0x826   : > { %v6689_v55 = vpop.eup %5201 }
 0x827   : > { %v6693_v43 = vpop.eup %5203 }
 0x828   : > { %2409 = vadd.xlane.f32.xlu0 %v6672_v23  ;;  %2415 = vadd.xlane.f32.xlu1 %v6674_v6 }
 0x839   : > { %2477 = vrot.lane.b32.xlu1 %v5824_v63, %s5447_s20 }
 0x83e   : > { %2475 = vrot.lane.b32.xlu0 %v5826_v2, %s5447_s20 }
 0x84e   : > { %v4631_v5 = vpop.f32.mrb[16].mxu1 }
 0x84f   : > { %v1813_v1 = vpop.f32.mrb[17].mxu1 }
 0x850   : > { %v4632_v24 = vpop.f32.mrb[18].mxu1 }
 0x851   : > { %v1877_v7 = vpack.c.bf16 %v4632_v24, %v4631_v5  ;;  %v1816_v56 = vpop.f32.mrb[19].mxu1 }
 0x852   : > { %v1876_v58 = vpack.c.bf16 %v1816_v56, %v1813_v1 }
 0x854   : > { %4647 = vmatprep.mubr.msk.bf16.mxu1 %vm990_vm1, %v1876_v58  ;;  %v2474_v58 = vpop.permute.xlu1 %2473 }
 0x855   : > { %4648 = vmatmul.mubr.msk.bf16.vlgmr.msra.gmra.mrb[32].mxu1 %vm990_vm1, %v1877_v7 }
 0x856   : > { %4664 = vmatpush3.bf16.msra.mxu1 %v2035_v29  ;;  %v4635_v22 = vpop.f32.mrb[20].mxu1  ;;  %v7502_v29 = vld [vmem:[#allocation12_spill] sm:$0xff] }
 0x857   : > { %4713 = vmatprep.subr.bf16.mxu1 %v2464_v3  ;;  %v1829_v53 = vpop.f32.mrb[21].mxu1 }
 0x858   : > { %v4636_v10 = vpop.f32.mrb[22].mxu1 }
 0x859   : > { %v1879_v8 = vpack.c.bf16 %v4636_v10, %v4635_v22  ;;  %v1832_v31 = vpop.f32.mrb[23].mxu1  ;;  %v7503_v22 = vpack.c.bf16 %v7501_v34, %v7502_v29  ;;  %v2468_v10 = vpop.permute.xlu0 %2467 }
 0x85a   : > { %v1878_v32 = vpack.c.bf16 %v1832_v31, %v1829_v53  ;;  %v7505_v31 = vld [vmem:[#allocation11_spill] sm:$0xff] }
 0x85c   : > { %4651 = vmatprep.mubr.msk.bf16.mxu1 %vm990_vm1, %v1878_v32 }
 0x85d   : > { %4652 = vmatmul.mubr.msk.bf16.gmra.mrb[36].mxu1 %vm990_vm1, %v1879_v8  ;;  %2417 = vadd.xlane.f32.xlu0 %v6689_v55  ;;  %v7504_v8 = vld [vmem:[#allocation13_spill] sm:$0xff] }
 0x85e   : > { %v4639_v26 = vpop.f32.mrb[24].mxu1  ;;  %v7506_v32 = vpack.c.bf16 %v7504_v8, %v7505_v31  ;;  %v7517_v8 = vld [vmem:[#allocation19_spill] sm:$0xff] }
 0x85f   : > { %v1845_v41 = vpop.f32.mrb[25].mxu1 }
 0x860   : > { %v4640_v49 = vpop.f32.mrb[26].mxu1 }
 0x861   : > { %v1881_v19 = vpack.c.bf16 %v4640_v49, %v4639_v26  ;;  %v1848_v57 = vpop.f32.mrb[27].mxu1  ;;  %2421 = vadd.xlane.f32.xlu0 %v6693_v43  ;;  %v7508_v49 = vld [vmem:[#allocation16_spill] sm:$0xff] }
 0x862   : > { %v1880_v47 = vpack.c.bf16 %v1848_v57, %v1845_v41  ;;  %v7507_v41 = vld [vmem:[#allocation18_spill] sm:$0xff] }
 0x864   : > { %4655 = vmatprep.mubr.msk.bf16.mxu1 %vm990_vm1, %v1880_v47  ;;  %v2470_v47 = vpop.permute.xlu0 %2469 }
 0x865   : > { %4656 = vmatmul.mubr.msk.bf16.gmra.mrb[40].mxu1 %vm990_vm1, %v1881_v19  ;;  %v7509_v19 = vpack.c.bf16 %v7507_v41, %v7508_v49  ;;  %v7520_v41 = vld [vmem:[#allocation24_spill] sm:$0xff] }
 0x88a   : > { %v4643_v5 = vpop.f32.mrb[28].mxu1 }
 0x88b   : > { %v1861_v52 = vpop.f32.mrb[29].mxu1 }
 0x88c   : > { %v4644_v1 = vpop.f32.mrb[30].mxu1 }
 0x88d   : > { %v1883_v24 = vpack.c.bf16 %v4644_v1, %v4643_v5  ;;  %v1864_v7 = vpop.f32.mrb[31].mxu1  ;;  %v7510_v5 = vld [vmem:[#allocation17_spill] sm:$0xff] }
 0x88e   : > { %v1882_v56 = vpack.c.bf16 %v1864_v7, %v1861_v52  ;;  %v7511_v52 = vld [vmem:[#allocation15_spill] sm:$0xff]  ;;  %v7513_v7 = vld [vmem:[#allocation22_spill] sm:$0xff] }
 0x88f   : > { %v7512_v1 = vpack.c.bf16 %v7510_v5, %v7511_v52 }
 0x890   : > { %4659 = vmatprep.mubr.msk.bf16.mxu1 %vm990_vm1, %v1882_v56  ;;  %v7514_v56 = vld [vmem:[#allocation20_spill] sm:$0xff] }
 0x891   : > { %4660 = vmatmul.mubr.msk.bf16.gmra.mrb[44].mxu1 %vm990_vm1, %v1883_v24  ;;  %v7515_v34 = vpack.c.bf16 %v7513_v7, %v7514_v56  ;;  %v7523_v7 = vld [vmem:[#allocation23_spill] sm:$0xff] }
 0x892   : > { %4665 = vmatprep.mubr.msk.bf16.mxu1 %vm990_vm1, %v7503_v22  ;;  %v7516_v22 = vld [vmem:[#allocation21_spill] sm:$0xff] }
 0x893   : > { %v7518_v31 = vpack.c.bf16 %v7516_v22, %v7517_v8 }
 0x895   : > { %v2396_v53 = vpop.xlane.xlu1 %2395 }
 0x899   : > { %4666 = vmatmul.mubr.msk.bf16.vlgmr.msra.gmra.mrb[32].mxu1 %vm990_vm1, %v7506_v32  ;;  %v2392_v26 = vpop.xlane.xlu1 %2391 }
 0x89a   : > { %4714 = vmatpush3.bf16.msra.mxu1 %v2464_v3  ;;  %4669 = vmatprep.mubr.msk.bf16.mxu1 %vm990_vm1, %v7509_v19  ;;  %5205 = vrcp.f32 %v2392_v26 }
 0x89b   : > { %4715 = vmatprep.subr.bf16.mxu1 %v2466_v18 }
 0x89d   : > { %v2398_v57 = vpop.xlane.xlu1 %2397 }
 0x89e   : > { %4716 = vmatpush3.bf16.msra.mxu1 %v2466_v18 }
 0x89f   : > { %4717 = vmatprep.subr.bf16.mxu1 %v2468_v10 }
 0x8a1   : > { %4670 = vmatmul.mubr.msk.bf16.gmra.mrb[36].mxu1 %vm990_vm1, %v7512_v1  ;;  %v2394_v24 = vpop.xlane.xlu1 %2393  ;;  %v2404_v3 = vpop.xlane.xlu0 %2403 }
 0x8a2   : > { %5207 = vrcp.f32 %v2394_v24  ;;  %4718 = vmatpush3.bf16.msra.mxu1 %v2468_v10  ;;  %4673 = vmatprep.mubr.msk.bf16.mxu1 %vm990_vm1, %v7515_v34  ;;  %v7519_v10 = vld [vmem:[#allocation26_spill] sm:$0xff] }
 0x8a3   : > { %4719 = vmatprep.subr.bf16.mxu1 %v2470_v47  ;;  %v7521_v49 = vpack.c.bf16 %v7519_v10, %v7520_v41  ;;  %5209 = vrcp.f32 %v2398_v57 }
 0x8a4   : > { %v5206_v32 = vpop.eup %5205 }
 0x8a5   : > { %v2400_v29 = vpop.xlane.xlu0 %2399  ;;  %v2402_v18 = vpop.xlane.xlu1 %2401 }
 0x8a6   : > { %4720 = vmatpush3.bf16.msra.mxu1 %v2470_v47  ;;  %v2439_v47 = vmul.f32 %v5206_v32, %v6634_v48  ;;  %5211 = vrcp.f32 %v2402_v18 }
 0x8a7   : > { %4721 = vmatprep.subr.bf16.mxu1 %v2472_v59  ;;  %5213 = vrcp.f32 %v2400_v29 }
 0x8a8   : > { %5215 = vrcp.f32 %v2396_v53 }
 0x8a9   : > { %4674 = vmatmul.mubr.msk.bf16.gmra.mrb[40].mxu1 %vm990_vm1, %v7518_v31  ;;  %v2406_v26 = vpop.xlane.xlu0 %2405  ;;  %v2408_v52 = vpop.xlane.xlu1 %2407 }
 0x8aa   : > { %4722 = vmatpush3.bf16.msra.mxu1 %v2472_v59  ;;  %4677 = vmatprep.mubr.msk.bf16.mxu1 %vm990_vm1, %v7521_v49  ;;  %v7522_v59 = vld [vmem:[#allocation25_spill] sm:$0xff]  ;;  %5217 = vrcp.f32 %v2406_v26 }
 0x8ab   : > { %4723 = vmatprep.subr.bf16.mxu1 %v2474_v58  ;;  %v7524_v56 = vpack.c.bf16 %v7522_v59, %v7523_v7 }
 0x8ac   : > { %v5208_v19 = vpop.eup %5207 }
 0x8ad   : > { %v2440_v5 = vmul.f32 %v5208_v19, %v6642_v4  ;;  %v2412_v1 = vpop.xlane.xlu0 %2411 }
 0x8ae   : > { %4724 = vmatpush3.bf16.msra.mxu1 %v2474_v58  ;;  %v5210_v58 = vpop.eup %5209 }
 0x8af   : > { %v2455_v24 = vpack.c.bf16 %v2440_v5, %v2439_v47  ;;  %v2442_v53 = vmul.f32 %v5210_v58, %v6638_v30 }
 0x8b0   : > { %v5212_v57 = vpop.eup %5211 }
 0x8b1   : > { %4678 = vmatmul.mubr.msk.bf16.gmra.mrb[44].mxu1 %vm990_vm1, %v7524_v56  ;;  %v6734_v34 = vpop.xlane.xlu1 %2419  ;;  %v2414_v22 = vpop.xlane.xlu0 %2413  ;;  %v2444_v10 = vmul.f32 %v5212_v57, %v6651_v21 }
 0x8b2   : > { %4729 = vmatprep.mubr.bf16.mxu1 %v2455_v24  ;;  %v5214_v29 = vpop.eup %5213 }
 0x8b3   : > { %v5216_v8 = vpop.eup %5215  ;;  %v2443_v32 = vmul.f32 %v5214_v29, %v6653_v39 }
 0x8b4   : > { %v2441_v26 = vmul.f32 %v5216_v8, %v6629_v51  ;;  %v5218_v5 = vpop.eup %5217 }
 0x8b5   : > { %v6736_v48 = vpop.xlane.xlu1 %2415  ;;  %v2410_v4 = vpop.xlane.xlu0 %2409  ;;  %v2457_v30 = vpack.c.bf16 %v2444_v10, %v2443_v32  ;;  %v2446_v59 = vmul.f32 %v5218_v5, %v6659_v62 }
 0x8b6   : > { %5219 = vrcp.f32 %v2410_v4  ;;  %v2456_v47 = vpack.c.bf16 %v2442_v53, %v2441_v26 }
 0x8b7   : > { %5221 = vrcp.f32 %v2404_v3 }
 0x8b8   : > { %5223 = vrcp.f32 %v2408_v52 }
 0x8b9   : > { %v2476_v18 = vpop.permute.xlu0 %2475  ;;  %v2478_v31 = vpop.permute.xlu1 %2477  ;;  %5225 = vrcp.f32 %v2414_v22 }
 0x8ba   : > { %4725 = vmatprep.subr.bf16.mxu1 %v2476_v18  ;;  %5227 = vrcp.f32 %v2412_v1 }
 0x8bb   : > { %4726 = vmatpush3.bf16.msra.mxu1 %v2476_v18  ;;  %5229 = vrcp.f32 %v6736_v48 }
 0x8bc   : > { %4727 = vmatprep.subr.bf16.mxu1 %v2478_v31 }
 0x8bf   : > { %v4781_v41 = vpop.f32.mrb[64].mxu0  ;;  %4728 = vmatpush3.bf16.msra.mxu1 %v2478_v31 }
 0x8c0   : > { %v2847_v3 = vpop.f32.mrb[65].mxu0  ;;  %v5220_v24 = vpop.eup %5219  ;;  %v6755_v4 = vadd.f32 %v4781_v41, %v5897_v11 }
 0x8c1   : > { %v6743_v49 = vadd.f32 %v2847_v3, %v5913_v37  ;;  %v4782_v19 = vpop.f32.mrb[66].mxu0  ;;  %v5222_v21 = vpop.eup %5221  ;;  %v2448_v37 = vmul.f32 %v5220_v24, %v6672_v23 }
 0x8c2   : > { %v2850_v52 = vpop.f32.mrb[67].mxu0  ;;  %4730 = vmatmul.mubr.bf16.vlgmr.msra.gmra.mrb[48].mxu1 %v2456_v47  ;;  %v5224_v51 = vpop.eup %5223  ;;  %v2445_v1 = vmul.f32 %v5222_v21, %v6644_v46  ;;  %v6763_v46 = vadd.f32 %v4782_v19, %v7487_v38 }
 0x8c3   : > { %2910 = vmax.xlane.f32.xlu0 %v6743_v49  ;;  %4733 = vmatprep.mubr.bf16.mxu1 %v2457_v30  ;;  %v6747_v39 = vadd.f32 %v2850_v52, %v5910_v17  ;;  %v2447_v22 = vmul.f32 %v5224_v51, %v6657_v60  ;;  %v5226_v18 = vpop.eup %5225 }
 0x8c4   : > { %v2458_v57 = vpack.c.bf16 %v2446_v59, %v2445_v1  ;;  %v5228_v23 = vpop.eup %5227  ;;  %v2450_v11 = vmul.f32 %v5226_v18, %v6666_v42 }
 0x8c5   : > { %v2459_v29 = vpack.c.bf16 %v2448_v37, %v2447_v22 }
 0x8c7   : > { %v4785_v7 = vpop.f32.mrb[68].mxu0  ;;  %2912 = vmax.xlane.f32.xlu0 %v6747_v39 }
 0x8c8   : > { %v2863_v56 = vpop.f32.mrb[69].mxu0  ;;  %v6773_v38 = vadd.f32 %v4785_v7, %v7491_v61 }
 0x8c9   : > { %v6758_v58 = vadd.f32 %v2863_v56, %v7489_v54  ;;  %v4786_v17 = vpop.f32.mrb[70].mxu0  ;;  %v2449_v54 = vmul.f32 %v5228_v23, %v6663_v50 }
 0x8ca   : > { %v2866_v62 = vpop.f32.mrb[71].mxu0  ;;  %4734 = vmatmul.mubr.bf16.gmra.mrb[52].mxu1 %v2458_v57  ;;  %v6780_v41 = vadd.f32 %v4786_v17, %v5941_v45 }
 0x8cb   : > { %2914 = vmax.xlane.f32.xlu0 %v6755_v4  ;;  %2918 = vmax.xlane.f32.xlu1 %v6758_v58  ;;  %v6769_v31 = vadd.f32 %v2866_v62, %v5961_v13  ;;  %v2460_v32 = vpack.c.bf16 %v2450_v11, %v2449_v54 }
 0x8cc   : > { %4737 = vmatprep.mubr.bf16.mxu1 %v2459_v29 }
 0x8cf   : > { %v4789_v60 = vpop.f32.mrb[72].mxu0  ;;  %2916 = vmax.xlane.f32.xlu0 %v6763_v46 }
 0x8d0   : > { %v2879_v8 = vpop.f32.mrb[73].mxu0 }
 0x8d1   : > { %v4790_v53 = vpop.f32.mrb[74].mxu0  ;;  %v6785_v19 = vadd.f32 %v2879_v8, %v7493_v25 }
 0x8d2   : > { %v2882_v10 = vpop.f32.mrb[75].mxu0  ;;  %4738 = vmatmul.mubr.bf16.gmra.mrb[56].mxu1 %v2460_v32  ;;  %v6797_v45 = vadd.f32 %v4790_v53, %v5983_v27 }
 0x8d3   : > { %2920 = vmax.xlane.f32.xlu0 %v6769_v31  ;;  %v6789_v61 = vadd.f32 %v2882_v10, %v6002_v36  ;;  %v2592_v36 = vld [vmem:[%s7408_s7 + $0x8] sm:$0xf] }
 0x8d4   : > { %4971 = vmatprep.subr.msk.bf16.mxu1 %vm1909_vm3, %v2592_v36  ;;  %v2618_v25 = vsel %vm1909_vm3, %v2592_v36, 0 }
 0x8d5   : > { %4746 = vmatpush3.bf16.msra.mxu1 %v2618_v25 }
 0x8d7   : > { %v4793_v26 = vpop.f32.mrb[76].mxu0  ;;  %2922 = vmax.xlane.f32.xlu0 %v6773_v38 }
 0x8d8   : > { %v6777_v42 = vadd.f32 %v4793_v26, %v7499_v9  ;;  %v2895_v50 = vpop.f32.mrb[77].mxu0  ;;  %v6793_v9 = vadd.f32 %v4789_v60, %v7495_v14 }
 0x8d9   : > { %v4794_v13 = vpop.f32.mrb[78].mxu0  ;;  %v6809_v27 = vadd.f32 %v2895_v50, %v7497_v35  ;;  %v5230_v35 = vpop.eup %5229 }
 0x8da   : > { %v2898_v3 = vpop.f32.mrb[79].mxu0  ;;  %2938 = vmax.xlane.f32.xlu1 %v6777_v42  ;;  %v6822_v48 = vadd.f32 %v4794_v13, %v7476_v16 }
 0x8db   : > { %2924 = vmax.xlane.f32.xlu0 %v6780_v41 }
 0x8df   : > { %2926 = vmax.xlane.f32.xlu0 %v6785_v19 }
 0x8e3   : > { %2928 = vmax.xlane.f32.xlu0 %v6789_v61 }
 0x8e7   : > { %2930 = vmax.xlane.f32.xlu0 %v6793_v9 }
 0x8ea   : > { %v2418_v47 = vpop.xlane.xlu0 %2417 }
 0x8eb   : > { %2932 = vmax.xlane.f32.xlu0 %v6797_v45  ;;  %3062 = vrot.lane.b32.xlu1 %v5776_v15, %s5448_s28  ;;  %5231 = vrcp.f32 %v2418_v47  ;;  %v6816_v15 = vadd.f32 %v2898_v3, %v7477_v0 }
 0x8ec   : > { %5233 = vrcp.f32 %v6734_v34 }
 0x8ee   : > { %v2422_v14 = vpop.xlane.xlu0 %2421 }
 0x8ef   : > { %2934 = vmax.xlane.f32.xlu0 %v6809_v27  ;;  %3064 = vrot.lane.b32.xlu1 %v5774_v12, %s5448_s28  ;;  %5235 = vrcp.f32 %v2422_v14  ;;  %v2451_v12 = vmul.f32 %v5230_v35, %v6674_v6 }
 0x8f3   : > { %2936 = vmax.xlane.f32.xlu0 %v6816_v15  ;;  %3068 = vrot.lane.b32.xlu1 %v5792_v20, %s5448_s28 }
 0x8f5   : > { %v5232_v34 = vpop.eup %5231 }
 0x8f6   : > { %v2452_v0 = vmul.f32 %v5232_v34, %v6689_v55  ;;  %v5234_v5 = vpop.eup %5233 }
 0x8f7   : > { %2940 = vmax.xlane.f32.xlu0 %v6822_v48  ;;  %3074 = vrot.lane.b32.xlu1 %v5826_v2, %s5448_s28  ;;  %v2453_v20 = vmul.f32 %v5234_v5, %v6668_v33 }
 0x8f8   : > { %v2461_v52 = vpack.c.bf16 %v2452_v0, %v2451_v12 }
 0x8f9   : > { %v5236_v30 = vpop.eup %5235 }
 0x8fa   : > { %4741 = vmatprep.mubr.bf16.mxu1 %v2461_v52  ;;  %v2454_v24 = vmul.f32 %v5236_v30, %v6693_v43 }
 0x8fc   : > { %v2462_v16 = vpack.c.bf16 %v2454_v24, %v2453_v20 }
 0x8fe   : > { %4742 = vmatmul.mubr.bf16.gmra.mrb[60].mxu1 %v2462_v16 }
 0x90d   : > { %3066 = vrot.lane.b32.xlu0 %v5794_v40, %s5448_s28 }
 0x911   : > { %3070 = vrot.lane.b32.xlu0 %v5810_v28, %s5448_s28 }
 0x915   : > { %3072 = vrot.lane.b32.xlu0 %v5808_v44, %s5448_s28 }
 0x950   : > { %v2911_v2 = vpop.xlane.xlu0 %2910 }
 0x951   : > { %v2942_v21 = vsub.f32 %v6743_v49, %v2911_v2 }
 0x953   : > { %v2958_v59 = vmul.f32 1.442695, %v2942_v21 }
 0x954   : > { %v2913_v6 = vpop.xlane.xlu0 %2912 }
 0x955   : > { %v2943_v40 = vsub.f32 %v6747_v39, %v2913_v6 }
 0x957   : > { %v2960_v44 = vmul.f32 1.442695, %v2943_v40 }
 0x958   : > { %v2915_v55 = vpop.xlane.xlu0 %2914  ;;  %v2919_v28 = vpop.xlane.xlu1 %2918 }
 0x959   : > { %v2944_v33 = vsub.f32 %v6755_v4, %v2915_v55  ;;  %v2946_v56 = vsub.f32 %v6758_v58, %v2919_v28 }
 0x95b   : > { %v2962_v51 = vmul.f32 1.442695, %v2944_v33  ;;  %v2966_v62 = vmul.f32 1.442695, %v2946_v56 }
 0x95c   : > { %v2917_v43 = vpop.xlane.xlu0 %2916 }
 0x95d   : > { %5237 = vpow2.f32 %v2962_v51  ;;  %v2945_v37 = vsub.f32 %v6763_v46, %v2917_v43 }
 0x95e   : > { %5239 = vpow2.f32 %v2958_v59 }
 0x95f   : > { %v2964_v1 = vmul.f32 1.442695, %v2945_v37 }
 0x960   : > { %v2921_v7 = vpop.xlane.xlu0 %2920 }
 0x961   : > { %5241 = vpow2.f32 %v2964_v1  ;;  %v2947_v49 = vsub.f32 %v6769_v31, %v2921_v7 }
 0x962   : > { %5243 = vpow2.f32 %v2960_v44 }
 0x963   : > { %v2968_v29 = vmul.f32 1.442695, %v2947_v49 }
 0x964   : > { %v2923_v22 = vpop.xlane.xlu0 %2922 }
 0x965   : > { %v2948_v4 = vsub.f32 %v6773_v38, %v2923_v22 }
 0x967   : > { %v6844_v17 = vpop.eup %5237  ;;  %v2970_v57 = vmul.f32 1.442695, %v2948_v4  ;;  %v2939_v18 = vpop.xlane.xlu1 %2938 }
 0x968   : > { %2994 = vadd.xlane.f32.xlu0 %v6844_v17  ;;  %v2925_v39 = vpop.xlane.xlu0 %2924  ;;  %v6848_v58 = vpop.eup %5239  ;;  %v2956_v8 = vsub.f32 %v6777_v42, %v2939_v18 }
 0x969   : > { %5245 = vpow2.f32 %v2970_v57  ;;  %v2949_v23 = vsub.f32 %v6780_v41, %v2925_v39 }
 0x96a   : > { %5247 = vpow2.f32 %v2966_v62  ;;  %v2986_v26 = vmul.f32 1.442695, %v2956_v8 }
 0x96b   : > { %v6850_v46 = vpop.permute.xlu1 %3062  ;;  %5249 = vpow2.f32 %v2968_v29  ;;  %v2972_v60 = vmul.f32 1.442695, %v2949_v23  ;;  %v6854_v54 = vpop.eup %5241 }
 0x96c   : > { %4795 = vmatprep.subr.bf16.mxu1 %v6850_v46  ;;  %2990 = vadd.xlane.f32.xlu0 %v6848_v58  ;;  %v2927_v11 = vpop.xlane.xlu0 %2926  ;;  %v6859_v32 = vpop.eup %5243 }
 0x96d   : > { %5251 = vpow2.f32 %v2972_v60  ;;  %v2950_v41 = vsub.f32 %v6785_v19, %v2927_v11 }
 0x96f   : > { %v2974_v36 = vmul.f32 1.442695, %v2950_v41  ;;  %v3065_v37 = vpop.permute.xlu1 %3064 }
 0x970   : > { %2996 = vadd.xlane.f32.xlu0 %v6854_v54  ;;  %v2929_v31 = vpop.xlane.xlu0 %2928 }
 0x971   : > { %v2951_v53 = vsub.f32 %v6789_v61, %v2929_v31 }
 0x973   : > { %v6861_v10 = vpop.eup %5245  ;;  %v2976_v38 = vmul.f32 1.442695, %v2951_v53  ;;  %v3069_v49 = vpop.permute.xlu1 %3068 }
 0x974   : > { %2992 = vadd.xlane.f32.xlu0 %v6859_v32  ;;  %3002 = vadd.xlane.f32.xlu1 %v6861_v10  ;;  %v2931_v50 = vpop.xlane.xlu0 %2930  ;;  %v6867_v13 = vpop.eup %5247 }
 0x975   : > { %5253 = vpow2.f32 %v2976_v38  ;;  %v2952_v42 = vsub.f32 %v6793_v9, %v2931_v50  ;;  %v6869_v3 = vpop.eup %5249 }
 0x976   : > { %5255 = vpow2.f32 %v2986_v26 }
 0x977   : > { %v2978_v61 = vmul.f32 1.442695, %v2952_v42  ;;  %v6874_v14 = vpop.eup %5251  ;;  %v3075_v11 = vpop.permute.xlu1 %3074 }
 0x978   : > { %3000 = vadd.xlane.f32.xlu0 %v6869_v3  ;;  %2998 = vadd.xlane.f32.xlu1 %v6867_v13  ;;  %v2933_v47 = vpop.xlane.xlu0 %2932 }
 0x979   : > { %5257 = vpow2.f32 %v2978_v61  ;;  %v2953_v25 = vsub.f32 %v6797_v45, %v2933_v47 }
 0x97a   : > { %5259 = vpow2.f32 %v2974_v36 }
 0x97b   : > { %v2980_v9 = vmul.f32 1.442695, %v2953_v25 }
 0x97c   : > { %3004 = vadd.xlane.f32.xlu1 %v6874_v14  ;;  %v2935_v19 = vpop.xlane.xlu0 %2934 }
 0x97d   : > { %v2954_v35 = vsub.f32 %v6809_v27, %v2935_v19  ;;  %5261 = vpow2.f32 %v2980_v9 }
 0x97f   : > { %v6878_v34 = vpop.eup %5253  ;;  %v2982_v12 = vmul.f32 1.442695, %v2954_v35 }
 0x980   : > { %3008 = vadd.xlane.f32.xlu0 %v6878_v34  ;;  %v2937_v0 = vpop.xlane.xlu0 %2936  ;;  %v6882_v52 = vpop.eup %5255 }
 0x981   : > { %v2955_v5 = vsub.f32 %v6816_v15, %v2937_v0  ;;  %5263 = vpow2.f32 %v2982_v12 }
 0x983   : > { %v6884_v45 = vpop.eup %5257  ;;  %v2984_v30 = vmul.f32 1.442695, %v2955_v5 }
 0x984   : > { %3018 = vadd.xlane.f32.xlu0 %v6882_v52  ;;  %3010 = vadd.xlane.f32.xlu1 %v6884_v45  ;;  %v2941_v27 = vpop.xlane.xlu0 %2940  ;;  %v6889_v24 = vpop.eup %5259 }
 0x985   : > { %5265 = vpow2.f32 %v2984_v30  ;;  %v2957_v20 = vsub.f32 %v6822_v48, %v2941_v27 }
 0x987   : > { %v2988_v16 = vmul.f32 1.442695, %v2957_v20  ;;  %v6892_v15 = vpop.eup %5261 }
 0x988   : > { %3006 = vadd.xlane.f32.xlu1 %v6889_v24  ;;  %v3067_v56 = vpop.permute.xlu0 %3066 }
 0x989   : > { %5267 = vpow2.f32 %v2988_v16 }
 0x98b   : > { %v6895_v2 = vpop.eup %5263 }
 0x98c   : > { %3012 = vadd.xlane.f32.xlu1 %v6892_v15  ;;  %v3071_v18 = vpop.permute.xlu0 %3070 }
 0x98f   : > { %v6897_v6 = vpop.eup %5265 }
 0x990   : > { %3014 = vadd.xlane.f32.xlu1 %v6895_v2  ;;  %3016 = vadd.xlane.f32.xlu0 %v6897_v6 }
 0x993   : > { %v6901_v55 = vpop.eup %5267 }
 0x994   : > { %3020 = vadd.xlane.f32.xlu1 %v6901_v55 }
 0x995   : > { %v4731_v48 = vpop.f32.mrb[48].mxu1 }
 0x996   : > { %v2521_v21 = vpop.f32.mrb[49].mxu1 }
 0x997   : > { %v4732_v33 = vpop.f32.mrb[50].mxu1 }
 0x998   : > { %v2585_v51 = vpack.c.bf16 %v4732_v33, %v4731_v48  ;;  %v2524_v43 = vpop.f32.mrb[51].mxu1 }
 0x999   : > { %v2584_v59 = vpack.c.bf16 %v2524_v43, %v2521_v21 }
 0x99b   : > { %4747 = vmatprep.mubr.msk.bf16.mxu1 %vm990_vm1, %v2584_v59 }
 0x99c   : > { %4748 = vmatmul.mubr.msk.bf16.vlgmr.msra.gmra.mrb[32].mxu1 %vm990_vm1, %v2585_v51 }
 0x99d   : > { %4796 = vmatpush3.bf16.msra.mxu1 %v6850_v46  ;;  %v4735_v40 = vpop.f32.mrb[52].mxu1  ;;  %v3073_v46 = vpop.permute.xlu0 %3072 }
 0x99e   : > { %4797 = vmatprep.subr.bf16.mxu1 %v3065_v37  ;;  %v2537_v7 = vpop.f32.mrb[53].mxu1 }
 0x99f   : > { %v4736_v28 = vpop.f32.mrb[54].mxu1 }
 0x9a0   : > { %v2587_v1 = vpack.c.bf16 %v4736_v28, %v4735_v40  ;;  %v2540_v44 = vpop.f32.mrb[55].mxu1 }
 0x9a1   : > { %v2586_v22 = vpack.c.bf16 %v2540_v44, %v2537_v7  ;;  %4798 = vmatpush3.bf16.msra.mxu1 %v3065_v37  ;;  %v3191_v7 = vld [vmem:[%s7408_s7 + $0xc] sm:$0xf] }
 0x9a2   : > { %4799 = vmatprep.subr.bf16.mxu1 %v3067_v56 }
 0x9a3   : > { %4751 = vmatprep.mubr.msk.bf16.mxu1 %vm990_vm1, %v2586_v22 }
 0x9a4   : > { %4752 = vmatmul.mubr.msk.bf16.gmra.mrb[36].mxu1 %vm990_vm1, %v2587_v1 }
 0x9a5   : > { %4800 = vmatpush3.bf16.msra.mxu1 %v3067_v56  ;;  %v4739_v4 = vpop.f32.mrb[56].mxu1 }
 0x9a6   : > { %3076 = vrot.lane.b32.xlu0 %v5824_v63, %s5448_s28  ;;  %4801 = vmatprep.subr.bf16.mxu1 %v3069_v49  ;;  %v2553_v57 = vpop.f32.mrb[57].mxu1 }
 0x9a7   : > { %v4740_v62 = vpop.f32.mrb[58].mxu1 }
 0x9a8   : > { %v2589_v39 = vpack.c.bf16 %v4740_v62, %v4739_v4  ;;  %v2556_v29 = vpop.f32.mrb[59].mxu1 }
 0x9a9   : > { %v2588_v23 = vpack.c.bf16 %v2556_v29, %v2553_v57  ;;  %4802 = vmatpush3.bf16.msra.mxu1 %v3069_v49 }
 0x9aa   : > { %4803 = vmatprep.subr.bf16.mxu1 %v3071_v18 }
 0x9ab   : > { %4755 = vmatprep.mubr.msk.bf16.mxu1 %vm990_vm1, %v2588_v23 }
 0x9ac   : > { %4756 = vmatmul.mubr.msk.bf16.gmra.mrb[40].mxu1 %vm990_vm1, %v2589_v39 }
 0x9ad   : > { %4804 = vmatpush3.bf16.msra.mxu1 %v3071_v18 }
 0x9ae   : > { %4805 = vmatprep.subr.bf16.mxu1 %v3073_v46 }
 0x9b1   : > { %4806 = vmatpush3.bf16.msra.mxu1 %v3073_v46 }
 0x9b2   : > { %4807 = vmatprep.subr.bf16.mxu1 %v3075_v11 }
 0x9b5   : > { %4808 = vmatpush3.bf16.msra.mxu1 %v3075_v11 }
 0x9d1   : > { %v4743_v63 = vpop.f32.mrb[60].mxu1 }
 0x9d2   : > { %v2569_v60 = vpop.f32.mrb[61].mxu1 }
 0x9d3   : > { %v4744_v8 = vpop.f32.mrb[62].mxu1 }
 0x9d4   : > { %v2591_v31 = vpack.c.bf16 %v4744_v8, %v4743_v63  ;;  %v2572_v53 = vpop.f32.mrb[63].mxu1 }
 0x9d5   : > { %v2590_v38 = vpack.c.bf16 %v2572_v53, %v2569_v60 }
 0x9d7   : > { %4759 = vmatprep.mubr.msk.bf16.mxu1 %vm990_vm1, %v2590_v38 }
 0x9d8   : > { %4760 = vmatmul.mubr.msk.bf16.gmra.mrb[44].mxu1 %vm990_vm1, %v2591_v31 }
 0x9f5   : > { %v2995_v26 = vpop.xlane.xlu0 %2994 }
 0x9f9   : > { %v2991_v50 = vpop.xlane.xlu0 %2990 }
 0x9fa   : > { %5269 = vrcp.f32 %v2991_v50 }
 0x9fd   : > { %v2997_v41 = vpop.xlane.xlu0 %2996 }
 0xa01   : > { %v3003_v42 = vpop.xlane.xlu1 %3002  ;;  %v2993_v61 = vpop.xlane.xlu0 %2992 }
 0xa02   : > { %5271 = vrcp.f32 %v2993_v61 }
 0xa03   : > { %5273 = vrcp.f32 %v2997_v41 }
 0xa04   : > { %v5270_v36 = vpop.eup %5269 }
 0xa05   : > { %v2999_v47 = vpop.xlane.xlu1 %2998  ;;  %v3038_v9 = vmul.f32 %v5270_v36, %v6848_v58  ;;  %v3001_v12 = vpop.xlane.xlu0 %3000 }
 0xa06   : > { %5275 = vrcp.f32 %v2999_v47 }
 0xa07   : > { %5277 = vrcp.f32 %v3001_v12 }
 0xa08   : > { %5279 = vrcp.f32 %v2995_v26 }
 0xa09   : > { %v3005_v19 = vpop.xlane.xlu1 %3004 }
 0xa0a   : > { %5281 = vrcp.f32 %v3005_v19 }
 0xa0c   : > { %v5272_v25 = vpop.eup %5271 }
 0xa0d   : > { %v3039_v35 = vmul.f32 %v5272_v25, %v6859_v32  ;;  %v3009_v30 = vpop.xlane.xlu0 %3008  ;;  %v5274_v48 = vpop.eup %5273 }
 0xa0e   : > { %v3041_v51 = vmul.f32 %v5274_v48, %v6854_v54  ;;  %v3217_v54 = vsel %vm1909_vm3, %v3191_v7, 0 }
 0xa0f   : > { %v3054_v0 = vpack.c.bf16 %v3039_v35, %v3038_v9 }
 0xa10   : > { %v5276_v21 = vpop.eup %5275 }
 0xa11   : > { %v3011_v5 = vpop.xlane.xlu1 %3010  ;;  %4811 = vmatprep.mubr.bf16.mxu1 %v3054_v0  ;;  %v3019_v20 = vpop.xlane.xlu0 %3018  ;;  %v3042_v37 = vmul.f32 %v5276_v21, %v6867_v13  ;;  %v6947_v21 = vld [vmem:[%s7409_s8] ss:$0 sm:$0xff] }
 0xa12   : > { %v5278_v33 = vpop.eup %5277 }
 0xa13   : > { %v5280_v32 = vpop.eup %5279  ;;  %v3043_v40 = vmul.f32 %v5278_v33, %v6869_v3 }
 0xa14   : > { %v3040_v28 = vmul.f32 %v5280_v32, %v6844_v17  ;;  %v5282_v44 = vpop.eup %5281 }
 0xa15   : > { %v3007_v27 = vpop.xlane.xlu1 %3006  ;;  %v3056_v13 = vpack.c.bf16 %v3043_v40, %v3042_v37  ;;  %v3045_v49 = vmul.f32 %v5282_v44, %v6874_v14 }
 0xa16   : > { %5283 = vrcp.f32 %v3007_v27  ;;  %v3055_v1 = vpack.c.bf16 %v3041_v51, %v3040_v28 }
 0xa17   : > { %5285 = vrcp.f32 %v3003_v42 }
 0xa18   : > { %5287 = vrcp.f32 %v3009_v30 }
 0xa19   : > { %v3013_v16 = vpop.xlane.xlu1 %3012 }
 0xa1a   : > { %5289 = vrcp.f32 %v3013_v16 }
 0xa1d   : > { %v3017_v58 = vpop.xlane.xlu0 %3016  ;;  %v3015_v43 = vpop.xlane.xlu1 %3014 }
 0xa1e   : > { %5291 = vrcp.f32 %v3015_v43 }
 0xa1f   : > { %5293 = vrcp.f32 %v3017_v58 }
 0xa20   : > { %5295 = vrcp.f32 %v3011_v5  ;;  %v5284_v3 = vpop.eup %5283 }
 0xa21   : > { %v3077_v59 = vpop.permute.xlu0 %3076  ;;  %v5286_v56 = vpop.eup %5285  ;;  %v3046_v4 = vmul.f32 %v5284_v3, %v6889_v24 }
 0xa22   : > { %4809 = vmatprep.subr.bf16.mxu1 %v3077_v59  ;;  %v5288_v22 = vpop.eup %5287  ;;  %v3021_v17 = vpop.xlane.xlu1 %3020  ;;  %v3044_v57 = vmul.f32 %v5286_v56, %v6861_v10 }
 0xa23   : > { %4810 = vmatpush3.bf16.msra.mxu1 %v3077_v59  ;;  %5297 = vrcp.f32 %v3021_v17  ;;  %v3047_v18 = vmul.f32 %v5288_v22, %v6878_v34  ;;  %v5397_v59 = vld [vmem:[%s5535_s30 + $0x10] sm:$0xff] }
 0xa24   : > { %4980 = vmatprep.subr.msk.bf16.mxu1 %vm1909_vm3, %v3191_v7  ;;  %v5290_v62 = vpop.eup %5289  ;;  %v3057_v39 = vpack.c.bf16 %v3045_v49, %v3044_v57  ;;  %5299 = vrcp.f32 %v3019_v20  ;;  %v5398_v7 = vld [vmem:[%s5535_s30] sm:$0xff]  ;;  %v5400_v57 = vld [vmem:[%s5535_s30 + $0x30] sm:$0xff] }
 0xa25   : > { %v3058_v23 = vpack.c.bf16 %v3047_v18, %v3046_v4  ;;  %v3049_v63 = vmul.f32 %v5290_v62, %v6892_v15 }
 0xa26   : > { %4812 = vmatmul.mubr.bf16.vlgmr.msra.gmra.mrb[64].mxu1 %v3055_v1 }
 0xa27   : > { %4815 = vmatprep.mubr.bf16.mxu1 %v3056_v13  ;;  %4828 = vmatpush3.bf16.msra.mxu1 %v3217_v54  ;;  %v5399_v13 = vld [vmem:[%s5535_s30 + $0x18] sm:$0xff] }
 0xa28   : > { %v5292_v29 = vpop.eup %5291 }
 0xa29   : > { %v5294_v46 = vpop.eup %5293  ;;  %v3050_v14 = vmul.f32 %v5292_v29, %v6895_v2 }
 0xa2a   : > { %v5296_v11 = vpop.eup %5295  ;;  %v3051_v24 = vmul.f32 %v5294_v46, %v6897_v6 }
 0xa2b   : > { %v3048_v10 = vmul.f32 %v5296_v11, %v6884_v45 }
 0xa2c   : > { %v3060_v34 = vpack.c.bf16 %v3051_v24, %v3050_v14  ;;  %v5402_v14 = vld [vmem:[%s5535_s30 + $0x20] sm:$0xff] }
 0xa2d   : > { %v3059_v60 = vpack.c.bf16 %v3049_v63, %v3048_v10  ;;  %v5298_v8 = vpop.eup %5297 }
 0xa2e   : > { %4816 = vmatmul.mubr.bf16.gmra.mrb[68].mxu1 %v3057_v39  ;;  %v5300_v31 = vpop.eup %5299  ;;  %v3053_v53 = vmul.f32 %v5298_v8, %v6901_v55  ;;  %v5401_v39 = vld [vmem:[%s5535_s30 + $0x8] sm:$0xff] }
 0xa2f   : > { %4819 = vmatprep.mubr.bf16.mxu1 %v3058_v23  ;;  %v3052_v38 = vmul.f32 %v5300_v31, %v6882_v52 }
 0xa31   : > { %v3061_v26 = vpack.c.bf16 %v3053_v53, %v3052_v38  ;;  %v5403_v53 = vld [vmem:[%s5535_s30 + $0x38] sm:$0xff] }
 0xa36   : > { %4820 = vmatmul.mubr.bf16.gmra.mrb[72].mxu1 %v3059_v60 }
 0xa37   : > { %4823 = vmatprep.mubr.bf16.mxu1 %v3060_v34 }
 0xa3e   : > { %4824 = vmatmul.mubr.bf16.gmra.mrb[76].mxu1 %v3061_v26 }
 0xaf9   : > { %v4813_v50 = vpop.f32.mrb[64].mxu1 }
 0xafa   : > { %v3120_v15 = vpop.f32.mrb[65].mxu1 }
 0xafb   : > { %v4814_v41 = vpop.f32.mrb[66].mxu1 }
 0xafc   : > { %v3184_v2 = vpack.c.bf16 %v4814_v41, %v4813_v50  ;;  %v3123_v42 = vpop.f32.mrb[67].mxu1  ;;  %v5404_v41 = vld [vmem:[%s5535_s30 + $0x28] sm:$0xff] }
 0xafd   : > { %v3183_v6 = vpack.c.bf16 %v3123_v42, %v3120_v15 }
 0xaff   : > { %4829 = vmatprep.mubr.msk.bf16.mxu1 %vm990_vm1, %v3183_v6 }
 0xb00   : > { %4830 = vmatmul.mubr.msk.bf16.vlgmr.msra.gmra.mrb[32].mxu1 %vm990_vm1, %v3184_v2 }
 0xb01   : > { %v4817_v45 = vpop.f32.mrb[68].mxu1 }
 0xb02   : > { %v3136_v61 = vpop.f32.mrb[69].mxu1 }
 0xb03   : > { %v4818_v47 = vpop.f32.mrb[70].mxu1 }
 0xb04   : > { %v3186_v36 = vpack.c.bf16 %v4818_v47, %v4817_v45  ;;  %v3139_v25 = vpop.f32.mrb[71].mxu1 }
 0xb05   : > { %v3185_v55 = vpack.c.bf16 %v3139_v25, %v3136_v61 }
 0xb07   : > { %4833 = vmatprep.mubr.msk.bf16.mxu1 %vm990_vm1, %v3185_v55 }
 0xb08   : > { %4834 = vmatmul.mubr.msk.bf16.gmra.mrb[36].mxu1 %vm990_vm1, %v3186_v36  ;;  %v5405_v36 = vld [vmem:[%s5535_s30 + $0x70] sm:$0xff] }
 0xb09   : > { %v4821_v52 = vpop.f32.mrb[72].mxu1 }
 0xb0a   : > { %v3152_v19 = vpop.f32.mrb[73].mxu1 }
 0xb0b   : > { %v4822_v9 = vpop.f32.mrb[74].mxu1 }
 0xb0c   : > { %v3188_v35 = vpack.c.bf16 %v4822_v9, %v4821_v52  ;;  %v3155_v12 = vpop.f32.mrb[75].mxu1  ;;  %v5406_v52 = vld [vmem:[%s5535_s30 + $0x50] sm:$0xff] }
 0xb0d   : > { %v3187_v0 = vpack.c.bf16 %v3155_v12, %v3152_v19 }
 0xb0f   : > { %4837 = vmatprep.mubr.msk.bf16.mxu1 %vm990_vm1, %v3187_v0  ;;  %v5407_v0 = vld [vmem:[%s5535_s30 + $0x40] sm:$0xff] }
 0xb10   : > { %4838 = vmatmul.mubr.msk.bf16.gmra.mrb[40].mxu1 %vm990_vm1, %v3188_v35 }
 0xb11   : > { %v4825_v5 = vpop.f32.mrb[76].mxu1 }
 0xb12   : > { %v3168_v30 = vpop.f32.mrb[77].mxu1 }
 0xb13   : > { %v4826_v27 = vpop.f32.mrb[78].mxu1 }
 0xb14   : > { %v3190_v20 = vpack.c.bf16 %v4826_v27, %v4825_v5  ;;  %v3171_v16 = vpop.f32.mrb[79].mxu1 }
 0xb15   : > { %v3189_v48 = vpack.c.bf16 %v3171_v16, %v3168_v30 }
 0xb17   : > { %4841 = vmatprep.mubr.msk.bf16.mxu1 %vm990_vm1, %v3189_v48 }
 0xb18   : > { %4842 = vmatmul.mubr.msk.bf16.gmra.mrb[44].mxu1 %vm990_vm1, %v3190_v20  ;;  %v5408_v20 = vld [vmem:[%s5535_s30 + $0x58] sm:$0xff] }
 0xbd3   : > { %v4831_v58 = vpop.f32.mrb[32].mxu1 }
 0xbd4   : > { %v3341_v33 = vadd.f32 %v4831_v58, %v6947_v21  ;;  %v3253_v32 = vpop.f32.mrb[33].mxu1 }
 0xbd5   : > { %v3339_v51 = vadd.f32 %v6947_v21, %v3253_v32  ;;  %v4832_v43 = vpop.f32.mrb[34].mxu1 }
 0xbd6   : > { %v6952_v37 = vadd.f32 %v5397_v59, %v3341_v33  ;;  %v3256_v40 = vpop.f32.mrb[35].mxu1  ;;  %v3342_v1 = vadd.f32 %v4832_v43, %v6947_v21  ;;  %v5409_v33 = vld [vmem:[%s5535_s30 + $0x48] sm:$0xff]  ;;  %v5410_v59 = vld [vmem:[%s5535_s30 + $0x60] sm:$0xff] }
 0xbd7   : > { %v6955_v28 = vadd.f32 %v5398_v7, %v3339_v51  ;;  %v3340_v56 = vadd.f32 %v6947_v21, %v3256_v40 }
 0xbd8   : > { %v3379_v54 = vsel %vm460_vm0, %v6952_v37, 0.0  ;;  %v6961_v3 = vadd.f32 %v5399_v13, %v3342_v1 }
 0xbd9   : > { %3380 = vadd.xlane.f32.xlu1 %v3379_v54  ;;  %v3373_v49 = vsel %vm460_vm0, %v6955_v28, 0.0  ;;  %v6971_v29 = vadd.f32 %v5401_v39, %v3340_v56 }
 0xbda   : > { %v3382_v46 = vsel %vm460_vm0, %v6961_v3, 0.0 }
 0xbdb   : > { %v4835_v44 = vpop.f32.mrb[36].mxu1  ;;  %v3376_v8 = vsel %vm460_vm0, %v6971_v29, 0.0 }
 0xbdc   : > { %v3345_v22 = vadd.f32 %v4835_v44, %v6947_v21  ;;  %v3269_v17 = vpop.f32.mrb[37].mxu1  ;;  %v5411_v44 = vld [vmem:[%s5535_s30 + $0x68] sm:$0xff] }
 0xbdd   : > { %3374 = vadd.xlane.f32.xlu1 %v3373_v49  ;;  %v4836_v4 = vpop.f32.mrb[38].mxu1  ;;  %v3343_v23 = vadd.f32 %v6947_v21, %v3269_v17 }
 0xbde   : > { %v6968_v18 = vadd.f32 %v5400_v57, %v3345_v22  ;;  %v3272_v62 = vpop.f32.mrb[39].mxu1  ;;  %v3346_v10 = vadd.f32 %v4836_v4, %v6947_v21  ;;  %v5412_v22 = vld [vmem:[%s5535_s30 + $0x78] sm:$0xff] }
 0xbdf   : > { %v6979_v24 = vadd.f32 %v5402_v14, %v3343_v23  ;;  %v3344_v26 = vadd.f32 %v6947_v21, %v3272_v62 }
 0xbe0   : > { %v3391_v11 = vsel %vm460_vm0, %v6968_v18, 0.0  ;;  %v6985_v38 = vadd.f32 %v5403_v53, %v3346_v10 }
 0xbe1   : > { %3383 = vadd.xlane.f32.xlu1 %v3382_v46  ;;  %3392 = vadd.xlane.f32.xlu0 %v3391_v11  ;;  %v3385_v50 = vsel %vm460_vm0, %v6979_v24, 0.0  ;;  %v6991_v2 = vadd.f32 %v5404_v41, %v3344_v26 }
 0xbe2   : > { %v3394_v61 = vsel %vm460_vm0, %v6985_v38, 0.0 }
 0xbe3   : > { %v4839_v63 = vpop.f32.mrb[40].mxu1  ;;  %v3388_v35 = vsel %vm460_vm0, %v6991_v2, 0.0 }
 0xbe4   : > { %v3285_v60 = vpop.f32.mrb[41].mxu1  ;;  %v3349_v42 = vadd.f32 %v4839_v63, %v6947_v21 }
 0xbe5   : > { %3377 = vadd.xlane.f32.xlu1 %v3376_v8  ;;  %v4840_v34 = vpop.f32.mrb[42].mxu1  ;;  %v3347_v9 = vadd.f32 %v6947_v21, %v3285_v60 }
 0xbe6   : > { %v3288_v31 = vpop.f32.mrb[43].mxu1  ;;  %v7001_v19 = vadd.f32 %v5406_v52, %v3349_v42  ;;  %v3350_v30 = vadd.f32 %v4840_v34, %v6947_v21 }
 0xbe7   : > { %v7009_v5 = vadd.f32 %v5407_v0, %v3347_v9  ;;  %v3348_v48 = vadd.f32 %v6947_v21, %v3288_v31 }
 0xbe8   : > { %v3403_v27 = vsel %vm460_vm0, %v7001_v19, 0.0  ;;  %v7015_v16 = vadd.f32 %v5408_v20, %v3350_v30 }
 0xbe9   : > { %3386 = vadd.xlane.f32.xlu1 %v3385_v50  ;;  %v3397_v58 = vsel %vm460_vm0, %v7009_v5, 0.0  ;;  %v7021_v32 = vadd.f32 %v5409_v33, %v3348_v48 }
 0xbea   : > { %v3406_v43 = vsel %vm460_vm0, %v7015_v16, 0.0 }
 0xbeb   : > { %v4843_v15 = vpop.f32.mrb[44].mxu1  ;;  %v3400_v1 = vsel %vm460_vm0, %v7021_v32, 0.0 }
 0xbec   : > { %v3353_v6 = vadd.f32 %v4843_v15, %v6947_v21  ;;  %v3301_v45 = vpop.f32.mrb[45].mxu1 }
 0xbed   : > { %3395 = vadd.xlane.f32.xlu1 %v3394_v61  ;;  %v4844_v47 = vpop.f32.mrb[46].mxu1  ;;  %v3351_v51 = vadd.f32 %v6947_v21, %v3301_v45 }
 0xbee   : > { %v6998_v25 = vadd.f32 %v5405_v36, %v3353_v6  ;;  %v3304_v55 = vpop.f32.mrb[47].mxu1  ;;  %v3354_v54 = vadd.f32 %v4844_v47, %v6947_v21 }
 0xbef   : > { %v7027_v40 = vadd.f32 %v5410_v59, %v3351_v51  ;;  %v3352_v7 = vadd.f32 %v6947_v21, %v3304_v55 }
 0xbf0   : > { %v3415_v12 = vsel %vm460_vm0, %v6998_v25, 0.0  ;;  %v7039_v17 = vadd.f32 %v5412_v22, %v3354_v54 }
 0xbf1   : > { %3389 = vadd.xlane.f32.xlu1 %v3388_v35  ;;  %3416 = vadd.xlane.f32.xlu0 %v3415_v12  ;;  %v7034_v13 = vadd.f32 %v5411_v44, %v3352_v7  ;;  %v3409_v56 = vsel %vm460_vm0, %v7027_v40, 0.0 }
 0xbf2   : > { %v3418_v4 = vsel %vm460_vm0, %v7039_v17, 0.0 }
 0xbf3   : > { %v3412_v49 = vsel %vm460_vm0, %v7034_v13, 0.0 }
 0xbf5   : > { %3404 = vadd.xlane.f32.xlu1 %v3403_v27 }
 0xbf9   : > { %3398 = vadd.xlane.f32.xlu1 %v3397_v58 }
 0xbfd   : > { %3407 = vadd.xlane.f32.xlu1 %v3406_v43 }
 0xc01   : > { %3401 = vadd.xlane.f32.xlu1 %v3400_v1 }
 0xc05   : > { %3410 = vadd.xlane.f32.xlu1 %v3409_v56 }
 0xc09   : > { %3413 = vadd.xlane.f32.xlu1 %v3412_v49 }
 0xc0d   : > { %3419 = vadd.xlane.f32.xlu1 %v3418_v4 }
 0xc66   : > { %v3381_v57 = vpop.xlane.xlu1 %3380 }
 0xc67   : > { %v3423_v21 = vmul.f32 0.03125, %v3381_v57 }
 0xc69   : > { %v7046_v23 = vsub.f32 %v6952_v37, %v3423_v21 }
 0xc6a   : > { %v3375_v62 = vpop.xlane.xlu1 %3374 }
 0xc6b   : > { %v3421_v39 = vmul.f32 0.03125, %v3375_v62  ;;  %v3455_v60 = vmul.f32 %v7046_v23, %v7046_v23 }
 0xc6d   : > { %v7049_v46 = vsub.f32 %v6955_v28, %v3421_v39  ;;  %v3475_v26 = vsel %vm460_vm0, %v3455_v60, 0.0 }
 0xc6e   : > { %v3384_v11 = vpop.xlane.xlu1 %3383  ;;  %v3393_v8 = vpop.xlane.xlu0 %3392 }
 0xc6f   : > { %v3453_v63 = vmul.f32 %v7049_v46, %v7049_v46  ;;  %v3424_v14 = vmul.f32 0.03125, %v3384_v11  ;;  %v3427_v53 = vmul.f32 0.03125, %v3393_v8 }
 0xc71   : > { %v3469_v10 = vsel %vm460_vm0, %v3453_v63, 0.0  ;;  %v7057_v37 = vsub.f32 %v6961_v3, %v3424_v14  ;;  %v7066_v42 = vsub.f32 %v6968_v18, %v3427_v53 }
 0xc72   : > { %v3378_v34 = vpop.xlane.xlu1 %3377  ;;  %3470 = vadd.xlane.f32.xlu0 %v3469_v10 }
 0xc73   : > { %v3422_v31 = vmul.f32 0.03125, %v3378_v34  ;;  %v3459_v18 = vmul.f32 %v7066_v42, %v7066_v42 }
 0xc75   : > { %v7060_v28 = vsub.f32 %v6971_v29, %v3422_v31  ;;  %v3456_v29 = vmul.f32 %v7057_v37, %v7057_v37  ;;  %v3487_v12 = vsel %vm460_vm0, %v3459_v18, 0.0 }
 0xc76   : > { %v3387_v50 = vpop.xlane.xlu1 %3386  ;;  %3476 = vadd.xlane.f32.xlu0 %v3475_v26  ;;  %v5003_v26 = vld [vmem:[%s7410_s9] sm:$0xff]  }
 0xc77   : > { %v3425_v15 = vmul.f32 0.03125, %v3387_v50  ;;  %v3454_v41 = vmul.f32 %v7060_v28, %v7060_v28  ;;  %v3478_v55 = vsel %vm460_vm0, %v3456_v29, 0.0  ;;  %4845 = vmatprep.subr.bf16.mxu0 %v5003_v26 }
 0xc78   : > { %4846 = vmatpush3.bf16.msra.mxu0 %v5003_v26 }
 0xc79   : > { %v7069_v6 = vsub.f32 %v6979_v24, %v3425_v15  ;;  %v3472_v3 = vsel %vm460_vm0, %v3454_v41, 0.0 }
 0xc7a   : > { %v3396_v45 = vpop.xlane.xlu1 %3395  ;;  %3473 = vadd.xlane.f32.xlu1 %v3472_v3  ;;  %v5004_v3 = vld [vmem:[%s7410_s9 + $0x8] sm:$0xff]  }
 0xc7b   : > { %v3457_v61 = vmul.f32 %v7069_v6, %v7069_v6  ;;  %v3428_v47 = vmul.f32 0.03125, %v3396_v45  ;;  %4847 = vmatprep.subr.bf16.mxu0 %v5004_v3 }
 0xc7c   : > { %4848 = vmatpush3.bf16.msra.mxu0 %v5004_v3 }
 0xc7d   : > { %v3481_v36 = vsel %vm460_vm0, %v3457_v61, 0.0  ;;  %v7081_v9 = vsub.f32 %v6985_v38, %v3428_v47 }
 0xc7e   : > { %v3390_v24 = vpop.xlane.xlu1 %3389  ;;  %3482 = vadd.xlane.f32.xlu0 %v3481_v36  ;;  %3479 = vadd.xlane.f32.xlu1 %v3478_v55  ;;  %v3417_v44 = vpop.xlane.xlu0 %3416 }
 0xc7f   : > { %v3426_v52 = vmul.f32 0.03125, %v3390_v24  ;;  %v3460_v48 = vmul.f32 %v7081_v9, %v7081_v9  ;;  %v3435_v22 = vmul.f32 0.03125, %v3417_v44 }
 0xc81   : > { %v7084_v35 = vsub.f32 %v6991_v2, %v3426_v52  ;;  %v3490_v51 = vsel %vm460_vm0, %v3460_v48, 0.0  ;;  %v7114_v39 = vsub.f32 %v6998_v25, %v3435_v22 }
 0xc82   : > { %v3405_v0 = vpop.xlane.xlu1 %3404  ;;  %3488 = vadd.xlane.f32.xlu0 %v3487_v12 }
 0xc83   : > { %v3458_v30 = vmul.f32 %v7084_v35, %v7084_v35  ;;  %v3431_v27 = vmul.f32 0.03125, %v3405_v0 }
 0xc85   : > { %v3484_v20 = vsel %vm460_vm0, %v3458_v30, 0.0  ;;  %v7093_v33 = vsub.f32 %v7001_v19, %v3431_v27 }
 0xc86   : > { %v3399_v58 = vpop.xlane.xlu1 %3398  ;;  %3485 = vadd.xlane.f32.xlu1 %v3484_v20 }
 0xc87   : > { %v3429_v38 = vmul.f32 0.03125, %v3399_v58  ;;  %v3463_v54 = vmul.f32 %v7093_v33, %v7093_v33 }
 0xc89   : > { %v7096_v2 = vsub.f32 %v7009_v5, %v3429_v38  ;;  %v3499_v4 = vsel %vm460_vm0, %v3463_v54, 0.0 }
 0xc8a   : > { %v3408_v43 = vpop.xlane.xlu1 %3407  ;;  %3491 = vadd.xlane.f32.xlu1 %v3490_v51 }
 0xc8b   : > { %v3461_v59 = vmul.f32 %v7096_v2, %v7096_v2  ;;  %v3432_v7 = vmul.f32 0.03125, %v3408_v43 }
 0xc8d   : > { %v3493_v1 = vsel %vm460_vm0, %v3461_v59, 0.0  ;;  %v7105_v5 = vsub.f32 %v7015_v16, %v3432_v7 }
 0xc8e   : > { %v3402_v56 = vpop.xlane.xlu1 %3401  ;;  %3494 = vadd.xlane.f32.xlu0 %v3493_v1  ;;  %v7151_v1 = vld [vmem:[%s7404_s3] ss:$0 sm:$0xff] }
 0xc8f   : > { %v3430_v19 = vmul.f32 0.03125, %v3402_v56 }
 0xc91   : > { %v7108_v49 = vsub.f32 %v7021_v32, %v3430_v19  ;;  %v3464_v32 = vmul.f32 %v7105_v5, %v7105_v5 }
 0xc92   : > { %3500 = vadd.xlane.f32.xlu0 %v3499_v4  ;;  %v3411_v57 = vpop.xlane.xlu1 %3410 }
 0xc93   : > { %v3433_v21 = vmul.f32 0.03125, %v3411_v57  ;;  %v3462_v62 = vmul.f32 %v7108_v49, %v7108_v49  ;;  %v3502_v8 = vsel %vm460_vm0, %v3464_v32, 0.0 }
 0xc95   : > { %v7117_v11 = vsub.f32 %v7027_v40, %v3433_v21  ;;  %v3496_v16 = vsel %vm460_vm0, %v3462_v62, 0.0  ;;  %v3467_v40 = vmul.f32 %v7114_v39, %v7114_v39 }
 0xc96   : > { %3497 = vadd.xlane.f32.xlu1 %v3496_v16  ;;  %v3414_v63 = vpop.xlane.xlu1 %3413 }
 0xc97   : > { %v3434_v14 = vmul.f32 0.03125, %v3414_v63  ;;  %v3465_v10 = vmul.f32 %v7117_v11, %v7117_v11  ;;  %v3511_v50 = vsel %vm460_vm0, %v3467_v40, 0.0 }
 0xc99   : > { %v7125_v60 = vsub.f32 %v7034_v13, %v3434_v14  ;;  %v3505_v25 = vsel %vm460_vm0, %v3465_v10, 0.0 }
 0xc9a   : > { %3506 = vadd.xlane.f32.xlu0 %v3505_v25  ;;  %3503 = vadd.xlane.f32.xlu1 %v3502_v8  ;;  %v3420_v34 = vpop.xlane.xlu1 %3419 }
 0xc9b   : > { %v3436_v31 = vmul.f32 0.03125, %v3420_v34  ;;  %v3466_v53 = vmul.f32 %v7125_v60, %v7125_v60 }
 0xc9d   : > { %v7137_v13 = vsub.f32 %v7039_v17, %v3436_v31  ;;  %v3508_v15 = vsel %vm460_vm0, %v3466_v53, 0.0 }
 0xc9e   : > { %3512 = vadd.xlane.f32.xlu0 %v3511_v50  ;;  %3509 = vadd.xlane.f32.xlu1 %v3508_v15 }
 0xc9f   : > { %v3468_v41 = vmul.f32 %v7137_v13, %v7137_v13 }
 0xca1   : > { %v3514_v29 = vsel %vm460_vm0, %v3468_v41, 0.0 }
 0xca2   : > { %3515 = vadd.xlane.f32.xlu1 %v3514_v29 }
 0xcff   : > { %v3471_v17 = vpop.xlane.xlu0 %3470 }
 0xd00   : > { %v3517_v45 = vmul.f32 0.03125, %v3471_v17 }
 0xd02   : > { %v3533_v61 = vadd.f32 1e-05, %v3517_v45 }
 0xd03   : > { %v3477_v47 = vpop.xlane.xlu0 %3476 }
 0xd04   : > { %v3519_v36 = vmul.f32 0.03125, %v3477_v47  ;;  %5301 = vrsqrt.f32 %v3533_v61 }
 0xd06   : > { %v3535_v55 = vadd.f32 1e-05, %v3519_v36 }
 0xd07   : > { %v3474_v18 = vpop.xlane.xlu1 %3473 }
 0xd08   : > { %v3518_v24 = vmul.f32 0.03125, %v3474_v18  ;;  %5303 = vrsqrt.f32 %v3535_v55 }
 0xd0a   : > { %v3534_v52 = vadd.f32 1e-05, %v3518_v24 }
 0xd0b   : > { %v3483_v12 = vpop.xlane.xlu0 %3482  ;;  %v3480_v0 = vpop.xlane.xlu1 %3479 }
 0xd0c   : > { %5305 = vrsqrt.f32 %v3534_v52  ;;  %v3521_v30 = vmul.f32 0.03125, %v3483_v12  ;;  %v3520_v27 = vmul.f32 0.03125, %v3480_v0 }
 0xd0e   : > { %v3537_v20 = vadd.f32 1e-05, %v3521_v30  ;;  %v3536_v48 = vadd.f32 1e-05, %v3520_v27  ;;  %v5302_v38 = vpop.eup %5301 }
 0xd0f   : > { %v3489_v58 = vpop.xlane.xlu0 %3488  ;;  %v3565_v59 = vmul.f32 %v5302_v38, %v7049_v46  ;;  %v7158_v46 = vld [vmem:[%s7405_s4] ss:$0 sm:$0xff] }
 0xd10   : > { %5307 = vrsqrt.f32 %v3537_v20  ;;  %v3523_v51 = vmul.f32 0.03125, %v3489_v58 }
 0xd11   : > { %5309 = vrsqrt.f32 %v3536_v48  ;;  %v3587_v57 = vmul.f32 %v7151_v1, %v3565_v59 }
 0xd12   : > { %v3539_v43 = vadd.f32 1e-05, %v3523_v51  ;;  %v5304_v44 = vpop.eup %5303 }
 0xd13   : > { %v3486_v7 = vpop.xlane.xlu1 %3485  ;;  %v3567_v21 = vmul.f32 %v5304_v44, %v7046_v23 }
 0xd14   : > { %v3522_v54 = vmul.f32 0.03125, %v3486_v7  ;;  %5311 = vrsqrt.f32 %v3539_v43 }
 0xd15   : > { %v3589_v8 = vmul.f32 %v7151_v1, %v3567_v21 }
 0xd16   : > { %v5306_v56 = vpop.eup %5305  ;;  %v3538_v19 = vadd.f32 1e-05, %v3522_v54 }
 0xd17   : > { %v3566_v22 = vmul.f32 %v5306_v56, %v7060_v28  ;;  %v3492_v4 = vpop.xlane.xlu1 %3491  ;;  %v3609_v28 = vadd.f32 %v7158_v46, %v3587_v57  ;;  %v3611_v41 = vadd.f32 %v7158_v46, %v3589_v8 }
 0xd18   : > { %5313 = vrsqrt.f32 %v3538_v19  ;;  %v3524_v62 = vmul.f32 0.03125, %v3492_v4 }
 0xd19   : > { %v3588_v16 = vmul.f32 %v7151_v1, %v3566_v22 }
 0xd1a   : > { %v5308_v32 = vpop.eup %5307  ;;  %v3540_v63 = vadd.f32 1e-05, %v3524_v62 }
 0xd1b   : > { %v5310_v14 = vpop.eup %5309  ;;  %v3495_v10 = vpop.xlane.xlu0 %3494  ;;  %v3610_v25 = vadd.f32 %v7158_v46, %v3588_v16  ;;  %v3569_v23 = vmul.f32 %v5308_v32, %v7069_v6 }
 0xd1c   : > { %v3568_v40 = vmul.f32 %v5310_v14, %v7057_v37  ;;  %5315 = vrsqrt.f32 %v3540_v63  ;;  %v3525_v34 = vmul.f32 0.03125, %v3495_v10 }
 0xd1d   : > { %v3625_v31 = vpack.c.bf16 %v3610_v25, %v3609_v28  ;;  %v3591_v45 = vmul.f32 %v7151_v1, %v3569_v23 }
 0xd1e   : > { %v3590_v53 = vmul.f32 %v7151_v1, %v3568_v40  ;;  %v3541_v26 = vadd.f32 1e-05, %v3525_v34  ;;  %v5312_v15 = vpop.eup %5311 }
 0xd1f   : > { %v3501_v50 = vpop.xlane.xlu0 %3500  ;;  %4849 = vmatprep.mubr.msk.bf16.mxu0 %vm460_vm0, %v3625_v31  ;;  %v3571_v61 = vmul.f32 %v5312_v15, %v7066_v42  ;;  %v3613_v12 = vadd.f32 %v7158_v46, %v3591_v45 }
 0xd20   : > { %v3612_v3 = vadd.f32 %v7158_v46, %v3590_v53  ;;  %v3527_v29 = vmul.f32 0.03125, %v3501_v50  ;;  %5317 = vrsqrt.f32 %v3541_v26 }
 0xd22   : > { %v5314_v17 = vpop.eup %5313  ;;  %v3626_v37 = vpack.c.bf16 %v3612_v3, %v3611_v41  ;;  %v3543_v47 = vadd.f32 1e-05, %v3527_v29 }
 0xd23   : > { %v3570_v6 = vmul.f32 %v5314_v17, %v7084_v35  ;;  %v3498_v36 = vpop.xlane.xlu1 %3497  ;;  %v3593_v35 = vmul.f32 %v7151_v1, %v3571_v61 }
 0xd24   : > { %4850 = vmatmul.mubr.msk.bf16.vlgmr.msra.gmra.mrb[80].mxu0 %vm460_vm0, %v3626_v37  ;;  %v3526_v55 = vmul.f32 0.03125, %v3498_v36  ;;  %5319 = vrsqrt.f32 %v3543_v47 }
 0xd25   : > { %v3592_v18 = vmul.f32 %v7151_v1, %v3570_v6 }
 0xd26   : > { %v5316_v24 = vpop.eup %5315  ;;  %v3542_v52 = vadd.f32 1e-05, %v3526_v55 }
 0xd27   : > { %v3572_v0 = vmul.f32 %v5316_v24, %v7081_v9  ;;  %v3507_v30 = vpop.xlane.xlu0 %3506  ;;  %v3504_v27 = vpop.xlane.xlu1 %3503  ;;  %v3614_v42 = vadd.f32 %v7158_v46, %v3592_v18  ;;  %v3615_v9 = vadd.f32 %v7158_v46, %v3593_v35 }
 0xd28   : > { %5321 = vrsqrt.f32 %v3542_v52  ;;  %v3529_v20 = vmul.f32 0.03125, %v3507_v30  ;;  %v3528_v48 = vmul.f32 0.03125, %v3504_v27  ;;  %v5008_v52 = vld [vmem:[%s7412_s11 + $0x18] sm:$0xff]   ;;  %v5011_v30 = vld [vmem:[%s7412_s11 + $0x30] sm:$0xff]  }
 0xd29   : > { %v3627_v58 = vpack.c.bf16 %v3614_v42, %v3613_v12  ;;  %v3594_v38 = vmul.f32 %v7151_v1, %v3572_v0  ;;  %v5009_v12 = vld [vmem:[%s7412_s11 + $0x20] sm:$0xff]   ;;  %v5010_v0 = vld [vmem:[%s7412_s11 + $0x28] sm:$0xff]   ;;  %v5012_v27 = vld [vmem:[%s7412_s11 + $0x38] sm:$0xff]  }
 0xd2a   : > { %v3545_v51 = vadd.f32 1e-05, %v3529_v20  ;;  %v3544_v43 = vadd.f32 1e-05, %v3528_v48  ;;  %v5318_v44 = vpop.eup %5317  ;;  %v7240_v42 = vld [vmem:[%s7411_s10] ss:$0 sm:$0xff] }
 0xd2b   : > { %v3513_v59 = vpop.xlane.xlu0 %3512  ;;  %4853 = vmatprep.mubr.msk.bf16.mxu0 %vm460_vm0, %v3627_v58  ;;  %v3510_v7 = vpop.xlane.xlu1 %3509  ;;  %v3616_v54 = vadd.f32 %v7158_v46, %v3594_v38  ;;  %v3573_v21 = vmul.f32 %v5318_v44, %v7096_v2 }
 0xd2c   : > { %5323 = vrsqrt.f32 %v3545_v51  ;;  %v3531_v56 = vmul.f32 0.03125, %v3513_v59  ;;  %v3530_v19 = vmul.f32 0.03125, %v3510_v7 }
 0xd2d   : > { %5325 = vrsqrt.f32 %v3544_v43  ;;  %v3628_v22 = vpack.c.bf16 %v3616_v54, %v3615_v9  ;;  %v3595_v28 = vmul.f32 %v7151_v1, %v3573_v21 }
 0xd2e   : > { %v3547_v4 = vadd.f32 1e-05, %v3531_v56  ;;  %v3546_v57 = vadd.f32 1e-05, %v3530_v19  ;;  %v5320_v32 = vpop.eup %5319 }
 0xd2f   : > { %4854 = vmatmul.mubr.msk.bf16.gmra.mrb[84].mxu0 %vm460_vm0, %v3628_v22  ;;  %v3516_v62 = vpop.xlane.xlu1 %3515  ;;  %v3575_v25 = vmul.f32 %v5320_v32, %v7093_v33  ;;  %v3617_v34 = vadd.f32 %v7158_v46, %v3595_v28 }
 0xd30   : > { %5327 = vrsqrt.f32 %v3547_v4  ;;  %v3532_v16 = vmul.f32 0.03125, %v3516_v62 }
 0xd31   : > { %5329 = vrsqrt.f32 %v3546_v57  ;;  %v3597_v26 = vmul.f32 %v7151_v1, %v3575_v25 }
 0xd32   : > { %v5322_v63 = vpop.eup %5321  ;;  %v3548_v14 = vadd.f32 1e-05, %v3532_v16 }
 0xd33   : > { %v3574_v10 = vmul.f32 %v5322_v63, %v7108_v49  ;;  %v3619_v29 = vadd.f32 %v7158_v46, %v3597_v26 }
 0xd34   : > { %5331 = vrsqrt.f32 %v3548_v14 }
 0xd35   : > { %v3596_v8 = vmul.f32 %v7151_v1, %v3574_v10 }
 0xd36   : > { %v5324_v40 = vpop.eup %5323 }
 0xd37   : > { %v5326_v2 = vpop.eup %5325  ;;  %v3618_v31 = vadd.f32 %v7158_v46, %v3596_v8  ;;  %v3577_v23 = vmul.f32 %v5324_v40, %v7117_v11 }
 0xd38   : > { %v3576_v53 = vmul.f32 %v5326_v2, %v7105_v5 }
 0xd39   : > { %v3629_v49 = vpack.c.bf16 %v3618_v31, %v3617_v34  ;;  %v3599_v11 = vmul.f32 %v7151_v1, %v3577_v23 }
 0xd3a   : > { %v5328_v50 = vpop.eup %5327  ;;  %v3598_v15 = vmul.f32 %v7151_v1, %v3576_v53 }
 0xd3b   : > { %v5330_v33 = vpop.eup %5329  ;;  %v3579_v41 = vmul.f32 %v5328_v50, %v7114_v39  ;;  %4857 = vmatprep.mubr.msk.bf16.mxu0 %vm460_vm0, %v3629_v49  ;;  %v3621_v39 = vadd.f32 %v7158_v46, %v3599_v11 }
 0xd3c   : > { %v3578_v3 = vmul.f32 %v5330_v33, %v7125_v60  ;;  %v3620_v17 = vadd.f32 %v7158_v46, %v3598_v15 }
 0xd3d   : > { %v3601_v6 = vmul.f32 %v7151_v1, %v3579_v41 }
 0xd3e   : > { %v5332_v5 = vpop.eup %5331  ;;  %v3630_v37 = vpack.c.bf16 %v3620_v17, %v3619_v29  ;;  %v3600_v45 = vmul.f32 %v7151_v1, %v3578_v3 }
 0xd3f   : > { %v3580_v61 = vmul.f32 %v5332_v5, %v7137_v13  ;;  %v3623_v55 = vadd.f32 %v7158_v46, %v3601_v6  ;;  %v5005_v13 = vld [vmem:[%s7412_s11] sm:$0xff]  }
 0xd40   : > { %4858 = vmatmul.mubr.msk.bf16.gmra.mrb[88].mxu0 %vm460_vm0, %v3630_v37  ;;  %v3622_v60 = vadd.f32 %v7158_v46, %v3600_v45  ;;  %4865 = vmatprep.subr.bf16.mxu0 %v5005_v13 }
 0xd41   : > { %v3602_v47 = vmul.f32 %v7151_v1, %v3580_v61  ;;  %4866 = vmatpush3.bf16.msra.mxu0 %v5005_v13  ;;  %v5006_v1 = vld [vmem:[%s7412_s11 + $0x8] sm:$0xff]  }
 0xd42   : > { %v3631_v36 = vpack.c.bf16 %v3622_v60, %v3621_v39  ;;  %4867 = vmatprep.subr.bf16.mxu0 %v5006_v1 }
 0xd43   : > { %v3624_v18 = vadd.f32 %v7158_v46, %v3602_v47  ;;  %v5007_v46 = vld [vmem:[%s7412_s11 + $0x10] sm:$0xff]  }
 0xd44   : > { %4861 = vmatprep.mubr.msk.bf16.mxu0 %vm460_vm0, %v3631_v36 }
 0xd45   : > { %v3632_v24 = vpack.c.bf16 %v3624_v18, %v3623_v55  ;;  %4868 = vmatpush3.bf16.msra.mxu0 %v5006_v1 }
 0xd46   : > { %4869 = vmatprep.subr.bf16.mxu0 %v5007_v46 }
 0xd48   : > { %4862 = vmatmul.mubr.msk.bf16.gmra.mrb[92].mxu0 %vm460_vm0, %v3632_v24 }
 0xd49   : > { %4870 = vmatpush3.bf16.msra.mxu0 %v5007_v46 }
 0xd4a   : > { %4871 = vmatprep.subr.bf16.mxu0 %v5008_v52 }
 0xd4d   : > { %4872 = vmatpush3.bf16.msra.mxu0 %v5008_v52 }
 0xd4e   : > { %4873 = vmatprep.subr.bf16.mxu0 %v5009_v12 }
 0xd51   : > { %4874 = vmatpush3.bf16.msra.mxu0 %v5009_v12 }
 0xd52   : > { %4875 = vmatprep.subr.bf16.mxu0 %v5010_v0 }
 0xd55   : > { %4876 = vmatpush3.bf16.msra.mxu0 %v5010_v0 }
 0xd56   : > { %4877 = vmatprep.subr.bf16.mxu0 %v5011_v30 }
 0xd59   : > { %4878 = vmatpush3.bf16.msra.mxu0 %v5011_v30 }
 0xd5a   : > { %4879 = vmatprep.subr.bf16.mxu0 %v5012_v27 }
 0xd5d   : > { %4880 = vmatpush3.bf16.msra.mxu0 %v5012_v27 }
 0xdf7   : > { %v4851_v35 = vpop.f32.mrb[80].mxu0 }
 0xdf8   : > { %v7243_v20 = vadd.f32 %v4851_v35, %v7240_v42  ;;  %v3714_v48 = vpop.f32.mrb[81].mxu0 }
 0xdf9   : > { %v7246_v58 = vadd.f32 %v7240_v42, %v3714_v48  ;;  %v4852_v38 = vpop.f32.mrb[82].mxu0 }
 0xdfa   : > { %v4270_v51 = vmul.f32 -1.702, %v7243_v20  ;;  %v7250_v43 = vadd.f32 %v4852_v38, %v7240_v42  ;;  %v3717_v59 = vpop.f32.mrb[83].mxu0 }
 0xdfb   : > { %v4268_v7 = vmul.f32 -1.702, %v7246_v58  ;;  %v7254_v9 = vadd.f32 %v7240_v42, %v3717_v59 }
 0xdfc   : > { %v3813_v54 = vmul.f32 1.442695, %v4270_v51  ;;  %v4271_v44 = vmul.f32 -1.702, %v7250_v43 }
 0xdfd   : > { %v3809_v56 = vmul.f32 1.442695, %v4268_v7  ;;  %v4269_v19 = vmul.f32 -1.702, %v7254_v9 }
 0xdfe   : > { %5333 = vpow2.f32 %v3813_v54  ;;  %v3815_v22 = vmul.f32 1.442695, %v4271_v44 }
 0xdff   : > { %5335 = vpow2.f32 %v3809_v56  ;;  %v3811_v4 = vmul.f32 1.442695, %v4269_v19 }
 0xe00   : > { %5337 = vpow2.f32 %v3815_v22 }
 0xe01   : > { %5339 = vpow2.f32 %v3811_v4 }
 0xe02   : > { %v4855_v57 = vpop.f32.mrb[84].mxu0 }
 0xe03   : > { %v7259_v21 = vadd.f32 %v4855_v57, %v7240_v42  ;;  %v3730_v62 = vpop.f32.mrb[85].mxu0 }
 0xe04   : > { %v7262_v16 = vadd.f32 %v7240_v42, %v3730_v62  ;;  %v4856_v32 = vpop.f32.mrb[86].mxu0 }
 0xe05   : > { %v4274_v63 = vmul.f32 -1.702, %v7259_v21  ;;  %v7266_v14 = vadd.f32 %v4856_v32, %v7240_v42  ;;  %v3733_v10 = vpop.f32.mrb[87].mxu0 }
 0xe06   : > { %v4272_v28 = vmul.f32 -1.702, %v7262_v16  ;;  %v7270_v25 = vadd.f32 %v7240_v42, %v3733_v10 }
 0xe07   : > { %v3821_v8 = vmul.f32 1.442695, %v4274_v63  ;;  %v4275_v40 = vmul.f32 -1.702, %v7266_v14 }
 0xe08   : > { %v5334_v2 = vpop.eup %5333  ;;  %v3817_v34 = vmul.f32 1.442695, %v4272_v28  ;;  %v4273_v31 = vmul.f32 -1.702, %v7270_v25 }
 0xe09   : > { %v5336_v23 = vpop.eup %5335  ;;  %v3843_v53 = vadd.f32 1.0, %v5334_v2  ;;  %5341 = vpow2.f32 %v3821_v8  ;;  %v3823_v33 = vmul.f32 1.442695, %v4275_v40 }
 0xe0a   : > { %v5338_v26 = vpop.eup %5337  ;;  %v3841_v49 = vadd.f32 1.0, %v5336_v23  ;;  %5343 = vpow2.f32 %v3817_v34  ;;  %v3819_v3 = vmul.f32 1.442695, %v4273_v31 }
 0xe0b   : > { %v5340_v50 = vpop.eup %5339  ;;  %5345 = vrcp.f32 %v3843_v53  ;;  %v3844_v15 = vadd.f32 1.0, %v5338_v26 }
 0xe0c   : > { %5347 = vrcp.f32 %v3841_v49  ;;  %v3842_v41 = vadd.f32 1.0, %v5340_v50 }
 0xe0d   : > { %5349 = vrcp.f32 %v3844_v15 }
 0xe0e   : > { %5351 = vrcp.f32 %v3842_v41 }
 0xe0f   : > { %5353 = vpow2.f32 %v3823_v33 }
 0xe10   : > { %5355 = vpow2.f32 %v3819_v3 }
 0xe13   : > { %v5342_v29 = vpop.eup %5341  ;;  %v4859_v17 = vpop.f32.mrb[88].mxu0 }
 0xe14   : > { %v5344_v11 = vpop.eup %5343  ;;  %v3847_v5 = vadd.f32 1.0, %v5342_v29  ;;  %v7275_v37 = vadd.f32 %v4859_v17, %v7240_v42  ;;  %v3746_v45 = vpop.f32.mrb[89].mxu0 }
 0xe15   : > { %v5346_v61 = vpop.eup %5345  ;;  %v3845_v6 = vadd.f32 1.0, %v5344_v11  ;;  %v7278_v39 = vadd.f32 %v7240_v42, %v3746_v45  ;;  %v4860_v60 = vpop.f32.mrb[90].mxu0 }
 0xe16   : > { %v5348_v47 = vpop.eup %5347  ;;  %v4278_v36 = vmul.f32 -1.702, %v7275_v37  ;;  %v7282_v55 = vadd.f32 %v4860_v60, %v7240_v42  ;;  %v3749_v18 = vpop.f32.mrb[91].mxu0  ;;  %v3891_v13 = vmul.f32 %v5346_v61, %v7243_v20  ;;  %5357 = vrcp.f32 %v3847_v5 }
 0xe17   : > { %v5350_v24 = vpop.eup %5349  ;;  %v4276_v1 = vmul.f32 -1.702, %v7278_v39  ;;  %v7287_v46 = vadd.f32 %v7240_v42, %v3749_v18  ;;  %v3889_v12 = vmul.f32 %v5348_v47, %v7246_v58  ;;  %5359 = vrcp.f32 %v3845_v6 }
 0xe18   : > { %v5352_v52 = vpop.eup %5351  ;;  %v3892_v0 = vmul.f32 %v5350_v24, %v7250_v43  ;;  %v3829_v30 = vmul.f32 1.442695, %v4278_v36  ;;  %v4279_v27 = vmul.f32 -1.702, %v7282_v55 }
 0xe19   : > { %v5354_v35 = vpop.eup %5353  ;;  %v3890_v48 = vmul.f32 %v5352_v52, %v7254_v9  ;;  %v3825_v38 = vmul.f32 1.442695, %v4276_v1  ;;  %v4277_v20 = vmul.f32 -1.702, %v7287_v46 }
 0xe1a   : > { %v5356_v51 = vpop.eup %5355  ;;  %v3906_v59 = vpack.c.bf16 %v3892_v0, %v3891_v13  ;;  %v3848_v7 = vadd.f32 1.0, %v5354_v35  ;;  %5361 = vpow2.f32 %v3829_v30  ;;  %v3831_v54 = vmul.f32 1.442695, %v4279_v27 }
 0xe1b   : > { %v3846_v44 = vadd.f32 1.0, %v5356_v51  ;;  %5363 = vpow2.f32 %v3825_v38  ;;  %v3827_v58 = vmul.f32 1.442695, %v4277_v20  ;;  %v4863_v56 = vpop.f32.mrb[92].mxu0  ;;  %v3905_v43 = vpack.c.bf16 %v3890_v48, %v3889_v12 }
 0xe1c   : > { %5365 = vrcp.f32 %v3848_v7  ;;  %v7295_v19 = vadd.f32 %v4863_v56, %v7240_v42  ;;  %v3762_v22 = vpop.f32.mrb[93].mxu0 }
 0xe1d   : > { %5367 = vrcp.f32 %v3846_v44  ;;  %v7298_v9 = vadd.f32 %v7240_v42, %v3762_v22  ;;  %v4864_v4 = vpop.f32.mrb[94].mxu0  ;;  %4881 = vmatprep.mubr.bf16.mxu0 %v3905_v43 }
 0xe1e   : > { %5369 = vpow2.f32 %v3831_v54  ;;  %v4282_v57 = vmul.f32 -1.702, %v7295_v19  ;;  %v7302_v62 = vadd.f32 %v4864_v4, %v7240_v42  ;;  %v3765_v32 = vpop.f32.mrb[95].mxu0  ;;  %4882 = vmatmul.mubr.bf16.vlgmr.msra.gmra.mrb[96].mxu0 %v3906_v59  ;;  %v5413_v4 = vld [vmem:[%s5535_s30 + $0x10] sm:$0xff] }
 0xe1f   : > { %5371 = vpow2.f32 %v3827_v58  ;;  %v4280_v63 = vmul.f32 -1.702, %v7298_v9  ;;  %v7306_v10 = vadd.f32 %v7240_v42, %v3765_v32  ;;  %v7325_v58 = vld [vmem:[%s7413_s12] ss:$0 sm:$0xff] }
 0xe20   : > { %v3837_v28 = vmul.f32 1.442695, %v4282_v57  ;;  %v4283_v8 = vmul.f32 -1.702, %v7302_v62  ;;  %v5358_v40 = vpop.eup %5357 }
 0xe21   : > { %v3833_v2 = vmul.f32 1.442695, %v4280_v63  ;;  %v4281_v34 = vmul.f32 -1.702, %v7306_v10  ;;  %v5360_v23 = vpop.eup %5359  ;;  %v3895_v41 = vmul.f32 %v5358_v40, %v7259_v21  ;;  %v5414_v63 = vld [vmem:[%s5535_s30] sm:$0xff] }
 0xe22   : > { %5373 = vpow2.f32 %v3837_v28  ;;  %v3839_v31 = vmul.f32 1.442695, %v4283_v8  ;;  %v3893_v17 = vmul.f32 %v5360_v23, %v7262_v16  ;;  %v5415_v8 = vld [vmem:[%s5535_s30 + $0x18] sm:$0xff] }
 0xe23   : > { %5375 = vpow2.f32 %v3833_v2  ;;  %v3835_v53 = vmul.f32 1.442695, %v4281_v34  ;;  %v5416_v2 = vld [vmem:[%s5535_s30 + $0x8] sm:$0xff] }
 0xe24   : > { %v5362_v26 = vpop.eup %5361  ;;  %5377 = vpow2.f32 %v3839_v31 }
 0xe25   : > { %v5364_v49 = vpop.eup %5363  ;;  %v3851_v50 = vadd.f32 1.0, %v5362_v26  ;;  %5379 = vpow2.f32 %v3835_v53 }
 0xe26   : > { %v5366_v15 = vpop.eup %5365  ;;  %v3849_v42 = vadd.f32 1.0, %v5364_v49 }
 0xe27   : > { %v5368_v33 = vpop.eup %5367  ;;  %v3896_v3 = vmul.f32 %v5366_v15, %v7266_v14  ;;  %5381 = vrcp.f32 %v3851_v50  ;;  %v5417_v50 = vld [vmem:[%s5535_s30 + $0x30] sm:$0xff] }
 0xe28   : > { %v5370_v29 = vpop.eup %5369  ;;  %v3894_v11 = vmul.f32 %v5368_v33, %v7270_v25  ;;  %5383 = vrcp.f32 %v3849_v42 }
 0xe29   : > { %v5372_v5 = vpop.eup %5371  ;;  %v3852_v45 = vadd.f32 1.0, %v5370_v29  ;;  %v3908_v61 = vpack.c.bf16 %v3896_v3, %v3895_v41  ;;  %v5418_v41 = vld [vmem:[%s5535_s30 + $0x20] sm:$0xff] }
 0xe2a   : > { %v3850_v6 = vadd.f32 1.0, %v5372_v5  ;;  %v3907_v60 = vpack.c.bf16 %v3894_v11, %v3893_v17  ;;  %v5419_v17 = vld [vmem:[%s5535_s30 + $0x38] sm:$0xff]  ;;  %v5420_v5 = vld [vmem:[%s5535_s30 + $0x28] sm:$0xff] }
 0xe2b   : > { %5385 = vrcp.f32 %v3852_v45 }
 0xe2c   : > { %v5374_v47 = vpop.eup %5373  ;;  %5387 = vrcp.f32 %v3850_v6  ;;  %4885 = vmatprep.mubr.bf16.mxu0 %v3907_v60 }
 0xe2d   : > { %v5376_v36 = vpop.eup %5375  ;;  %v3855_v21 = vadd.f32 1.0, %v5374_v47  ;;  %4886 = vmatmul.mubr.bf16.gmra.mrb[100].mxu0 %v3908_v61 }
 0xe2e   : > { %v5378_v14 = vpop.eup %5377  ;;  %v3853_v18 = vadd.f32 1.0, %v5376_v36 }
 0xe2f   : > { %v5380_v24 = vpop.eup %5379  ;;  %5389 = vrcp.f32 %v3855_v21  ;;  %v3856_v16 = vadd.f32 1.0, %v5378_v14  ;;  %v5421_v21 = vld [vmem:[%s5535_s30 + $0x50] sm:$0xff] }
 0xe30   : > { %5391 = vrcp.f32 %v3853_v18  ;;  %v3854_v25 = vadd.f32 1.0, %v5380_v24 }
 0xe31   : > { %5393 = vrcp.f32 %v3856_v16  ;;  %v5382_v13 = vpop.eup %5381  ;;  %v5422_v16 = vld [vmem:[%s5535_s30 + $0x40] sm:$0xff] }
 0xe32   : > { %5395 = vrcp.f32 %v3854_v25  ;;  %v5384_v1 = vpop.eup %5383  ;;  %v3899_v0 = vmul.f32 %v5382_v13, %v7275_v37 }
 0xe33   : > { %v3897_v27 = vmul.f32 %v5384_v1, %v7278_v39  ;;  %v5423_v1 = vld [vmem:[%s5535_s30 + $0x58] sm:$0xff] }
 0xe35   : > { %v5386_v52 = vpop.eup %5385 }
 0xe36   : > { %v5388_v12 = vpop.eup %5387  ;;  %v3900_v30 = vmul.f32 %v5386_v52, %v7282_v55 }
 0xe37   : > { %v3898_v35 = vmul.f32 %v5388_v12, %v7287_v46  ;;  %v5424_v12 = vld [vmem:[%s5535_s30 + $0x48] sm:$0xff] }
 0xe38   : > { %v3910_v48 = vpack.c.bf16 %v3900_v30, %v3899_v0 }
 0xe39   : > { %v5390_v38 = vpop.eup %5389  ;;  %v3909_v20 = vpack.c.bf16 %v3898_v35, %v3897_v27 }
 0xe3a   : > { %v5392_v51 = vpop.eup %5391  ;;  %v3903_v54 = vmul.f32 %v5390_v38, %v7295_v19 }
 0xe3b   : > { %v5394_v59 = vpop.eup %5393  ;;  %4889 = vmatprep.mubr.bf16.mxu0 %v3909_v20  ;;  %v3901_v37 = vmul.f32 %v5392_v51, %v7298_v9  ;;  %v5425_v20 = vld [vmem:[%s5535_s30 + $0x70] sm:$0xff] }
 0xe3c   : > { %v5396_v7 = vpop.eup %5395  ;;  %v3904_v44 = vmul.f32 %v5394_v59, %v7302_v62  ;;  %4890 = vmatmul.mubr.bf16.gmra.mrb[104].mxu0 %v3910_v48 }
 0xe3d   : > { %v3902_v39 = vmul.f32 %v5396_v7, %v7306_v10 }
 0xe3e   : > { %v3912_v55 = vpack.c.bf16 %v3904_v44, %v3903_v54  ;;  %v5426_v54 = vld [vmem:[%s5535_s30 + $0x60] sm:$0xff] }
 0xe3f   : > { %v3911_v46 = vpack.c.bf16 %v3902_v39, %v3901_v37  ;;  %v5427_v39 = vld [vmem:[%s5535_s30 + $0x78] sm:$0xff] }
 0xe41   : > { %4893 = vmatprep.mubr.bf16.mxu0 %v3911_v46  ;;  %v5428_v46 = vld [vmem:[%s5535_s30 + $0x68] sm:$0xff] }
 0xe44   : > { %4894 = vmatmul.mubr.bf16.gmra.mrb[108].mxu0 %v3912_v55 }
 0xef1   : > { %v4883_v56 = vpop.f32.mrb[96].mxu0 }
 0xef2   : > { %v4027_v43 = vadd.f32 %v4883_v56, %v7325_v58  ;;  %v4018_v19 = vpop.f32.mrb[97].mxu0 }
 0xef3   : > { %v4019_v22 = vadd.f32 %v7325_v58, %v4018_v19  ;;  %v4884_v9 = vpop.f32.mrb[98].mxu0 }
 0xef4   : > { %v4083_v57 = vadd.f32 %v5413_v4, %v4027_v43  ;;  %v4030_v62 = vadd.f32 %v4884_v9, %v7325_v58  ;;  %v4021_v32 = vpop.f32.mrb[99].mxu0 }
 0xef5   : > { %v4081_v10 = vadd.f32 %v5414_v63, %v4019_v22  ;;  %v4022_v28 = vadd.f32 %v7325_v58, %v4021_v32 }
 0xef6   : > { %4099 = vst.msk [vmem:[%s7333_s23 + $0x10] sm:$0xff] %vm460_vm0, %v4083_v57  ;;  %v4084_v40 = vadd.f32 %v5415_v8, %v4030_v62 }
 0xef7   : > { %4097 = vst.msk [vmem:[%s7333_s23] sm:$0xff] %vm460_vm0, %v4081_v10  ;;  %v4082_v34 = vadd.f32 %v5416_v2, %v4022_v28 }
 0xef8   : > { %4100 = vst.msk [vmem:[%s7333_s23 + $0x18] sm:$0xff] %vm460_vm0, %v4084_v40 }
 0xef9   : > { %4098 = vst.msk [vmem:[%s7333_s23 + $0x8] sm:$0xff] %vm460_vm0, %v4082_v34 }
 0xf00   : > { %v4887_v31 = vpop.f32.mrb[100].mxu0 }
 0xf01   : > { %v4043_v23 = vadd.f32 %v4887_v31, %v7325_v58  ;;  %v4034_v53 = vpop.f32.mrb[101].mxu0 }
 0xf02   : > { %v4035_v26 = vadd.f32 %v7325_v58, %v4034_v53  ;;  %v4888_v49 = vpop.f32.mrb[102].mxu0 }
 0xf03   : > { %v4087_v15 = vadd.f32 %v5417_v50, %v4043_v23  ;;  %v4046_v42 = vadd.f32 %v4888_v49, %v7325_v58  ;;  %v4037_v33 = vpop.f32.mrb[103].mxu0 }
 0xf04   : > { %v4085_v3 = vadd.f32 %v5418_v41, %v4035_v26  ;;  %v4038_v29 = vadd.f32 %v7325_v58, %v4037_v33 }
 0xf05   : > { %4103 = vst.msk [vmem:[%s7333_s23 + $0x30] sm:$0xff] %vm460_vm0, %v4087_v15  ;;  %v4088_v11 = vadd.f32 %v5419_v17, %v4046_v42 }
 0xf06   : > { %4101 = vst.msk [vmem:[%s7333_s23 + $0x20] sm:$0xff] %vm460_vm0, %v4085_v3  ;;  %v4086_v45 = vadd.f32 %v5420_v5, %v4038_v29 }
 0xf07   : > { %4104 = vst.msk [vmem:[%s7333_s23 + $0x38] sm:$0xff] %vm460_vm0, %v4088_v11 }
 0xf08   : > { %4102 = vst.msk [vmem:[%s7333_s23 + $0x28] sm:$0xff] %vm460_vm0, %v4086_v45 }
 0xf0f   : > { %v4891_v61 = vpop.f32.mrb[104].mxu0 }
 0xf10   : > { %v4059_v6 = vadd.f32 %v4891_v61, %v7325_v58  ;;  %v4050_v60 = vpop.f32.mrb[105].mxu0 }
 0xf11   : > { %v4051_v47 = vadd.f32 %v7325_v58, %v4050_v60  ;;  %v4892_v36 = vpop.f32.mrb[106].mxu0 }
 0xf12   : > { %v4091_v14 = vadd.f32 %v5421_v21, %v4059_v6  ;;  %v4062_v18 = vadd.f32 %v4892_v36, %v7325_v58  ;;  %v4053_v24 = vpop.f32.mrb[107].mxu0 }
 0xf13   : > { %v4089_v25 = vadd.f32 %v5422_v16, %v4051_v47  ;;  %v4054_v13 = vadd.f32 %v7325_v58, %v4053_v24 }
 0xf14   : > { %4107 = vst.msk [vmem:[%s7333_s23 + $0x50] sm:$0xff] %vm460_vm0, %v4091_v14  ;;  %v4092_v52 = vadd.f32 %v5423_v1, %v4062_v18 }
 0xf15   : > { %4105 = vst.msk [vmem:[%s7333_s23 + $0x40] sm:$0xff] %vm460_vm0, %v4089_v25  ;;  %v4090_v0 = vadd.f32 %v5424_v12, %v4054_v13 }
 0xf16   : > { %4108 = vst.msk [vmem:[%s7333_s23 + $0x58] sm:$0xff] %vm460_vm0, %v4092_v52 }
 0xf17   : > { %4106 = vst.msk [vmem:[%s7333_s23 + $0x48] sm:$0xff] %vm460_vm0, %v4090_v0  ;;  %v4895_v30 = vpop.f32.mrb[108].mxu0 }
 0xf18   : > { %v4075_v27 = vadd.f32 %v4895_v30, %v7325_v58  ;;  %v4066_v35 = vpop.f32.mrb[109].mxu0 }
 0xf19   : > { %v4067_v48 = vadd.f32 %v7325_v58, %v4066_v35  ;;  %v4896_v38 = vpop.f32.mrb[110].mxu0 }
 0xf1a   : > { %v4095_v51 = vadd.f32 %v5425_v20, %v4075_v27  ;;  %v4078_v59 = vadd.f32 %v4896_v38, %v7325_v58  ;;  %v4069_v7 = vpop.f32.mrb[111].mxu0 }
 0xf1b   : > { %v4093_v44 = vadd.f32 %v5426_v54, %v4067_v48  ;;  %v4070_v37 = vadd.f32 %v7325_v58, %v4069_v7 }
 0xf1c   : > { %4111 = vst.msk [vmem:[%s7333_s23 + $0x70] sm:$0xff] %vm460_vm0, %v4095_v51  ;;  %v4096_v55 = vadd.f32 %v5427_v39, %v4078_v59 }
 0xf1d   : > { %4109 = vst.msk [vmem:[%s7333_s23 + $0x60] sm:$0xff] %vm460_vm0, %v4093_v44  ;;  %v4094_v56 = vadd.f32 %v5428_v46, %v4070_v37 }
 0xf1e   : > { %4112 = vst.msk [vmem:[%s7333_s23 + $0x78] sm:$0xff] %vm460_vm0, %v4096_v55 }
 0xf1f   : > { %4110 = vst.msk [vmem:[%s7333_s23 + $0x68] sm:$0xff] %vm460_vm0, %v4094_v56 }
 0xf20 PF: > { %s23_s25 = sadd.s32 1, %s5435_s25  }
 0xf21   : > { %p20_p4 = scmp.ge.s32.totalorder %s23_s25, 4  }
 0xf23   :  { %22 = sbr.rel (!%p20_p4) target bundleno = 1 (0x1), region = 102 }

</bundles_post_ra>
